<compile_context>
chip_gen: v5e
topology: v5e:2x2
jax: 0.10.0
libtpu: 0.0.40
codegen_flags: <defaults>
</compile_context>

<pallas_src>
import jax
import jax.numpy as jnp
from jax import lax
from jax.experimental import pallas as pl
from jax.experimental.pallas import tpu as pltpu

EPS = 1e-5

H = 4
W = 4
IN_C = 28
HHHH1111 = 10     # out_1 classes
HHHH2222 = 32     # out_2 hidden
hhhhh33333 = 8    # out_2 outputs

FC1_PAD = 16      # fc1 fout (10) padded to a bf16 sublane multiple

# (cin, cout, n_res) for layer1/2/3
LAYER_CFG = ((IN_C, 128, 3), (128, 256, 5), (256, 128, 3))

# ------- bias-pack row indices (one f32 (N_BIAS_ROWS, 256) array) ---------- #
_bases = []
_row = 0
for _cin, _cout, _nres in LAYER_CFG:
    _bases.append(_row)
    _row += 1 + 2 * _nres
B_L1, B_L2, B_L3 = _bases
B_HEADS = _row
B_FC1 = _row + 1
B_FC21 = _row + 2
B_FC22 = _row + 3
N_BIAS_ROWS = _row + 4

_VMEM = pl.BlockSpec(memory_space=pltpu.MemorySpace.VMEM)

NT = (((1,), (1,)), ((), ()))   # A @ B^T


# ------------------------------ fused kernel ------------------------------- #

def _net_kernel(x_ref,
                l1hw_ref, l1rw_ref,
                l2hw_ref, l2rw_ref,
                l3hw_ref, l3rw_ref,
                hdw_ref, fc1w_ref, fc21w_ref, fc22w_ref,
                b_ref,
                o1_ref, o2_ref):
    """Whole Net forward: trunk + merged head convs + both FC tails."""
    N, _, HW = x_ref.shape
    f32 = jnp.float32
    bf16 = jnp.bfloat16

    def mm(a, w):
        # bf16 x bf16 MXU matmul with f32 accumulation; activations stay f32.
        return jnp.dot(a.astype(bf16), w, preferred_element_type=f32)

    def bias(row, width):
        return b_ref[row:row + 1, 0:width]          # (1, width) f32

    def res_chain(a, rw_ref, base, cout):
        # Unrolled chain of ResidualBlocks (weights stacked on leading axis).
        for i in range(rw_ref.shape[0]):
            h = jnp.maximum(mm(a, rw_ref[i, 0]) + bias(base + 1 + 2 * i, cout), 0.0)
            y = mm(h, rw_ref[i, 1]) + bias(base + 2 + 2 * i, cout)
            a = jnp.maximum(a + y, 0.0)
        return a

    # ---- layer1: in-kernel NCHW handling.  x_ref[n] is (C_in, HW); a tiny
    # f32 2-D transpose gives the (HW, C_in) pixel-major activation per batch.
    w1 = l1hw_ref[...]                               # (C_in, 128) bf16
    c1 = l1hw_ref.shape[1]
    a = jnp.concatenate(
        [mm(jnp.transpose(x_ref[n], (1, 0)), w1) for n in range(N)], axis=0)
    a = jnp.maximum(a + bias(B_L1, c1), 0.0)         # (N*HW, 128)
    a = res_chain(a, l1rw_ref, B_L1, c1)

    # ---- layer2 / layer3
    c2 = l2hw_ref.shape[1]
    a = jnp.maximum(mm(a, l2hw_ref[...]) + bias(B_L2, c2), 0.0)
    a = res_chain(a, l2rw_ref, B_L2, c2)
    c3 = l3hw_ref.shape[1]
    a = jnp.maximum(mm(a, l3hw_ref[...]) + bias(B_L3, c3), 0.0)
    a = res_chain(a, l3rw_ref, B_L3, c3)

    # ---- merged out_1 / out_2 head convs (+BN+ReLU).  cols [0:128] -> out_1
    # branch, [128:256] -> out_2 branch (both branches have ReLU in the spec).
    hh = jnp.maximum(mm(a, hdw_ref[...]) + bias(B_HEADS, 2 * c3), 0.0)  # (N*HW, 256)

    # ---- FC tails as an accumulation over the HW spatial positions (no
    # flatten / lane-relayout).  fc weights are (HW, fout, 128) bf16 -> NT dot.
    f1p = fc1w_ref.shape[1]                          # padded fc1 fout (16)
    f2 = fc21w_ref.shape[1]                          # 32
    acc1 = jnp.zeros((N, f1p), f32)
    acc2 = jnp.zeros((N, f2), f32)
    for hw in range(HW):
        s = jnp.concatenate(
            [hh[n * HW + hw:n * HW + hw + 1, :] for n in range(N)], axis=0)  # (N, 256)
        s1 = s[:, 0:c3].astype(bf16)
        s2 = s[:, c3:2 * c3].astype(bf16)
        acc1 = acc1 + lax.dot_general(s1, fc1w_ref[hw], NT,
                                      preferred_element_type=f32)
        acc2 = acc2 + lax.dot_general(s2, fc21w_ref[hw], NT,
                                      preferred_element_type=f32)

    # out_1: Linear -> LogSoftmax (stabilized)
    y1 = acc1[:, 0:HHHH1111] + bias(B_FC1, HHHH1111)
    m = jnp.max(y1, axis=-1, keepdims=True)
    lse = jnp.log(jnp.sum(jnp.exp(y1 - m), axis=-1, keepdims=True)) + m
    o1_ref[...] = y1 - lse

    # out_2: Linear -> ReLU -> Linear -> Tanh
    h2 = jnp.maximum(acc2 + bias(B_FC21, HHHH2222), 0.0)
    y2 = mm(h2, fc22w_ref[...]) + bias(B_FC22, hhhhh33333)
    o2_ref[...] = jnp.tanh(y2)


@jax.jit
def net_forward(params, x_nchw):
    N = x_nchw.shape[0]
    x = x_nchw.reshape(N, IN_C, H * W)               # free metadata reshape
    args = (x,
            params["l1_head_w"], params["l1_res_w"],
            params["l2_head_w"], params["l2_res_w"],
            params["l3_head_w"], params["l3_res_w"],
            params["heads_w"],
            params["fc1_w"], params["fc21_w"], params["fc22_w"],
            params["bias"])
    return pl.pallas_call(
        _net_kernel,
        out_shape=(jax.ShapeDtypeStruct((N, HHHH1111), jnp.float32),
                   jax.ShapeDtypeStruct((N, hhhhh33333), jnp.float32)),
        in_specs=[_VMEM] * len(args),
        out_specs=(_VMEM, _VMEM),
    )(*args)


# --------------------------- parameter construction ------------------------ #

def fold_conv_bn(key, cin, cout):
    """Deterministic Conv2d(1x1) + BatchNorm2d(eval) params, folded to W, b."""
    k1, k2, k3, k4, k5, k6 = jax.random.split(key, 6)
    wc = jax.random.normal(k1, (cout, cin), jnp.float32) * 0.05
    bc = jax.random.normal(k2, (cout,), jnp.float32) * 0.05
    gamma = 1.0 + 0.1 * jax.random.normal(k3, (cout,), jnp.float32)
    beta = 0.1 * jax.random.normal(k4, (cout,), jnp.float32)
    mean = 0.1 * jax.random.normal(k5, (cout,), jnp.float32)
    var = 1.0 + 0.1 * jnp.abs(jax.random.normal(k6, (cout,), jnp.float32))
    scale = gamma / jnp.sqrt(var + EPS)
    w_fold = wc.T * scale[None, :]                   # (cin, cout)
    b_fold = (scale * (bc - mean) + beta)[None, :]   # (1, cout)
    return w_fold, b_fold


def make_linear(key, fin, fout):
    k1, k2 = jax.random.split(key)
    w = jax.random.normal(k1, (fout, fin), jnp.float32) * 0.02   # torch (out, in)
    b = jax.random.normal(k2, (fout,), jnp.float32) * 0.02
    return w, b[None, :]


def _fc_weight_nt(w_torch, fout_pad):
    """Torch (fout, 128*H*W) Linear weight -> (HW, fout_pad, 128) bf16.

    Folds the PyTorch NCHW Flatten (input index = c*HW + hw) into the weight
    layout used by the kernel's per-hw NT matmul accumulation.
    """
    fout = w_torch.shape[0]
    w3 = w_torch.reshape(fout, 128, H * W)           # (fout, c, hw)
    w3 = jnp.transpose(w3, (2, 0, 1))                # (hw, fout, c)
    if fout_pad > fout:
        w3 = jnp.pad(w3, ((0, 0), (0, fout_pad - fout), (0, 0)))
    return w3.astype(jnp.bfloat16)


def make_params(key):
    bias_rows = []

    def add_bias(b):                                  # b: (1, width)
        row = jnp.zeros((1, 256), jnp.float32).at[:, :b.shape[1]].set(b)
        bias_rows.append(row)

    layer_ws = []
    for cin, cout, n_res in LAYER_CFG:
        key, kh = jax.random.split(key)
        hw_, hb = fold_conv_bn(kh, cin, cout)
        add_bias(hb)
        rws = []
        for _ in range(n_res):
            key, ka, kb = jax.random.split(key, 3)
            w1, b1 = fold_conv_bn(ka, cout, cout)
            w2, b2 = fold_conv_bn(kb, cout, cout)
            add_bias(b1)
            add_bias(b2)
            rws.append(jnp.stack([w1, w2]))           # (2, cout, cout)
        layer_ws.append((hw_.astype(jnp.bfloat16),
                         jnp.stack(rws).astype(jnp.bfloat16)))
    (l1hw, l1rw), (l2hw, l2rw), (l3hw, l3rw) = layer_ws

    # merged out_1 / out_2 head convs (+BN)
    key, k1, k2 = jax.random.split(key, 3)
    w1c, b1c = fold_conv_bn(k1, 128, 128)
    w2c, b2c = fold_conv_bn(k2, 128, 128)
    heads_w = jnp.concatenate([w1c, w2c], axis=1).astype(jnp.bfloat16)  # (128, 256)
    add_bias(jnp.concatenate([b1c, b2c], axis=1))

    # FC tails
    feat = 128 * H * W
    key, k3, k4, k5 = jax.random.split(key, 4)
    fc1_wt, fc1_b = make_linear(k3, feat, HHHH1111)
    fc21_wt, fc21_b = make_linear(k4, feat, HHHH2222)
    fc22_wt, fc22_b = make_linear(k5, HHHH2222, hhhhh33333)
    add_bias(fc1_b)
    add_bias(fc21_b)
    add_bias(fc22_b)

    bias_pack = jnp.concatenate(bias_rows, axis=0)    # (N_BIAS_ROWS, 256) f32
    assert bias_pack.shape[0] == N_BIAS_ROWS

    return dict(
        l1_head_w=l1hw, l1_res_w=l1rw,
        l2_head_w=l2hw, l2_res_w=l2rw,
        l3_head_w=l3hw, l3_res_w=l3rw,
        heads_w=heads_w,
        fc1_w=_fc_weight_nt(fc1_wt, FC1_PAD),         # (HW, 16, 128) bf16
        fc21_w=_fc_weight_nt(fc21_wt, HHHH2222),      # (HW, 32, 128) bf16
        fc22_w=fc22_wt.T.astype(jnp.bfloat16),        # (32, 8) bf16
        bias=bias_pack,
    )


# ------------------------------ pure-JAX reference ------------------------- #

def net_forward_ref(params, x_nchw):
    """Pure-JAX reference with the identical folded parameters / dtype flow."""
    N = x_nchw.shape[0]
    bias = params["bias"]

    def b(row, width):
        return bias[row:row + 1, :width]

    def mm(a, w):
        return jnp.dot(a.astype(jnp.bfloat16), w, preferred_element_type=jnp.float32)

    def res_chain(a, rw, base, cout):
        for i in range(rw.shape[0]):
            h = jnp.maximum(mm(a, rw[i, 0]) + b(base + 1 + 2 * i, cout), 0.0)
            y = mm(h, rw[i, 1]) + b(base + 2 + 2 * i, cout)
            a = jnp.maximum(a + y, 0.0)
        return a

    x = jnp.transpose(x_nchw, (0, 2, 3, 1)).reshape(N * H * W, IN_C)
    a = jnp.maximum(mm(x, params["l1_head_w"]) + b(B_L1, 128), 0.0)
    a = res_chain(a, params["l1_res_w"], B_L1, 128)
    a = jnp.maximum(mm(a, params["l2_head_w"]) + b(B_L2, 256), 0.0)
    a = res_chain(a, params["l2_res_w"], B_L2, 256)
    a = jnp.maximum(mm(a, params["l3_head_w"]) + b(B_L3, 128), 0.0)
    a = res_chain(a, params["l3_res_w"], B_L3, 128)
    hh = jnp.maximum(mm(a, params["heads_w"]) + b(B_HEADS, 256), 0.0)

    hh3 = hh.reshape(N, H * W, 256)
    s1 = hh3[:, :, 0:128].astype(jnp.bfloat16)
    s2 = hh3[:, :, 128:256].astype(jnp.bfloat16)
    y1 = jnp.einsum("nkc,kfc->nf", s1, params["fc1_w"],
                    preferred_element_type=jnp.float32)[:, :HHHH1111] + b(B_FC1, HHHH1111)
    out1 = jax.nn.log_softmax(y1, axis=-1)
    h2 = jnp.maximum(jnp.einsum("nkc,kfc->nf", s2, params["fc21_w"],
                                preferred_element_type=jnp.float32)
                     + b(B_FC21, HHHH2222), 0.0)
    out2 = jnp.tanh(mm(h2, params["fc22_w"]) + b(B_FC22, hhhhh33333))
    return out1, out2


# ----------------------------------- main ----------------------------------- #

if __name__ == "__main__":
    key = jax.random.PRNGKey(0)
    key, kx, kp = jax.random.split(key, 3)

    # input: NCHW, batch=2, channels=28 (required by layer1), spatial 4x4
    x = jax.random.normal(kx, (2, IN_C, H, W), jnp.float32)
    params = make_params(kp)

    out1, out2 = net_forward(params, x)
    jax.block_until_ready((out1, out2))

    assert out1.shape == (2, HHHH1111)
    assert out2.shape == (2, hhhhh33333)
    assert bool(jnp.all(jnp.isfinite(out1))) and bool(jnp.all(jnp.isfinite(out2)))
    # log-softmax rows must (approximately) sum to 1 in prob space
    assert bool(jnp.allclose(jnp.sum(jnp.exp(out1), axis=1), 1.0, atol=1e-4))

    # cross-check the fused kernel against a pure-JAX reference (same params)
    ref1, ref2 = net_forward_ref(params, x)
    assert bool(jnp.allclose(out1, ref1, atol=3e-2, rtol=3e-2))
    assert bool(jnp.allclose(out2, ref2, atol=3e-2, rtol=3e-2))

    print("KERNEL_OK")
</pallas_src>

<mosaic_0001>
module attributes {stable_mosaic.version = 11 : i64} {
  func.func @_net_kernel(%arg0: memref<2x28x16xf32, #tpu.memory_space<vmem>>, %arg1: memref<28x128xbf16, #tpu.memory_space<vmem>>, %arg2: memref<3x2x128x128xbf16, #tpu.memory_space<vmem>>, %arg3: memref<128x256xbf16, #tpu.memory_space<vmem>>, %arg4: memref<5x2x256x256xbf16, #tpu.memory_space<vmem>>, %arg5: memref<256x128xbf16, #tpu.memory_space<vmem>>, %arg6: memref<3x2x128x128xbf16, #tpu.memory_space<vmem>>, %arg7: memref<128x256xbf16, #tpu.memory_space<vmem>>, %arg8: memref<16x16x128xbf16, #tpu.memory_space<vmem>>, %arg9: memref<16x32x128xbf16, #tpu.memory_space<vmem>>, %arg10: memref<32x8xbf16, #tpu.memory_space<vmem>>, %arg11: memref<29x256xf32, #tpu.memory_space<vmem>>, %arg12: memref<2x10xf32, #tpu.memory_space<vmem>>, %arg13: memref<2x8xf32, #tpu.memory_space<vmem>>) attributes {dimension_semantics = [], scalar_prefetch = 0 : i64, scratch_operands = 0 : i64, tpu.core_type = #tpu.core_type<tc>} {
    %c0 = arith.constant 0 : index
    %c0_0 = arith.constant 0 : index
    %0 = vector.load %arg1[%c0, %c0_0] : memref<28x128xbf16, #tpu.memory_space<vmem>>, vector<28x128xbf16>
    %c0_1 = arith.constant 0 : index
    %c0_2 = arith.constant 0 : index
    %c0_3 = arith.constant 0 : index
    %1 = vector.load %arg0[%c0_1, %c0_2, %c0_3] : memref<2x28x16xf32, #tpu.memory_space<vmem>>, vector<1x28x16xf32>
    %2 = vector.shape_cast %1 : vector<1x28x16xf32> to vector<28x16xf32>
    %3 = tpu.transpose %2, [1, 0] : vector<28x16xf32> -> vector<16x28xf32>
    %4 = arith.truncf %3 : vector<16x28xf32> to vector<16x28xbf16>
    %cst = arith.constant dense<0.000000e+00> : vector<16x128xf32>
    %5 = tpu.matmul %4, %0, %cst {dimension_numbers = #tpu.dot_dimension_numbers<[1], [0], [0], [1], [0, 0, 1, 1], [], []>} : vector<16x28xbf16>, vector<28x128xbf16>, vector<16x128xf32> -> vector<16x128xf32>
    %c1 = arith.constant 1 : index
    %c0_4 = arith.constant 0 : index
    %c0_5 = arith.constant 0 : index
    %6 = vector.load %arg0[%c1, %c0_4, %c0_5] : memref<2x28x16xf32, #tpu.memory_space<vmem>>, vector<1x28x16xf32>
    %7 = vector.shape_cast %6 : vector<1x28x16xf32> to vector<28x16xf32>
    %8 = tpu.transpose %7, [1, 0] : vector<28x16xf32> -> vector<16x28xf32>
    %9 = arith.truncf %8 : vector<16x28xf32> to vector<16x28xbf16>
    %cst_6 = arith.constant dense<0.000000e+00> : vector<16x128xf32>
    %10 = tpu.matmul %9, %0, %cst_6 {dimension_numbers = #tpu.dot_dimension_numbers<[1], [0], [0], [1], [0, 0, 1, 1], [], []>} : vector<16x28xbf16>, vector<28x128xbf16>, vector<16x128xf32> -> vector<16x128xf32>
    %11 = tpu.concatenate %5, %10 in 0 : vector<16x128xf32>, vector<16x128xf32> -> vector<32x128xf32>
    %c0_7 = arith.constant 0 : index
    %c0_8 = arith.constant 0 : index
    %12 = vector.load %arg11[%c0_7, %c0_8] : memref<29x256xf32, #tpu.memory_space<vmem>>, vector<1x128xf32>
    %13 = vector.broadcast %12 : vector<1x128xf32> to vector<32x128xf32>
    %14 = arith.addf %11, %13 : vector<32x128xf32>
    %cst_9 = arith.constant 0.000000e+00 : f32
    %15 = vector.broadcast %cst_9 : f32 to vector<32x128xf32>
    %16 = arith.maximumf %14, %15 : vector<32x128xf32>
    %c0_10 = arith.constant 0 : index
    %c0_11 = arith.constant 0 : index
    %c0_12 = arith.constant 0 : index
    %c0_13 = arith.constant 0 : index
    %17 = vector.load %arg2[%c0_10, %c0_11, %c0_12, %c0_13] : memref<3x2x128x128xbf16, #tpu.memory_space<vmem>>, vector<1x1x128x128xbf16>
    %18 = vector.shape_cast %17 : vector<1x1x128x128xbf16> to vector<128x128xbf16>
    %19 = arith.truncf %16 : vector<32x128xf32> to vector<32x128xbf16>
    %cst_14 = arith.constant dense<0.000000e+00> : vector<32x128xf32>
    %20 = tpu.matmul %19, %18, %cst_14 {dimension_numbers = #tpu.dot_dimension_numbers<[1], [0], [0], [1], [0, 0, 1, 1], [], []>} : vector<32x128xbf16>, vector<128x128xbf16>, vector<32x128xf32> -> vector<32x128xf32>
    %c1_15 = arith.constant 1 : index
    %c0_16 = arith.constant 0 : index
    %21 = vector.load %arg11[%c1_15, %c0_16] : memref<29x256xf32, #tpu.memory_space<vmem>>, vector<1x128xf32>
    %22 = vector.broadcast %21 : vector<1x128xf32> to vector<32x128xf32>
    %23 = arith.addf %20, %22 : vector<32x128xf32>
    %cst_17 = arith.constant 0.000000e+00 : f32
    %24 = vector.broadcast %cst_17 : f32 to vector<32x128xf32>
    %25 = arith.maximumf %23, %24 : vector<32x128xf32>
    %c0_18 = arith.constant 0 : index
    %c1_19 = arith.constant 1 : index
    %c0_20 = arith.constant 0 : index
    %c0_21 = arith.constant 0 : index
    %26 = vector.load %arg2[%c0_18, %c1_19, %c0_20, %c0_21] : memref<3x2x128x128xbf16, #tpu.memory_space<vmem>>, vector<1x1x128x128xbf16>
    %27 = vector.shape_cast %26 : vector<1x1x128x128xbf16> to vector<128x128xbf16>
    %28 = arith.truncf %25 : vector<32x128xf32> to vector<32x128xbf16>
    %cst_22 = arith.constant dense<0.000000e+00> : vector<32x128xf32>
    %29 = tpu.matmul %28, %27, %cst_22 {dimension_numbers = #tpu.dot_dimension_numbers<[1], [0], [0], [1], [0, 0, 1, 1], [], []>} : vector<32x128xbf16>, vector<128x128xbf16>, vector<32x128xf32> -> vector<32x128xf32>
    %c2 = arith.constant 2 : index
    %c0_23 = arith.constant 0 : index
    %30 = vector.load %arg11[%c2, %c0_23] : memref<29x256xf32, #tpu.memory_space<vmem>>, vector<1x128xf32>
    %31 = vector.broadcast %30 : vector<1x128xf32> to vector<32x128xf32>
    %32 = arith.addf %29, %31 : vector<32x128xf32>
    %33 = arith.addf %16, %32 : vector<32x128xf32>
    %cst_24 = arith.constant 0.000000e+00 : f32
    %34 = vector.broadcast %cst_24 : f32 to vector<32x128xf32>
    %35 = arith.maximumf %33, %34 : vector<32x128xf32>
    %c1_25 = arith.constant 1 : index
    %c0_26 = arith.constant 0 : index
    %c0_27 = arith.constant 0 : index
    %c0_28 = arith.constant 0 : index
    %36 = vector.load %arg2[%c1_25, %c0_26, %c0_27, %c0_28] : memref<3x2x128x128xbf16, #tpu.memory_space<vmem>>, vector<1x1x128x128xbf16>
    %37 = vector.shape_cast %36 : vector<1x1x128x128xbf16> to vector<128x128xbf16>
    %38 = arith.truncf %35 : vector<32x128xf32> to vector<32x128xbf16>
    %cst_29 = arith.constant dense<0.000000e+00> : vector<32x128xf32>
    %39 = tpu.matmul %38, %37, %cst_29 {dimension_numbers = #tpu.dot_dimension_numbers<[1], [0], [0], [1], [0, 0, 1, 1], [], []>} : vector<32x128xbf16>, vector<128x128xbf16>, vector<32x128xf32> -> vector<32x128xf32>
    %c3 = arith.constant 3 : index
    %c0_30 = arith.constant 0 : index
    %40 = vector.load %arg11[%c3, %c0_30] : memref<29x256xf32, #tpu.memory_space<vmem>>, vector<1x128xf32>
    %41 = vector.broadcast %40 : vector<1x128xf32> to vector<32x128xf32>
    %42 = arith.addf %39, %41 : vector<32x128xf32>
    %cst_31 = arith.constant 0.000000e+00 : f32
    %43 = vector.broadcast %cst_31 : f32 to vector<32x128xf32>
    %44 = arith.maximumf %42, %43 : vector<32x128xf32>
    %c1_32 = arith.constant 1 : index
    %c1_33 = arith.constant 1 : index
    %c0_34 = arith.constant 0 : index
    %c0_35 = arith.constant 0 : index
    %45 = vector.load %arg2[%c1_32, %c1_33, %c0_34, %c0_35] : memref<3x2x128x128xbf16, #tpu.memory_space<vmem>>, vector<1x1x128x128xbf16>
    %46 = vector.shape_cast %45 : vector<1x1x128x128xbf16> to vector<128x128xbf16>
    %47 = arith.truncf %44 : vector<32x128xf32> to vector<32x128xbf16>
    %cst_36 = arith.constant dense<0.000000e+00> : vector<32x128xf32>
    %48 = tpu.matmul %47, %46, %cst_36 {dimension_numbers = #tpu.dot_dimension_numbers<[1], [0], [0], [1], [0, 0, 1, 1], [], []>} : vector<32x128xbf16>, vector<128x128xbf16>, vector<32x128xf32> -> vector<32x128xf32>
    %c4 = arith.constant 4 : index
    %c0_37 = arith.constant 0 : index
    %49 = vector.load %arg11[%c4, %c0_37] : memref<29x256xf32, #tpu.memory_space<vmem>>, vector<1x128xf32>
    %50 = vector.broadcast %49 : vector<1x128xf32> to vector<32x128xf32>
    %51 = arith.addf %48, %50 : vector<32x128xf32>
    %52 = arith.addf %35, %51 : vector<32x128xf32>
    %cst_38 = arith.constant 0.000000e+00 : f32
    %53 = vector.broadcast %cst_38 : f32 to vector<32x128xf32>
    %54 = arith.maximumf %52, %53 : vector<32x128xf32>
    %c2_39 = arith.constant 2 : index
    %c0_40 = arith.constant 0 : index
    %c0_41 = arith.constant 0 : index
    %c0_42 = arith.constant 0 : index
    %55 = vector.load %arg2[%c2_39, %c0_40, %c0_41, %c0_42] : memref<3x2x128x128xbf16, #tpu.memory_space<vmem>>, vector<1x1x128x128xbf16>
    %56 = vector.shape_cast %55 : vector<1x1x128x128xbf16> to vector<128x128xbf16>
    %57 = arith.truncf %54 : vector<32x128xf32> to vector<32x128xbf16>
    %cst_43 = arith.constant dense<0.000000e+00> : vector<32x128xf32>
    %58 = tpu.matmul %57, %56, %cst_43 {dimension_numbers = #tpu.dot_dimension_numbers<[1], [0], [0], [1], [0, 0, 1, 1], [], []>} : vector<32x128xbf16>, vector<128x128xbf16>, vector<32x128xf32> -> vector<32x128xf32>
    %c5 = arith.constant 5 : index
    %c0_44 = arith.constant 0 : index
    %59 = vector.load %arg11[%c5, %c0_44] : memref<29x256xf32, #tpu.memory_space<vmem>>, vector<1x128xf32>
    %60 = vector.broadcast %59 : vector<1x128xf32> to vector<32x128xf32>
    %61 = arith.addf %58, %60 : vector<32x128xf32>
    %cst_45 = arith.constant 0.000000e+00 : f32
    %62 = vector.broadcast %cst_45 : f32 to vector<32x128xf32>
    %63 = arith.maximumf %61, %62 : vector<32x128xf32>
    %c2_46 = arith.constant 2 : index
    %c1_47 = arith.constant 1 : index
    %c0_48 = arith.constant 0 : index
    %c0_49 = arith.constant 0 : index
    %64 = vector.load %arg2[%c2_46, %c1_47, %c0_48, %c0_49] : memref<3x2x128x128xbf16, #tpu.memory_space<vmem>>, vector<1x1x128x128xbf16>
    %65 = vector.shape_cast %64 : vector<1x1x128x128xbf16> to vector<128x128xbf16>
    %66 = arith.truncf %63 : vector<32x128xf32> to vector<32x128xbf16>
    %cst_50 = arith.constant dense<0.000000e+00> : vector<32x128xf32>
    %67 = tpu.matmul %66, %65, %cst_50 {dimension_numbers = #tpu.dot_dimension_numbers<[1], [0], [0], [1], [0, 0, 1, 1], [], []>} : vector<32x128xbf16>, vector<128x128xbf16>, vector<32x128xf32> -> vector<32x128xf32>
    %c6 = arith.constant 6 : index
    %c0_51 = arith.constant 0 : index
    %68 = vector.load %arg11[%c6, %c0_51] : memref<29x256xf32, #tpu.memory_space<vmem>>, vector<1x128xf32>
    %69 = vector.broadcast %68 : vector<1x128xf32> to vector<32x128xf32>
    %70 = arith.addf %67, %69 : vector<32x128xf32>
    %71 = arith.addf %54, %70 : vector<32x128xf32>
    %cst_52 = arith.constant 0.000000e+00 : f32
    %72 = vector.broadcast %cst_52 : f32 to vector<32x128xf32>
    %73 = arith.maximumf %71, %72 : vector<32x128xf32>
    %c0_53 = arith.constant 0 : index
    %c0_54 = arith.constant 0 : index
    %74 = vector.load %arg3[%c0_53, %c0_54] : memref<128x256xbf16, #tpu.memory_space<vmem>>, vector<128x256xbf16>
    %75 = arith.truncf %73 : vector<32x128xf32> to vector<32x128xbf16>
    %cst_55 = arith.constant dense<0.000000e+00> : vector<32x256xf32>
    %76 = tpu.matmul %75, %74, %cst_55 {dimension_numbers = #tpu.dot_dimension_numbers<[1], [0], [0], [1], [0, 0, 1, 1], [], []>} : vector<32x128xbf16>, vector<128x256xbf16>, vector<32x256xf32> -> vector<32x256xf32>
    %c7 = arith.constant 7 : index
    %c0_56 = arith.constant 0 : index
    %77 = vector.load %arg11[%c7, %c0_56] : memref<29x256xf32, #tpu.memory_space<vmem>>, vector<1x256xf32>
    %78 = vector.broadcast %77 : vector<1x256xf32> to vector<32x256xf32>
    %79 = arith.addf %76, %78 : vector<32x256xf32>
    %cst_57 = arith.constant 0.000000e+00 : f32
    %80 = vector.broadcast %cst_57 : f32 to vector<32x256xf32>
    %81 = arith.maximumf %79, %80 : vector<32x256xf32>
    %c0_58 = arith.constant 0 : index
    %c0_59 = arith.constant 0 : index
    %c0_60 = arith.constant 0 : index
    %c0_61 = arith.constant 0 : index
    %82 = vector.load %arg4[%c0_58, %c0_59, %c0_60, %c0_61] : memref<5x2x256x256xbf16, #tpu.memory_space<vmem>>, vector<1x1x256x256xbf16>
    %83 = vector.shape_cast %82 : vector<1x1x256x256xbf16> to vector<256x256xbf16>
    %84 = arith.truncf %81 : vector<32x256xf32> to vector<32x256xbf16>
    %cst_62 = arith.constant dense<0.000000e+00> : vector<32x256xf32>
    %85 = tpu.matmul %84, %83, %cst_62 {dimension_numbers = #tpu.dot_dimension_numbers<[1], [0], [0], [1], [0, 0, 1, 1], [], []>} : vector<32x256xbf16>, vector<256x256xbf16>, vector<32x256xf32> -> vector<32x256xf32>
    %c8 = arith.constant 8 : index
    %c0_63 = arith.constant 0 : index
    %86 = vector.load %arg11[%c8, %c0_63] : memref<29x256xf32, #tpu.memory_space<vmem>>, vector<1x256xf32>
    %87 = vector.broadcast %86 : vector<1x256xf32> to vector<32x256xf32>
    %88 = arith.addf %85, %87 : vector<32x256xf32>
    %cst_64 = arith.constant 0.000000e+00 : f32
    %89 = vector.broadcast %cst_64 : f32 to vector<32x256xf32>
    %90 = arith.maximumf %88, %89 : vector<32x256xf32>
    %c0_65 = arith.constant 0 : index
    %c1_66 = arith.constant 1 : index
    %c0_67 = arith.constant 0 : index
    %c0_68 = arith.constant 0 : index
    %91 = vector.load %arg4[%c0_65, %c1_66, %c0_67, %c0_68] : memref<5x2x256x256xbf16, #tpu.memory_space<vmem>>, vector<1x1x256x256xbf16>
    %92 = vector.shape_cast %91 : vector<1x1x256x256xbf16> to vector<256x256xbf16>
    %93 = arith.truncf %90 : vector<32x256xf32> to vector<32x256xbf16>
    %cst_69 = arith.constant dense<0.000000e+00> : vector<32x256xf32>
    %94 = tpu.matmul %93, %92, %cst_69 {dimension_numbers = #tpu.dot_dimension_numbers<[1], [0], [0], [1], [0, 0, 1, 1], [], []>} : vector<32x256xbf16>, vector<256x256xbf16>, vector<32x256xf32> -> vector<32x256xf32>
    %c9 = arith.constant 9 : index
    %c0_70 = arith.constant 0 : index
    %95 = vector.load %arg11[%c9, %c0_70] : memref<29x256xf32, #tpu.memory_space<vmem>>, vector<1x256xf32>
    %96 = vector.broadcast %95 : vector<1x256xf32> to vector<32x256xf32>
    %97 = arith.addf %94, %96 : vector<32x256xf32>
    %98 = arith.addf %81, %97 : vector<32x256xf32>
    %cst_71 = arith.constant 0.000000e+00 : f32
    %99 = vector.broadcast %cst_71 : f32 to vector<32x256xf32>
    %100 = arith.maximumf %98, %99 : vector<32x256xf32>
    %c1_72 = arith.constant 1 : index
    %c0_73 = arith.constant 0 : index
    %c0_74 = arith.constant 0 : index
    %c0_75 = arith.constant 0 : index
    %101 = vector.load %arg4[%c1_72, %c0_73, %c0_74, %c0_75] : memref<5x2x256x256xbf16, #tpu.memory_space<vmem>>, vector<1x1x256x256xbf16>
    %102 = vector.shape_cast %101 : vector<1x1x256x256xbf16> to vector<256x256xbf16>
    %103 = arith.truncf %100 : vector<32x256xf32> to vector<32x256xbf16>
    %cst_76 = arith.constant dense<0.000000e+00> : vector<32x256xf32>
    %104 = tpu.matmul %103, %102, %cst_76 {dimension_numbers = #tpu.dot_dimension_numbers<[1], [0], [0], [1], [0, 0, 1, 1], [], []>} : vector<32x256xbf16>, vector<256x256xbf16>, vector<32x256xf32> -> vector<32x256xf32>
    %c10 = arith.constant 10 : index
    %c0_77 = arith.constant 0 : index
    %105 = vector.load %arg11[%c10, %c0_77] : memref<29x256xf32, #tpu.memory_space<vmem>>, vector<1x256xf32>
    %106 = vector.broadcast %105 : vector<1x256xf32> to vector<32x256xf32>
    %107 = arith.addf %104, %106 : vector<32x256xf32>
    %cst_78 = arith.constant 0.000000e+00 : f32
    %108 = vector.broadcast %cst_78 : f32 to vector<32x256xf32>
    %109 = arith.maximumf %107, %108 : vector<32x256xf32>
    %c1_79 = arith.constant 1 : index
    %c1_80 = arith.constant 1 : index
    %c0_81 = arith.constant 0 : index
    %c0_82 = arith.constant 0 : index
    %110 = vector.load %arg4[%c1_79, %c1_80, %c0_81, %c0_82] : memref<5x2x256x256xbf16, #tpu.memory_space<vmem>>, vector<1x1x256x256xbf16>
    %111 = vector.shape_cast %110 : vector<1x1x256x256xbf16> to vector<256x256xbf16>
    %112 = arith.truncf %109 : vector<32x256xf32> to vector<32x256xbf16>
    %cst_83 = arith.constant dense<0.000000e+00> : vector<32x256xf32>
    %113 = tpu.matmul %112, %111, %cst_83 {dimension_numbers = #tpu.dot_dimension_numbers<[1], [0], [0], [1], [0, 0, 1, 1], [], []>} : vector<32x256xbf16>, vector<256x256xbf16>, vector<32x256xf32> -> vector<32x256xf32>
    %c11 = arith.constant 11 : index
    %c0_84 = arith.constant 0 : index
    %114 = vector.load %arg11[%c11, %c0_84] : memref<29x256xf32, #tpu.memory_space<vmem>>, vector<1x256xf32>
    %115 = vector.broadcast %114 : vector<1x256xf32> to vector<32x256xf32>
    %116 = arith.addf %113, %115 : vector<32x256xf32>
    %117 = arith.addf %100, %116 : vector<32x256xf32>
    %cst_85 = arith.constant 0.000000e+00 : f32
    %118 = vector.broadcast %cst_85 : f32 to vector<32x256xf32>
    %119 = arith.maximumf %117, %118 : vector<32x256xf32>
    %c2_86 = arith.constant 2 : index
    %c0_87 = arith.constant 0 : index
    %c0_88 = arith.constant 0 : index
    %c0_89 = arith.constant 0 : index
    %120 = vector.load %arg4[%c2_86, %c0_87, %c0_88, %c0_89] : memref<5x2x256x256xbf16, #tpu.memory_space<vmem>>, vector<1x1x256x256xbf16>
    %121 = vector.shape_cast %120 : vector<1x1x256x256xbf16> to vector<256x256xbf16>
    %122 = arith.truncf %119 : vector<32x256xf32> to vector<32x256xbf16>
    %cst_90 = arith.constant dense<0.000000e+00> : vector<32x256xf32>
    %123 = tpu.matmul %122, %121, %cst_90 {dimension_numbers = #tpu.dot_dimension_numbers<[1], [0], [0], [1], [0, 0, 1, 1], [], []>} : vector<32x256xbf16>, vector<256x256xbf16>, vector<32x256xf32> -> vector<32x256xf32>
    %c12 = arith.constant 12 : index
    %c0_91 = arith.constant 0 : index
    %124 = vector.load %arg11[%c12, %c0_91] : memref<29x256xf32, #tpu.memory_space<vmem>>, vector<1x256xf32>
    %125 = vector.broadcast %124 : vector<1x256xf32> to vector<32x256xf32>
    %126 = arith.addf %123, %125 : vector<32x256xf32>
    %cst_92 = arith.constant 0.000000e+00 : f32
    %127 = vector.broadcast %cst_92 : f32 to vector<32x256xf32>
    %128 = arith.maximumf %126, %127 : vector<32x256xf32>
    %c2_93 = arith.constant 2 : index
    %c1_94 = arith.constant 1 : index
    %c0_95 = arith.constant 0 : index
    %c0_96 = arith.constant 0 : index
    %129 = vector.load %arg4[%c2_93, %c1_94, %c0_95, %c0_96] : memref<5x2x256x256xbf16, #tpu.memory_space<vmem>>, vector<1x1x256x256xbf16>
    %130 = vector.shape_cast %129 : vector<1x1x256x256xbf16> to vector<256x256xbf16>
    %131 = arith.truncf %128 : vector<32x256xf32> to vector<32x256xbf16>
    %cst_97 = arith.constant dense<0.000000e+00> : vector<32x256xf32>
    %132 = tpu.matmul %131, %130, %cst_97 {dimension_numbers = #tpu.dot_dimension_numbers<[1], [0], [0], [1], [0, 0, 1, 1], [], []>} : vector<32x256xbf16>, vector<256x256xbf16>, vector<32x256xf32> -> vector<32x256xf32>
    %c13 = arith.constant 13 : index
    %c0_98 = arith.constant 0 : index
    %133 = vector.load %arg11[%c13, %c0_98] : memref<29x256xf32, #tpu.memory_space<vmem>>, vector<1x256xf32>
    %134 = vector.broadcast %133 : vector<1x256xf32> to vector<32x256xf32>
    %135 = arith.addf %132, %134 : vector<32x256xf32>
    %136 = arith.addf %119, %135 : vector<32x256xf32>
    %cst_99 = arith.constant 0.000000e+00 : f32
    %137 = vector.broadcast %cst_99 : f32 to vector<32x256xf32>
    %138 = arith.maximumf %136, %137 : vector<32x256xf32>
    %c3_100 = arith.constant 3 : index
    %c0_101 = arith.constant 0 : index
    %c0_102 = arith.constant 0 : index
    %c0_103 = arith.constant 0 : index
    %139 = vector.load %arg4[%c3_100, %c0_101, %c0_102, %c0_103] : memref<5x2x256x256xbf16, #tpu.memory_space<vmem>>, vector<1x1x256x256xbf16>
    %140 = vector.shape_cast %139 : vector<1x1x256x256xbf16> to vector<256x256xbf16>
    %141 = arith.truncf %138 : vector<32x256xf32> to vector<32x256xbf16>
    %cst_104 = arith.constant dense<0.000000e+00> : vector<32x256xf32>
    %142 = tpu.matmul %141, %140, %cst_104 {dimension_numbers = #tpu.dot_dimension_numbers<[1], [0], [0], [1], [0, 0, 1, 1], [], []>} : vector<32x256xbf16>, vector<256x256xbf16>, vector<32x256xf32> -> vector<32x256xf32>
    %c14 = arith.constant 14 : index
    %c0_105 = arith.constant 0 : index
    %143 = vector.load %arg11[%c14, %c0_105] : memref<29x256xf32, #tpu.memory_space<vmem>>, vector<1x256xf32>
    %144 = vector.broadcast %143 : vector<1x256xf32> to vector<32x256xf32>
    %145 = arith.addf %142, %144 : vector<32x256xf32>
    %cst_106 = arith.constant 0.000000e+00 : f32
    %146 = vector.broadcast %cst_106 : f32 to vector<32x256xf32>
    %147 = arith.maximumf %145, %146 : vector<32x256xf32>
    %c3_107 = arith.constant 3 : index
    %c1_108 = arith.constant 1 : index
    %c0_109 = arith.constant 0 : index
    %c0_110 = arith.constant 0 : index
    %148 = vector.load %arg4[%c3_107, %c1_108, %c0_109, %c0_110] : memref<5x2x256x256xbf16, #tpu.memory_space<vmem>>, vector<1x1x256x256xbf16>
    %149 = vector.shape_cast %148 : vector<1x1x256x256xbf16> to vector<256x256xbf16>
    %150 = arith.truncf %147 : vector<32x256xf32> to vector<32x256xbf16>
    %cst_111 = arith.constant dense<0.000000e+00> : vector<32x256xf32>
    %151 = tpu.matmul %150, %149, %cst_111 {dimension_numbers = #tpu.dot_dimension_numbers<[1], [0], [0], [1], [0, 0, 1, 1], [], []>} : vector<32x256xbf16>, vector<256x256xbf16>, vector<32x256xf32> -> vector<32x256xf32>
    %c15 = arith.constant 15 : index
    %c0_112 = arith.constant 0 : index
    %152 = vector.load %arg11[%c15, %c0_112] : memref<29x256xf32, #tpu.memory_space<vmem>>, vector<1x256xf32>
    %153 = vector.broadcast %152 : vector<1x256xf32> to vector<32x256xf32>
    %154 = arith.addf %151, %153 : vector<32x256xf32>
    %155 = arith.addf %138, %154 : vector<32x256xf32>
    %cst_113 = arith.constant 0.000000e+00 : f32
    %156 = vector.broadcast %cst_113 : f32 to vector<32x256xf32>
    %157 = arith.maximumf %155, %156 : vector<32x256xf32>
    %c4_114 = arith.constant 4 : index
    %c0_115 = arith.constant 0 : index
    %c0_116 = arith.constant 0 : index
    %c0_117 = arith.constant 0 : index
    %158 = vector.load %arg4[%c4_114, %c0_115, %c0_116, %c0_117] : memref<5x2x256x256xbf16, #tpu.memory_space<vmem>>, vector<1x1x256x256xbf16>
    %159 = vector.shape_cast %158 : vector<1x1x256x256xbf16> to vector<256x256xbf16>
    %160 = arith.truncf %157 : vector<32x256xf32> to vector<32x256xbf16>
    %cst_118 = arith.constant dense<0.000000e+00> : vector<32x256xf32>
    %161 = tpu.matmul %160, %159, %cst_118 {dimension_numbers = #tpu.dot_dimension_numbers<[1], [0], [0], [1], [0, 0, 1, 1], [], []>} : vector<32x256xbf16>, vector<256x256xbf16>, vector<32x256xf32> -> vector<32x256xf32>
    %c16 = arith.constant 16 : index
    %c0_119 = arith.constant 0 : index
    %162 = vector.load %arg11[%c16, %c0_119] : memref<29x256xf32, #tpu.memory_space<vmem>>, vector<1x256xf32>
    %163 = vector.broadcast %162 : vector<1x256xf32> to vector<32x256xf32>
    %164 = arith.addf %161, %163 : vector<32x256xf32>
    %cst_120 = arith.constant 0.000000e+00 : f32
    %165 = vector.broadcast %cst_120 : f32 to vector<32x256xf32>
    %166 = arith.maximumf %164, %165 : vector<32x256xf32>
    %c4_121 = arith.constant 4 : index
    %c1_122 = arith.constant 1 : index
    %c0_123 = arith.constant 0 : index
    %c0_124 = arith.constant 0 : index
    %167 = vector.load %arg4[%c4_121, %c1_122, %c0_123, %c0_124] : memref<5x2x256x256xbf16, #tpu.memory_space<vmem>>, vector<1x1x256x256xbf16>
    %168 = vector.shape_cast %167 : vector<1x1x256x256xbf16> to vector<256x256xbf16>
    %169 = arith.truncf %166 : vector<32x256xf32> to vector<32x256xbf16>
    %cst_125 = arith.constant dense<0.000000e+00> : vector<32x256xf32>
    %170 = tpu.matmul %169, %168, %cst_125 {dimension_numbers = #tpu.dot_dimension_numbers<[1], [0], [0], [1], [0, 0, 1, 1], [], []>} : vector<32x256xbf16>, vector<256x256xbf16>, vector<32x256xf32> -> vector<32x256xf32>
    %c17 = arith.constant 17 : index
    %c0_126 = arith.constant 0 : index
    %171 = vector.load %arg11[%c17, %c0_126] : memref<29x256xf32, #tpu.memory_space<vmem>>, vector<1x256xf32>
    %172 = vector.broadcast %171 : vector<1x256xf32> to vector<32x256xf32>
    %173 = arith.addf %170, %172 : vector<32x256xf32>
    %174 = arith.addf %157, %173 : vector<32x256xf32>
    %cst_127 = arith.constant 0.000000e+00 : f32
    %175 = vector.broadcast %cst_127 : f32 to vector<32x256xf32>
    %176 = arith.maximumf %174, %175 : vector<32x256xf32>
    %c0_128 = arith.constant 0 : index
    %c0_129 = arith.constant 0 : index
    %177 = vector.load %arg5[%c0_128, %c0_129] : memref<256x128xbf16, #tpu.memory_space<vmem>>, vector<256x128xbf16>
    %178 = arith.truncf %176 : vector<32x256xf32> to vector<32x256xbf16>
    %cst_130 = arith.constant dense<0.000000e+00> : vector<32x128xf32>
    %179 = tpu.matmul %178, %177, %cst_130 {dimension_numbers = #tpu.dot_dimension_numbers<[1], [0], [0], [1], [0, 0, 1, 1], [], []>} : vector<32x256xbf16>, vector<256x128xbf16>, vector<32x128xf32> -> vector<32x128xf32>
    %c18 = arith.constant 18 : index
    %c0_131 = arith.constant 0 : index
    %180 = vector.load %arg11[%c18, %c0_131] : memref<29x256xf32, #tpu.memory_space<vmem>>, vector<1x128xf32>
    %181 = vector.broadcast %180 : vector<1x128xf32> to vector<32x128xf32>
    %182 = arith.addf %179, %181 : vector<32x128xf32>
    %cst_132 = arith.constant 0.000000e+00 : f32
    %183 = vector.broadcast %cst_132 : f32 to vector<32x128xf32>
    %184 = arith.maximumf %182, %183 : vector<32x128xf32>
    %c0_133 = arith.constant 0 : index
    %c0_134 = arith.constant 0 : index
    %c0_135 = arith.constant 0 : index
    %c0_136 = arith.constant 0 : index
    %185 = vector.load %arg6[%c0_133, %c0_134, %c0_135, %c0_136] : memref<3x2x128x128xbf16, #tpu.memory_space<vmem>>, vector<1x1x128x128xbf16>
    %186 = vector.shape_cast %185 : vector<1x1x128x128xbf16> to vector<128x128xbf16>
    %187 = arith.truncf %184 : vector<32x128xf32> to vector<32x128xbf16>
    %cst_137 = arith.constant dense<0.000000e+00> : vector<32x128xf32>
    %188 = tpu.matmul %187, %186, %cst_137 {dimension_numbers = #tpu.dot_dimension_numbers<[1], [0], [0], [1], [0, 0, 1, 1], [], []>} : vector<32x128xbf16>, vector<128x128xbf16>, vector<32x128xf32> -> vector<32x128xf32>
    %c19 = arith.constant 19 : index
    %c0_138 = arith.constant 0 : index
    %189 = vector.load %arg11[%c19, %c0_138] : memref<29x256xf32, #tpu.memory_space<vmem>>, vector<1x128xf32>
    %190 = vector.broadcast %189 : vector<1x128xf32> to vector<32x128xf32>
    %191 = arith.addf %188, %190 : vector<32x128xf32>
    %cst_139 = arith.constant 0.000000e+00 : f32
    %192 = vector.broadcast %cst_139 : f32 to vector<32x128xf32>
    %193 = arith.maximumf %191, %192 : vector<32x128xf32>
    %c0_140 = arith.constant 0 : index
    %c1_141 = arith.constant 1 : index
    %c0_142 = arith.constant 0 : index
    %c0_143 = arith.constant 0 : index
    %194 = vector.load %arg6[%c0_140, %c1_141, %c0_142, %c0_143] : memref<3x2x128x128xbf16, #tpu.memory_space<vmem>>, vector<1x1x128x128xbf16>
    %195 = vector.shape_cast %194 : vector<1x1x128x128xbf16> to vector<128x128xbf16>
    %196 = arith.truncf %193 : vector<32x128xf32> to vector<32x128xbf16>
    %cst_144 = arith.constant dense<0.000000e+00> : vector<32x128xf32>
    %197 = tpu.matmul %196, %195, %cst_144 {dimension_numbers = #tpu.dot_dimension_numbers<[1], [0], [0], [1], [0, 0, 1, 1], [], []>} : vector<32x128xbf16>, vector<128x128xbf16>, vector<32x128xf32> -> vector<32x128xf32>
    %c20 = arith.constant 20 : index
    %c0_145 = arith.constant 0 : index
    %198 = vector.load %arg11[%c20, %c0_145] : memref<29x256xf32, #tpu.memory_space<vmem>>, vector<1x128xf32>
    %199 = vector.broadcast %198 : vector<1x128xf32> to vector<32x128xf32>
    %200 = arith.addf %197, %199 : vector<32x128xf32>
    %201 = arith.addf %184, %200 : vector<32x128xf32>
    %cst_146 = arith.constant 0.000000e+00 : f32
    %202 = vector.broadcast %cst_146 : f32 to vector<32x128xf32>
    %203 = arith.maximumf %201, %202 : vector<32x128xf32>
    %c1_147 = arith.constant 1 : index
    %c0_148 = arith.constant 0 : index
    %c0_149 = arith.constant 0 : index
    %c0_150 = arith.constant 0 : index
    %204 = vector.load %arg6[%c1_147, %c0_148, %c0_149, %c0_150] : memref<3x2x128x128xbf16, #tpu.memory_space<vmem>>, vector<1x1x128x128xbf16>
    %205 = vector.shape_cast %204 : vector<1x1x128x128xbf16> to vector<128x128xbf16>
    %206 = arith.truncf %203 : vector<32x128xf32> to vector<32x128xbf16>
    %cst_151 = arith.constant dense<0.000000e+00> : vector<32x128xf32>
    %207 = tpu.matmul %206, %205, %cst_151 {dimension_numbers = #tpu.dot_dimension_numbers<[1], [0], [0], [1], [0, 0, 1, 1], [], []>} : vector<32x128xbf16>, vector<128x128xbf16>, vector<32x128xf32> -> vector<32x128xf32>
    %c21 = arith.constant 21 : index
    %c0_152 = arith.constant 0 : index
    %208 = vector.load %arg11[%c21, %c0_152] : memref<29x256xf32, #tpu.memory_space<vmem>>, vector<1x128xf32>
    %209 = vector.broadcast %208 : vector<1x128xf32> to vector<32x128xf32>
    %210 = arith.addf %207, %209 : vector<32x128xf32>
    %cst_153 = arith.constant 0.000000e+00 : f32
    %211 = vector.broadcast %cst_153 : f32 to vector<32x128xf32>
    %212 = arith.maximumf %210, %211 : vector<32x128xf32>
    %c1_154 = arith.constant 1 : index
    %c1_155 = arith.constant 1 : index
    %c0_156 = arith.constant 0 : index
    %c0_157 = arith.constant 0 : index
    %213 = vector.load %arg6[%c1_154, %c1_155, %c0_156, %c0_157] : memref<3x2x128x128xbf16, #tpu.memory_space<vmem>>, vector<1x1x128x128xbf16>
    %214 = vector.shape_cast %213 : vector<1x1x128x128xbf16> to vector<128x128xbf16>
    %215 = arith.truncf %212 : vector<32x128xf32> to vector<32x128xbf16>
    %cst_158 = arith.constant dense<0.000000e+00> : vector<32x128xf32>
    %216 = tpu.matmul %215, %214, %cst_158 {dimension_numbers = #tpu.dot_dimension_numbers<[1], [0], [0], [1], [0, 0, 1, 1], [], []>} : vector<32x128xbf16>, vector<128x128xbf16>, vector<32x128xf32> -> vector<32x128xf32>
    %c22 = arith.constant 22 : index
    %c0_159 = arith.constant 0 : index
    %217 = vector.load %arg11[%c22, %c0_159] : memref<29x256xf32, #tpu.memory_space<vmem>>, vector<1x128xf32>
    %218 = vector.broadcast %217 : vector<1x128xf32> to vector<32x128xf32>
    %219 = arith.addf %216, %218 : vector<32x128xf32>
    %220 = arith.addf %203, %219 : vector<32x128xf32>
    %cst_160 = arith.constant 0.000000e+00 : f32
    %221 = vector.broadcast %cst_160 : f32 to vector<32x128xf32>
    %222 = arith.maximumf %220, %221 : vector<32x128xf32>
    %c2_161 = arith.constant 2 : index
    %c0_162 = arith.constant 0 : index
    %c0_163 = arith.constant 0 : index
    %c0_164 = arith.constant 0 : index
    %223 = vector.load %arg6[%c2_161, %c0_162, %c0_163, %c0_164] : memref<3x2x128x128xbf16, #tpu.memory_space<vmem>>, vector<1x1x128x128xbf16>
    %224 = vector.shape_cast %223 : vector<1x1x128x128xbf16> to vector<128x128xbf16>
    %225 = arith.truncf %222 : vector<32x128xf32> to vector<32x128xbf16>
    %cst_165 = arith.constant dense<0.000000e+00> : vector<32x128xf32>
    %226 = tpu.matmul %225, %224, %cst_165 {dimension_numbers = #tpu.dot_dimension_numbers<[1], [0], [0], [1], [0, 0, 1, 1], [], []>} : vector<32x128xbf16>, vector<128x128xbf16>, vector<32x128xf32> -> vector<32x128xf32>
    %c23 = arith.constant 23 : index
    %c0_166 = arith.constant 0 : index
    %227 = vector.load %arg11[%c23, %c0_166] : memref<29x256xf32, #tpu.memory_space<vmem>>, vector<1x128xf32>
    %228 = vector.broadcast %227 : vector<1x128xf32> to vector<32x128xf32>
    %229 = arith.addf %226, %228 : vector<32x128xf32>
    %cst_167 = arith.constant 0.000000e+00 : f32
    %230 = vector.broadcast %cst_167 : f32 to vector<32x128xf32>
    %231 = arith.maximumf %229, %230 : vector<32x128xf32>
    %c2_168 = arith.constant 2 : index
    %c1_169 = arith.constant 1 : index
    %c0_170 = arith.constant 0 : index
    %c0_171 = arith.constant 0 : index
    %232 = vector.load %arg6[%c2_168, %c1_169, %c0_170, %c0_171] : memref<3x2x128x128xbf16, #tpu.memory_space<vmem>>, vector<1x1x128x128xbf16>
    %233 = vector.shape_cast %232 : vector<1x1x128x128xbf16> to vector<128x128xbf16>
    %234 = arith.truncf %231 : vector<32x128xf32> to vector<32x128xbf16>
    %cst_172 = arith.constant dense<0.000000e+00> : vector<32x128xf32>
    %235 = tpu.matmul %234, %233, %cst_172 {dimension_numbers = #tpu.dot_dimension_numbers<[1], [0], [0], [1], [0, 0, 1, 1], [], []>} : vector<32x128xbf16>, vector<128x128xbf16>, vector<32x128xf32> -> vector<32x128xf32>
    %c24 = arith.constant 24 : index
    %c0_173 = arith.constant 0 : index
    %236 = vector.load %arg11[%c24, %c0_173] : memref<29x256xf32, #tpu.memory_space<vmem>>, vector<1x128xf32>
    %237 = vector.broadcast %236 : vector<1x128xf32> to vector<32x128xf32>
    %238 = arith.addf %235, %237 : vector<32x128xf32>
    %239 = arith.addf %222, %238 : vector<32x128xf32>
    %cst_174 = arith.constant 0.000000e+00 : f32
    %240 = vector.broadcast %cst_174 : f32 to vector<32x128xf32>
    %241 = arith.maximumf %239, %240 : vector<32x128xf32>
    %c0_175 = arith.constant 0 : index
    %c0_176 = arith.constant 0 : index
    %242 = vector.load %arg7[%c0_175, %c0_176] : memref<128x256xbf16, #tpu.memory_space<vmem>>, vector<128x256xbf16>
    %243 = arith.truncf %241 : vector<32x128xf32> to vector<32x128xbf16>
    %cst_177 = arith.constant dense<0.000000e+00> : vector<32x256xf32>
    %244 = tpu.matmul %243, %242, %cst_177 {dimension_numbers = #tpu.dot_dimension_numbers<[1], [0], [0], [1], [0, 0, 1, 1], [], []>} : vector<32x128xbf16>, vector<128x256xbf16>, vector<32x256xf32> -> vector<32x256xf32>
    %c25 = arith.constant 25 : index
    %c0_178 = arith.constant 0 : index
    %245 = vector.load %arg11[%c25, %c0_178] : memref<29x256xf32, #tpu.memory_space<vmem>>, vector<1x256xf32>
    %246 = vector.broadcast %245 : vector<1x256xf32> to vector<32x256xf32>
    %247 = arith.addf %244, %246 : vector<32x256xf32>
    %cst_179 = arith.constant 0.000000e+00 : f32
    %248 = vector.broadcast %cst_179 : f32 to vector<32x256xf32>
    %249 = arith.maximumf %247, %248 : vector<32x256xf32>
    %cst_180 = arith.constant 0.000000e+00 : f32
    %250 = vector.broadcast %cst_180 : f32 to vector<2x16xf32>
    %cst_181 = arith.constant 0.000000e+00 : f32
    %251 = vector.broadcast %cst_181 : f32 to vector<2x32xf32>
    %252 = vector.extract_strided_slice %249 {offsets = [0, 0], sizes = [1, 256], strides = [1, 1]} : vector<32x256xf32> to vector<1x256xf32>
    %253 = vector.extract_strided_slice %249 {offsets = [16, 0], sizes = [1, 256], strides = [1, 1]} : vector<32x256xf32> to vector<1x256xf32>
    %254 = tpu.concatenate %252, %253 in 0 : vector<1x256xf32>, vector<1x256xf32> -> vector<2x256xf32>
    %255 = vector.extract_strided_slice %254 {offsets = [0, 0], sizes = [2, 128], strides = [1, 1]} : vector<2x256xf32> to vector<2x128xf32>
    %256 = arith.truncf %255 : vector<2x128xf32> to vector<2x128xbf16>
    %257 = vector.extract_strided_slice %254 {offsets = [0, 128], sizes = [2, 128], strides = [1, 1]} : vector<2x256xf32> to vector<2x128xf32>
    %258 = arith.truncf %257 : vector<2x128xf32> to vector<2x128xbf16>
    %c0_182 = arith.constant 0 : index
    %c0_183 = arith.constant 0 : index
    %c0_184 = arith.constant 0 : index
    %259 = vector.load %arg8[%c0_182, %c0_183, %c0_184] : memref<16x16x128xbf16, #tpu.memory_space<vmem>>, vector<1x16x128xbf16>
    %260 = vector.shape_cast %259 : vector<1x16x128xbf16> to vector<16x128xbf16>
    %cst_185 = arith.constant dense<0.000000e+00> : vector<2x16xf32>
    %261 = tpu.matmul %256, %260, %cst_185 {dimension_numbers = #tpu.dot_dimension_numbers<[1], [1], [0], [0], [0, 0, 1, 0], [], []>} : vector<2x128xbf16>, vector<16x128xbf16>, vector<2x16xf32> -> vector<2x16xf32>
    %262 = arith.addf %250, %261 : vector<2x16xf32>
    %c0_186 = arith.constant 0 : index
    %c0_187 = arith.constant 0 : index
    %c0_188 = arith.constant 0 : index
    %263 = vector.load %arg9[%c0_186, %c0_187, %c0_188] : memref<16x32x128xbf16, #tpu.memory_space<vmem>>, vector<1x32x128xbf16>
    %264 = vector.shape_cast %263 : vector<1x32x128xbf16> to vector<32x128xbf16>
    %cst_189 = arith.constant dense<0.000000e+00> : vector<2x32xf32>
    %265 = tpu.matmul %258, %264, %cst_189 {dimension_numbers = #tpu.dot_dimension_numbers<[1], [1], [0], [0], [0, 0, 1, 0], [], []>} : vector<2x128xbf16>, vector<32x128xbf16>, vector<2x32xf32> -> vector<2x32xf32>
    %266 = arith.addf %251, %265 : vector<2x32xf32>
    %267 = vector.extract_strided_slice %249 {offsets = [1, 0], sizes = [1, 256], strides = [1, 1]} : vector<32x256xf32> to vector<1x256xf32>
    %268 = vector.extract_strided_slice %249 {offsets = [17, 0], sizes = [1, 256], strides = [1, 1]} : vector<32x256xf32> to vector<1x256xf32>
    %269 = tpu.concatenate %267, %268 in 0 : vector<1x256xf32>, vector<1x256xf32> -> vector<2x256xf32>
    %270 = vector.extract_strided_slice %269 {offsets = [0, 0], sizes = [2, 128], strides = [1, 1]} : vector<2x256xf32> to vector<2x128xf32>
    %271 = arith.truncf %270 : vector<2x128xf32> to vector<2x128xbf16>
    %272 = vector.extract_strided_slice %269 {offsets = [0, 128], sizes = [2, 128], strides = [1, 1]} : vector<2x256xf32> to vector<2x128xf32>
    %273 = arith.truncf %272 : vector<2x128xf32> to vector<2x128xbf16>
    %c1_190 = arith.constant 1 : index
    %c0_191 = arith.constant 0 : index
    %c0_192 = arith.constant 0 : index
    %274 = vector.load %arg8[%c1_190, %c0_191, %c0_192] : memref<16x16x128xbf16, #tpu.memory_space<vmem>>, vector<1x16x128xbf16>
    %275 = vector.shape_cast %274 : vector<1x16x128xbf16> to vector<16x128xbf16>
    %cst_193 = arith.constant dense<0.000000e+00> : vector<2x16xf32>
    %276 = tpu.matmul %271, %275, %cst_193 {dimension_numbers = #tpu.dot_dimension_numbers<[1], [1], [0], [0], [0, 0, 1, 0], [], []>} : vector<2x128xbf16>, vector<16x128xbf16>, vector<2x16xf32> -> vector<2x16xf32>
    %277 = arith.addf %262, %276 : vector<2x16xf32>
    %c1_194 = arith.constant 1 : index
    %c0_195 = arith.constant 0 : index
    %c0_196 = arith.constant 0 : index
    %278 = vector.load %arg9[%c1_194, %c0_195, %c0_196] : memref<16x32x128xbf16, #tpu.memory_space<vmem>>, vector<1x32x128xbf16>
    %279 = vector.shape_cast %278 : vector<1x32x128xbf16> to vector<32x128xbf16>
    %cst_197 = arith.constant dense<0.000000e+00> : vector<2x32xf32>
    %280 = tpu.matmul %273, %279, %cst_197 {dimension_numbers = #tpu.dot_dimension_numbers<[1], [1], [0], [0], [0, 0, 1, 0], [], []>} : vector<2x128xbf16>, vector<32x128xbf16>, vector<2x32xf32> -> vector<2x32xf32>
    %281 = arith.addf %266, %280 : vector<2x32xf32>
    %282 = vector.extract_strided_slice %249 {offsets = [2, 0], sizes = [1, 256], strides = [1, 1]} : vector<32x256xf32> to vector<1x256xf32>
    %283 = vector.extract_strided_slice %249 {offsets = [18, 0], sizes = [1, 256], strides = [1, 1]} : vector<32x256xf32> to vector<1x256xf32>
    %284 = tpu.concatenate %282, %283 in 0 : vector<1x256xf32>, vector<1x256xf32> -> vector<2x256xf32>
    %285 = vector.extract_strided_slice %284 {offsets = [0, 0], sizes = [2, 128], strides = [1, 1]} : vector<2x256xf32> to vector<2x128xf32>
    %286 = arith.truncf %285 : vector<2x128xf32> to vector<2x128xbf16>
    %287 = vector.extract_strided_slice %284 {offsets = [0, 128], sizes = [2, 128], strides = [1, 1]} : vector<2x256xf32> to vector<2x128xf32>
    %288 = arith.truncf %287 : vector<2x128xf32> to vector<2x128xbf16>
    %c2_198 = arith.constant 2 : index
    %c0_199 = arith.constant 0 : index
    %c0_200 = arith.constant 0 : index
    %289 = vector.load %arg8[%c2_198, %c0_199, %c0_200] : memref<16x16x128xbf16, #tpu.memory_space<vmem>>, vector<1x16x128xbf16>
    %290 = vector.shape_cast %289 : vector<1x16x128xbf16> to vector<16x128xbf16>
    %cst_201 = arith.constant dense<0.000000e+00> : vector<2x16xf32>
    %291 = tpu.matmul %286, %290, %cst_201 {dimension_numbers = #tpu.dot_dimension_numbers<[1], [1], [0], [0], [0, 0, 1, 0], [], []>} : vector<2x128xbf16>, vector<16x128xbf16>, vector<2x16xf32> -> vector<2x16xf32>
    %292 = arith.addf %277, %291 : vector<2x16xf32>
    %c2_202 = arith.constant 2 : index
    %c0_203 = arith.constant 0 : index
    %c0_204 = arith.constant 0 : index
    %293 = vector.load %arg9[%c2_202, %c0_203, %c0_204] : memref<16x32x128xbf16, #tpu.memory_space<vmem>>, vector<1x32x128xbf16>
    %294 = vector.shape_cast %293 : vector<1x32x128xbf16> to vector<32x128xbf16>
    %cst_205 = arith.constant dense<0.000000e+00> : vector<2x32xf32>
    %295 = tpu.matmul %288, %294, %cst_205 {dimension_numbers = #tpu.dot_dimension_numbers<[1], [1], [0], [0], [0, 0, 1, 0], [], []>} : vector<2x128xbf16>, vector<32x128xbf16>, vector<2x32xf32> -> vector<2x32xf32>
    %296 = arith.addf %281, %295 : vector<2x32xf32>
    %297 = vector.extract_strided_slice %249 {offsets = [3, 0], sizes = [1, 256], strides = [1, 1]} : vector<32x256xf32> to vector<1x256xf32>
    %298 = vector.extract_strided_slice %249 {offsets = [19, 0], sizes = [1, 256], strides = [1, 1]} : vector<32x256xf32> to vector<1x256xf32>
    %299 = tpu.concatenate %297, %298 in 0 : vector<1x256xf32>, vector<1x256xf32> -> vector<2x256xf32>
    %300 = vector.extract_strided_slice %299 {offsets = [0, 0], sizes = [2, 128], strides = [1, 1]} : vector<2x256xf32> to vector<2x128xf32>
    %301 = arith.truncf %300 : vector<2x128xf32> to vector<2x128xbf16>
    %302 = vector.extract_strided_slice %299 {offsets = [0, 128], sizes = [2, 128], strides = [1, 1]} : vector<2x256xf32> to vector<2x128xf32>
    %303 = arith.truncf %302 : vector<2x128xf32> to vector<2x128xbf16>
    %c3_206 = arith.constant 3 : index
    %c0_207 = arith.constant 0 : index
    %c0_208 = arith.constant 0 : index
    %304 = vector.load %arg8[%c3_206, %c0_207, %c0_208] : memref<16x16x128xbf16, #tpu.memory_space<vmem>>, vector<1x16x128xbf16>
    %305 = vector.shape_cast %304 : vector<1x16x128xbf16> to vector<16x128xbf16>
    %cst_209 = arith.constant dense<0.000000e+00> : vector<2x16xf32>
    %306 = tpu.matmul %301, %305, %cst_209 {dimension_numbers = #tpu.dot_dimension_numbers<[1], [1], [0], [0], [0, 0, 1, 0], [], []>} : vector<2x128xbf16>, vector<16x128xbf16>, vector<2x16xf32> -> vector<2x16xf32>
    %307 = arith.addf %292, %306 : vector<2x16xf32>
    %c3_210 = arith.constant 3 : index
    %c0_211 = arith.constant 0 : index
    %c0_212 = arith.constant 0 : index
    %308 = vector.load %arg9[%c3_210, %c0_211, %c0_212] : memref<16x32x128xbf16, #tpu.memory_space<vmem>>, vector<1x32x128xbf16>
    %309 = vector.shape_cast %308 : vector<1x32x128xbf16> to vector<32x128xbf16>
    %cst_213 = arith.constant dense<0.000000e+00> : vector<2x32xf32>
    %310 = tpu.matmul %303, %309, %cst_213 {dimension_numbers = #tpu.dot_dimension_numbers<[1], [1], [0], [0], [0, 0, 1, 0], [], []>} : vector<2x128xbf16>, vector<32x128xbf16>, vector<2x32xf32> -> vector<2x32xf32>
    %311 = arith.addf %296, %310 : vector<2x32xf32>
    %312 = vector.extract_strided_slice %249 {offsets = [4, 0], sizes = [1, 256], strides = [1, 1]} : vector<32x256xf32> to vector<1x256xf32>
    %313 = vector.extract_strided_slice %249 {offsets = [20, 0], sizes = [1, 256], strides = [1, 1]} : vector<32x256xf32> to vector<1x256xf32>
    %314 = tpu.concatenate %312, %313 in 0 : vector<1x256xf32>, vector<1x256xf32> -> vector<2x256xf32>
    %315 = vector.extract_strided_slice %314 {offsets = [0, 0], sizes = [2, 128], strides = [1, 1]} : vector<2x256xf32> to vector<2x128xf32>
    %316 = arith.truncf %315 : vector<2x128xf32> to vector<2x128xbf16>
    %317 = vector.extract_strided_slice %314 {offsets = [0, 128], sizes = [2, 128], strides = [1, 1]} : vector<2x256xf32> to vector<2x128xf32>
    %318 = arith.truncf %317 : vector<2x128xf32> to vector<2x128xbf16>
    %c4_214 = arith.constant 4 : index
    %c0_215 = arith.constant 0 : index
    %c0_216 = arith.constant 0 : index
    %319 = vector.load %arg8[%c4_214, %c0_215, %c0_216] : memref<16x16x128xbf16, #tpu.memory_space<vmem>>, vector<1x16x128xbf16>
    %320 = vector.shape_cast %319 : vector<1x16x128xbf16> to vector<16x128xbf16>
    %cst_217 = arith.constant dense<0.000000e+00> : vector<2x16xf32>
    %321 = tpu.matmul %316, %320, %cst_217 {dimension_numbers = #tpu.dot_dimension_numbers<[1], [1], [0], [0], [0, 0, 1, 0], [], []>} : vector<2x128xbf16>, vector<16x128xbf16>, vector<2x16xf32> -> vector<2x16xf32>
    %322 = arith.addf %307, %321 : vector<2x16xf32>
    %c4_218 = arith.constant 4 : index
    %c0_219 = arith.constant 0 : index
    %c0_220 = arith.constant 0 : index
    %323 = vector.load %arg9[%c4_218, %c0_219, %c0_220] : memref<16x32x128xbf16, #tpu.memory_space<vmem>>, vector<1x32x128xbf16>
    %324 = vector.shape_cast %323 : vector<1x32x128xbf16> to vector<32x128xbf16>
    %cst_221 = arith.constant dense<0.000000e+00> : vector<2x32xf32>
    %325 = tpu.matmul %318, %324, %cst_221 {dimension_numbers = #tpu.dot_dimension_numbers<[1], [1], [0], [0], [0, 0, 1, 0], [], []>} : vector<2x128xbf16>, vector<32x128xbf16>, vector<2x32xf32> -> vector<2x32xf32>
    %326 = arith.addf %311, %325 : vector<2x32xf32>
    %327 = vector.extract_strided_slice %249 {offsets = [5, 0], sizes = [1, 256], strides = [1, 1]} : vector<32x256xf32> to vector<1x256xf32>
    %328 = vector.extract_strided_slice %249 {offsets = [21, 0], sizes = [1, 256], strides = [1, 1]} : vector<32x256xf32> to vector<1x256xf32>
    %329 = tpu.concatenate %327, %328 in 0 : vector<1x256xf32>, vector<1x256xf32> -> vector<2x256xf32>
    %330 = vector.extract_strided_slice %329 {offsets = [0, 0], sizes = [2, 128], strides = [1, 1]} : vector<2x256xf32> to vector<2x128xf32>
    %331 = arith.truncf %330 : vector<2x128xf32> to vector<2x128xbf16>
    %332 = vector.extract_strided_slice %329 {offsets = [0, 128], sizes = [2, 128], strides = [1, 1]} : vector<2x256xf32> to vector<2x128xf32>
    %333 = arith.truncf %332 : vector<2x128xf32> to vector<2x128xbf16>
    %c5_222 = arith.constant 5 : index
    %c0_223 = arith.constant 0 : index
    %c0_224 = arith.constant 0 : index
    %334 = vector.load %arg8[%c5_222, %c0_223, %c0_224] : memref<16x16x128xbf16, #tpu.memory_space<vmem>>, vector<1x16x128xbf16>
    %335 = vector.shape_cast %334 : vector<1x16x128xbf16> to vector<16x128xbf16>
    %cst_225 = arith.constant dense<0.000000e+00> : vector<2x16xf32>
    %336 = tpu.matmul %331, %335, %cst_225 {dimension_numbers = #tpu.dot_dimension_numbers<[1], [1], [0], [0], [0, 0, 1, 0], [], []>} : vector<2x128xbf16>, vector<16x128xbf16>, vector<2x16xf32> -> vector<2x16xf32>
    %337 = arith.addf %322, %336 : vector<2x16xf32>
    %c5_226 = arith.constant 5 : index
    %c0_227 = arith.constant 0 : index
    %c0_228 = arith.constant 0 : index
    %338 = vector.load %arg9[%c5_226, %c0_227, %c0_228] : memref<16x32x128xbf16, #tpu.memory_space<vmem>>, vector<1x32x128xbf16>
    %339 = vector.shape_cast %338 : vector<1x32x128xbf16> to vector<32x128xbf16>
    %cst_229 = arith.constant dense<0.000000e+00> : vector<2x32xf32>
    %340 = tpu.matmul %333, %339, %cst_229 {dimension_numbers = #tpu.dot_dimension_numbers<[1], [1], [0], [0], [0, 0, 1, 0], [], []>} : vector<2x128xbf16>, vector<32x128xbf16>, vector<2x32xf32> -> vector<2x32xf32>
    %341 = arith.addf %326, %340 : vector<2x32xf32>
    %342 = vector.extract_strided_slice %249 {offsets = [6, 0], sizes = [1, 256], strides = [1, 1]} : vector<32x256xf32> to vector<1x256xf32>
    %343 = vector.extract_strided_slice %249 {offsets = [22, 0], sizes = [1, 256], strides = [1, 1]} : vector<32x256xf32> to vector<1x256xf32>
    %344 = tpu.concatenate %342, %343 in 0 : vector<1x256xf32>, vector<1x256xf32> -> vector<2x256xf32>
    %345 = vector.extract_strided_slice %344 {offsets = [0, 0], sizes = [2, 128], strides = [1, 1]} : vector<2x256xf32> to vector<2x128xf32>
    %346 = arith.truncf %345 : vector<2x128xf32> to vector<2x128xbf16>
    %347 = vector.extract_strided_slice %344 {offsets = [0, 128], sizes = [2, 128], strides = [1, 1]} : vector<2x256xf32> to vector<2x128xf32>
    %348 = arith.truncf %347 : vector<2x128xf32> to vector<2x128xbf16>
    %c6_230 = arith.constant 6 : index
    %c0_231 = arith.constant 0 : index
    %c0_232 = arith.constant 0 : index
    %349 = vector.load %arg8[%c6_230, %c0_231, %c0_232] : memref<16x16x128xbf16, #tpu.memory_space<vmem>>, vector<1x16x128xbf16>
    %350 = vector.shape_cast %349 : vector<1x16x128xbf16> to vector<16x128xbf16>
    %cst_233 = arith.constant dense<0.000000e+00> : vector<2x16xf32>
    %351 = tpu.matmul %346, %350, %cst_233 {dimension_numbers = #tpu.dot_dimension_numbers<[1], [1], [0], [0], [0, 0, 1, 0], [], []>} : vector<2x128xbf16>, vector<16x128xbf16>, vector<2x16xf32> -> vector<2x16xf32>
    %352 = arith.addf %337, %351 : vector<2x16xf32>
    %c6_234 = arith.constant 6 : index
    %c0_235 = arith.constant 0 : index
    %c0_236 = arith.constant 0 : index
    %353 = vector.load %arg9[%c6_234, %c0_235, %c0_236] : memref<16x32x128xbf16, #tpu.memory_space<vmem>>, vector<1x32x128xbf16>
    %354 = vector.shape_cast %353 : vector<1x32x128xbf16> to vector<32x128xbf16>
    %cst_237 = arith.constant dense<0.000000e+00> : vector<2x32xf32>
    %355 = tpu.matmul %348, %354, %cst_237 {dimension_numbers = #tpu.dot_dimension_numbers<[1], [1], [0], [0], [0, 0, 1, 0], [], []>} : vector<2x128xbf16>, vector<32x128xbf16>, vector<2x32xf32> -> vector<2x32xf32>
    %356 = arith.addf %341, %355 : vector<2x32xf32>
    %357 = vector.extract_strided_slice %249 {offsets = [7, 0], sizes = [1, 256], strides = [1, 1]} : vector<32x256xf32> to vector<1x256xf32>
    %358 = vector.extract_strided_slice %249 {offsets = [23, 0], sizes = [1, 256], strides = [1, 1]} : vector<32x256xf32> to vector<1x256xf32>
    %359 = tpu.concatenate %357, %358 in 0 : vector<1x256xf32>, vector<1x256xf32> -> vector<2x256xf32>
    %360 = vector.extract_strided_slice %359 {offsets = [0, 0], sizes = [2, 128], strides = [1, 1]} : vector<2x256xf32> to vector<2x128xf32>
    %361 = arith.truncf %360 : vector<2x128xf32> to vector<2x128xbf16>
    %362 = vector.extract_strided_slice %359 {offsets = [0, 128], sizes = [2, 128], strides = [1, 1]} : vector<2x256xf32> to vector<2x128xf32>
    %363 = arith.truncf %362 : vector<2x128xf32> to vector<2x128xbf16>
    %c7_238 = arith.constant 7 : index
    %c0_239 = arith.constant 0 : index
    %c0_240 = arith.constant 0 : index
    %364 = vector.load %arg8[%c7_238, %c0_239, %c0_240] : memref<16x16x128xbf16, #tpu.memory_space<vmem>>, vector<1x16x128xbf16>
    %365 = vector.shape_cast %364 : vector<1x16x128xbf16> to vector<16x128xbf16>
    %cst_241 = arith.constant dense<0.000000e+00> : vector<2x16xf32>
    %366 = tpu.matmul %361, %365, %cst_241 {dimension_numbers = #tpu.dot_dimension_numbers<[1], [1], [0], [0], [0, 0, 1, 0], [], []>} : vector<2x128xbf16>, vector<16x128xbf16>, vector<2x16xf32> -> vector<2x16xf32>
    %367 = arith.addf %352, %366 : vector<2x16xf32>
    %c7_242 = arith.constant 7 : index
    %c0_243 = arith.constant 0 : index
    %c0_244 = arith.constant 0 : index
    %368 = vector.load %arg9[%c7_242, %c0_243, %c0_244] : memref<16x32x128xbf16, #tpu.memory_space<vmem>>, vector<1x32x128xbf16>
    %369 = vector.shape_cast %368 : vector<1x32x128xbf16> to vector<32x128xbf16>
    %cst_245 = arith.constant dense<0.000000e+00> : vector<2x32xf32>
    %370 = tpu.matmul %363, %369, %cst_245 {dimension_numbers = #tpu.dot_dimension_numbers<[1], [1], [0], [0], [0, 0, 1, 0], [], []>} : vector<2x128xbf16>, vector<32x128xbf16>, vector<2x32xf32> -> vector<2x32xf32>
    %371 = arith.addf %356, %370 : vector<2x32xf32>
    %372 = vector.extract_strided_slice %249 {offsets = [8, 0], sizes = [1, 256], strides = [1, 1]} : vector<32x256xf32> to vector<1x256xf32>
    %373 = vector.extract_strided_slice %249 {offsets = [24, 0], sizes = [1, 256], strides = [1, 1]} : vector<32x256xf32> to vector<1x256xf32>
    %374 = tpu.concatenate %372, %373 in 0 : vector<1x256xf32>, vector<1x256xf32> -> vector<2x256xf32>
    %375 = vector.extract_strided_slice %374 {offsets = [0, 0], sizes = [2, 128], strides = [1, 1]} : vector<2x256xf32> to vector<2x128xf32>
    %376 = arith.truncf %375 : vector<2x128xf32> to vector<2x128xbf16>
    %377 = vector.extract_strided_slice %374 {offsets = [0, 128], sizes = [2, 128], strides = [1, 1]} : vector<2x256xf32> to vector<2x128xf32>
    %378 = arith.truncf %377 : vector<2x128xf32> to vector<2x128xbf16>
    %c8_246 = arith.constant 8 : index
    %c0_247 = arith.constant 0 : index
    %c0_248 = arith.constant 0 : index
    %379 = vector.load %arg8[%c8_246, %c0_247, %c0_248] : memref<16x16x128xbf16, #tpu.memory_space<vmem>>, vector<1x16x128xbf16>
    %380 = vector.shape_cast %379 : vector<1x16x128xbf16> to vector<16x128xbf16>
    %cst_249 = arith.constant dense<0.000000e+00> : vector<2x16xf32>
    %381 = tpu.matmul %376, %380, %cst_249 {dimension_numbers = #tpu.dot_dimension_numbers<[1], [1], [0], [0], [0, 0, 1, 0], [], []>} : vector<2x128xbf16>, vector<16x128xbf16>, vector<2x16xf32> -> vector<2x16xf32>
    %382 = arith.addf %367, %381 : vector<2x16xf32>
    %c8_250 = arith.constant 8 : index
    %c0_251 = arith.constant 0 : index
    %c0_252 = arith.constant 0 : index
    %383 = vector.load %arg9[%c8_250, %c0_251, %c0_252] : memref<16x32x128xbf16, #tpu.memory_space<vmem>>, vector<1x32x128xbf16>
    %384 = vector.shape_cast %383 : vector<1x32x128xbf16> to vector<32x128xbf16>
    %cst_253 = arith.constant dense<0.000000e+00> : vector<2x32xf32>
    %385 = tpu.matmul %378, %384, %cst_253 {dimension_numbers = #tpu.dot_dimension_numbers<[1], [1], [0], [0], [0, 0, 1, 0], [], []>} : vector<2x128xbf16>, vector<32x128xbf16>, vector<2x32xf32> -> vector<2x32xf32>
    %386 = arith.addf %371, %385 : vector<2x32xf32>
    %387 = vector.extract_strided_slice %249 {offsets = [9, 0], sizes = [1, 256], strides = [1, 1]} : vector<32x256xf32> to vector<1x256xf32>
    %388 = vector.extract_strided_slice %249 {offsets = [25, 0], sizes = [1, 256], strides = [1, 1]} : vector<32x256xf32> to vector<1x256xf32>
    %389 = tpu.concatenate %387, %388 in 0 : vector<1x256xf32>, vector<1x256xf32> -> vector<2x256xf32>
    %390 = vector.extract_strided_slice %389 {offsets = [0, 0], sizes = [2, 128], strides = [1, 1]} : vector<2x256xf32> to vector<2x128xf32>
    %391 = arith.truncf %390 : vector<2x128xf32> to vector<2x128xbf16>
    %392 = vector.extract_strided_slice %389 {offsets = [0, 128], sizes = [2, 128], strides = [1, 1]} : vector<2x256xf32> to vector<2x128xf32>
    %393 = arith.truncf %392 : vector<2x128xf32> to vector<2x128xbf16>
    %c9_254 = arith.constant 9 : index
    %c0_255 = arith.constant 0 : index
    %c0_256 = arith.constant 0 : index
    %394 = vector.load %arg8[%c9_254, %c0_255, %c0_256] : memref<16x16x128xbf16, #tpu.memory_space<vmem>>, vector<1x16x128xbf16>
    %395 = vector.shape_cast %394 : vector<1x16x128xbf16> to vector<16x128xbf16>
    %cst_257 = arith.constant dense<0.000000e+00> : vector<2x16xf32>
    %396 = tpu.matmul %391, %395, %cst_257 {dimension_numbers = #tpu.dot_dimension_numbers<[1], [1], [0], [0], [0, 0, 1, 0], [], []>} : vector<2x128xbf16>, vector<16x128xbf16>, vector<2x16xf32> -> vector<2x16xf32>
    %397 = arith.addf %382, %396 : vector<2x16xf32>
    %c9_258 = arith.constant 9 : index
    %c0_259 = arith.constant 0 : index
    %c0_260 = arith.constant 0 : index
    %398 = vector.load %arg9[%c9_258, %c0_259, %c0_260] : memref<16x32x128xbf16, #tpu.memory_space<vmem>>, vector<1x32x128xbf16>
    %399 = vector.shape_cast %398 : vector<1x32x128xbf16> to vector<32x128xbf16>
    %cst_261 = arith.constant dense<0.000000e+00> : vector<2x32xf32>
    %400 = tpu.matmul %393, %399, %cst_261 {dimension_numbers = #tpu.dot_dimension_numbers<[1], [1], [0], [0], [0, 0, 1, 0], [], []>} : vector<2x128xbf16>, vector<32x128xbf16>, vector<2x32xf32> -> vector<2x32xf32>
    %401 = arith.addf %386, %400 : vector<2x32xf32>
    %402 = vector.extract_strided_slice %249 {offsets = [10, 0], sizes = [1, 256], strides = [1, 1]} : vector<32x256xf32> to vector<1x256xf32>
    %403 = vector.extract_strided_slice %249 {offsets = [26, 0], sizes = [1, 256], strides = [1, 1]} : vector<32x256xf32> to vector<1x256xf32>
    %404 = tpu.concatenate %402, %403 in 0 : vector<1x256xf32>, vector<1x256xf32> -> vector<2x256xf32>
    %405 = vector.extract_strided_slice %404 {offsets = [0, 0], sizes = [2, 128], strides = [1, 1]} : vector<2x256xf32> to vector<2x128xf32>
    %406 = arith.truncf %405 : vector<2x128xf32> to vector<2x128xbf16>
    %407 = vector.extract_strided_slice %404 {offsets = [0, 128], sizes = [2, 128], strides = [1, 1]} : vector<2x256xf32> to vector<2x128xf32>
    %408 = arith.truncf %407 : vector<2x128xf32> to vector<2x128xbf16>
    %c10_262 = arith.constant 10 : index
    %c0_263 = arith.constant 0 : index
    %c0_264 = arith.constant 0 : index
    %409 = vector.load %arg8[%c10_262, %c0_263, %c0_264] : memref<16x16x128xbf16, #tpu.memory_space<vmem>>, vector<1x16x128xbf16>
    %410 = vector.shape_cast %409 : vector<1x16x128xbf16> to vector<16x128xbf16>
    %cst_265 = arith.constant dense<0.000000e+00> : vector<2x16xf32>
    %411 = tpu.matmul %406, %410, %cst_265 {dimension_numbers = #tpu.dot_dimension_numbers<[1], [1], [0], [0], [0, 0, 1, 0], [], []>} : vector<2x128xbf16>, vector<16x128xbf16>, vector<2x16xf32> -> vector<2x16xf32>
    %412 = arith.addf %397, %411 : vector<2x16xf32>
    %c10_266 = arith.constant 10 : index
    %c0_267 = arith.constant 0 : index
    %c0_268 = arith.constant 0 : index
    %413 = vector.load %arg9[%c10_266, %c0_267, %c0_268] : memref<16x32x128xbf16, #tpu.memory_space<vmem>>, vector<1x32x128xbf16>
    %414 = vector.shape_cast %413 : vector<1x32x128xbf16> to vector<32x128xbf16>
    %cst_269 = arith.constant dense<0.000000e+00> : vector<2x32xf32>
    %415 = tpu.matmul %408, %414, %cst_269 {dimension_numbers = #tpu.dot_dimension_numbers<[1], [1], [0], [0], [0, 0, 1, 0], [], []>} : vector<2x128xbf16>, vector<32x128xbf16>, vector<2x32xf32> -> vector<2x32xf32>
    %416 = arith.addf %401, %415 : vector<2x32xf32>
    %417 = vector.extract_strided_slice %249 {offsets = [11, 0], sizes = [1, 256], strides = [1, 1]} : vector<32x256xf32> to vector<1x256xf32>
    %418 = vector.extract_strided_slice %249 {offsets = [27, 0], sizes = [1, 256], strides = [1, 1]} : vector<32x256xf32> to vector<1x256xf32>
    %419 = tpu.concatenate %417, %418 in 0 : vector<1x256xf32>, vector<1x256xf32> -> vector<2x256xf32>
    %420 = vector.extract_strided_slice %419 {offsets = [0, 0], sizes = [2, 128], strides = [1, 1]} : vector<2x256xf32> to vector<2x128xf32>
    %421 = arith.truncf %420 : vector<2x128xf32> to vector<2x128xbf16>
    %422 = vector.extract_strided_slice %419 {offsets = [0, 128], sizes = [2, 128], strides = [1, 1]} : vector<2x256xf32> to vector<2x128xf32>
    %423 = arith.truncf %422 : vector<2x128xf32> to vector<2x128xbf16>
    %c11_270 = arith.constant 11 : index
    %c0_271 = arith.constant 0 : index
    %c0_272 = arith.constant 0 : index
    %424 = vector.load %arg8[%c11_270, %c0_271, %c0_272] : memref<16x16x128xbf16, #tpu.memory_space<vmem>>, vector<1x16x128xbf16>
    %425 = vector.shape_cast %424 : vector<1x16x128xbf16> to vector<16x128xbf16>
    %cst_273 = arith.constant dense<0.000000e+00> : vector<2x16xf32>
    %426 = tpu.matmul %421, %425, %cst_273 {dimension_numbers = #tpu.dot_dimension_numbers<[1], [1], [0], [0], [0, 0, 1, 0], [], []>} : vector<2x128xbf16>, vector<16x128xbf16>, vector<2x16xf32> -> vector<2x16xf32>
    %427 = arith.addf %412, %426 : vector<2x16xf32>
    %c11_274 = arith.constant 11 : index
    %c0_275 = arith.constant 0 : index
    %c0_276 = arith.constant 0 : index
    %428 = vector.load %arg9[%c11_274, %c0_275, %c0_276] : memref<16x32x128xbf16, #tpu.memory_space<vmem>>, vector<1x32x128xbf16>
    %429 = vector.shape_cast %428 : vector<1x32x128xbf16> to vector<32x128xbf16>
    %cst_277 = arith.constant dense<0.000000e+00> : vector<2x32xf32>
    %430 = tpu.matmul %423, %429, %cst_277 {dimension_numbers = #tpu.dot_dimension_numbers<[1], [1], [0], [0], [0, 0, 1, 0], [], []>} : vector<2x128xbf16>, vector<32x128xbf16>, vector<2x32xf32> -> vector<2x32xf32>
    %431 = arith.addf %416, %430 : vector<2x32xf32>
    %432 = vector.extract_strided_slice %249 {offsets = [12, 0], sizes = [1, 256], strides = [1, 1]} : vector<32x256xf32> to vector<1x256xf32>
    %433 = vector.extract_strided_slice %249 {offsets = [28, 0], sizes = [1, 256], strides = [1, 1]} : vector<32x256xf32> to vector<1x256xf32>
    %434 = tpu.concatenate %432, %433 in 0 : vector<1x256xf32>, vector<1x256xf32> -> vector<2x256xf32>
    %435 = vector.extract_strided_slice %434 {offsets = [0, 0], sizes = [2, 128], strides = [1, 1]} : vector<2x256xf32> to vector<2x128xf32>
    %436 = arith.truncf %435 : vector<2x128xf32> to vector<2x128xbf16>
    %437 = vector.extract_strided_slice %434 {offsets = [0, 128], sizes = [2, 128], strides = [1, 1]} : vector<2x256xf32> to vector<2x128xf32>
    %438 = arith.truncf %437 : vector<2x128xf32> to vector<2x128xbf16>
    %c12_278 = arith.constant 12 : index
    %c0_279 = arith.constant 0 : index
    %c0_280 = arith.constant 0 : index
    %439 = vector.load %arg8[%c12_278, %c0_279, %c0_280] : memref<16x16x128xbf16, #tpu.memory_space<vmem>>, vector<1x16x128xbf16>
    %440 = vector.shape_cast %439 : vector<1x16x128xbf16> to vector<16x128xbf16>
    %cst_281 = arith.constant dense<0.000000e+00> : vector<2x16xf32>
    %441 = tpu.matmul %436, %440, %cst_281 {dimension_numbers = #tpu.dot_dimension_numbers<[1], [1], [0], [0], [0, 0, 1, 0], [], []>} : vector<2x128xbf16>, vector<16x128xbf16>, vector<2x16xf32> -> vector<2x16xf32>
    %442 = arith.addf %427, %441 : vector<2x16xf32>
    %c12_282 = arith.constant 12 : index
    %c0_283 = arith.constant 0 : index
    %c0_284 = arith.constant 0 : index
    %443 = vector.load %arg9[%c12_282, %c0_283, %c0_284] : memref<16x32x128xbf16, #tpu.memory_space<vmem>>, vector<1x32x128xbf16>
    %444 = vector.shape_cast %443 : vector<1x32x128xbf16> to vector<32x128xbf16>
    %cst_285 = arith.constant dense<0.000000e+00> : vector<2x32xf32>
    %445 = tpu.matmul %438, %444, %cst_285 {dimension_numbers = #tpu.dot_dimension_numbers<[1], [1], [0], [0], [0, 0, 1, 0], [], []>} : vector<2x128xbf16>, vector<32x128xbf16>, vector<2x32xf32> -> vector<2x32xf32>
    %446 = arith.addf %431, %445 : vector<2x32xf32>
    %447 = vector.extract_strided_slice %249 {offsets = [13, 0], sizes = [1, 256], strides = [1, 1]} : vector<32x256xf32> to vector<1x256xf32>
    %448 = vector.extract_strided_slice %249 {offsets = [29, 0], sizes = [1, 256], strides = [1, 1]} : vector<32x256xf32> to vector<1x256xf32>
    %449 = tpu.concatenate %447, %448 in 0 : vector<1x256xf32>, vector<1x256xf32> -> vector<2x256xf32>
    %450 = vector.extract_strided_slice %449 {offsets = [0, 0], sizes = [2, 128], strides = [1, 1]} : vector<2x256xf32> to vector<2x128xf32>
    %451 = arith.truncf %450 : vector<2x128xf32> to vector<2x128xbf16>
    %452 = vector.extract_strided_slice %449 {offsets = [0, 128], sizes = [2, 128], strides = [1, 1]} : vector<2x256xf32> to vector<2x128xf32>
    %453 = arith.truncf %452 : vector<2x128xf32> to vector<2x128xbf16>
    %c13_286 = arith.constant 13 : index
    %c0_287 = arith.constant 0 : index
    %c0_288 = arith.constant 0 : index
    %454 = vector.load %arg8[%c13_286, %c0_287, %c0_288] : memref<16x16x128xbf16, #tpu.memory_space<vmem>>, vector<1x16x128xbf16>
    %455 = vector.shape_cast %454 : vector<1x16x128xbf16> to vector<16x128xbf16>
    %cst_289 = arith.constant dense<0.000000e+00> : vector<2x16xf32>
    %456 = tpu.matmul %451, %455, %cst_289 {dimension_numbers = #tpu.dot_dimension_numbers<[1], [1], [0], [0], [0, 0, 1, 0], [], []>} : vector<2x128xbf16>, vector<16x128xbf16>, vector<2x16xf32> -> vector<2x16xf32>
    %457 = arith.addf %442, %456 : vector<2x16xf32>
    %c13_290 = arith.constant 13 : index
    %c0_291 = arith.constant 0 : index
    %c0_292 = arith.constant 0 : index
    %458 = vector.load %arg9[%c13_290, %c0_291, %c0_292] : memref<16x32x128xbf16, #tpu.memory_space<vmem>>, vector<1x32x128xbf16>
    %459 = vector.shape_cast %458 : vector<1x32x128xbf16> to vector<32x128xbf16>
    %cst_293 = arith.constant dense<0.000000e+00> : vector<2x32xf32>
    %460 = tpu.matmul %453, %459, %cst_293 {dimension_numbers = #tpu.dot_dimension_numbers<[1], [1], [0], [0], [0, 0, 1, 0], [], []>} : vector<2x128xbf16>, vector<32x128xbf16>, vector<2x32xf32> -> vector<2x32xf32>
    %461 = arith.addf %446, %460 : vector<2x32xf32>
    %462 = vector.extract_strided_slice %249 {offsets = [14, 0], sizes = [1, 256], strides = [1, 1]} : vector<32x256xf32> to vector<1x256xf32>
    %463 = vector.extract_strided_slice %249 {offsets = [30, 0], sizes = [1, 256], strides = [1, 1]} : vector<32x256xf32> to vector<1x256xf32>
    %464 = tpu.concatenate %462, %463 in 0 : vector<1x256xf32>, vector<1x256xf32> -> vector<2x256xf32>
    %465 = vector.extract_strided_slice %464 {offsets = [0, 0], sizes = [2, 128], strides = [1, 1]} : vector<2x256xf32> to vector<2x128xf32>
    %466 = arith.truncf %465 : vector<2x128xf32> to vector<2x128xbf16>
    %467 = vector.extract_strided_slice %464 {offsets = [0, 128], sizes = [2, 128], strides = [1, 1]} : vector<2x256xf32> to vector<2x128xf32>
    %468 = arith.truncf %467 : vector<2x128xf32> to vector<2x128xbf16>
    %c14_294 = arith.constant 14 : index
    %c0_295 = arith.constant 0 : index
    %c0_296 = arith.constant 0 : index
    %469 = vector.load %arg8[%c14_294, %c0_295, %c0_296] : memref<16x16x128xbf16, #tpu.memory_space<vmem>>, vector<1x16x128xbf16>
    %470 = vector.shape_cast %469 : vector<1x16x128xbf16> to vector<16x128xbf16>
    %cst_297 = arith.constant dense<0.000000e+00> : vector<2x16xf32>
    %471 = tpu.matmul %466, %470, %cst_297 {dimension_numbers = #tpu.dot_dimension_numbers<[1], [1], [0], [0], [0, 0, 1, 0], [], []>} : vector<2x128xbf16>, vector<16x128xbf16>, vector<2x16xf32> -> vector<2x16xf32>
    %472 = arith.addf %457, %471 : vector<2x16xf32>
    %c14_298 = arith.constant 14 : index
    %c0_299 = arith.constant 0 : index
    %c0_300 = arith.constant 0 : index
    %473 = vector.load %arg9[%c14_298, %c0_299, %c0_300] : memref<16x32x128xbf16, #tpu.memory_space<vmem>>, vector<1x32x128xbf16>
    %474 = vector.shape_cast %473 : vector<1x32x128xbf16> to vector<32x128xbf16>
    %cst_301 = arith.constant dense<0.000000e+00> : vector<2x32xf32>
    %475 = tpu.matmul %468, %474, %cst_301 {dimension_numbers = #tpu.dot_dimension_numbers<[1], [1], [0], [0], [0, 0, 1, 0], [], []>} : vector<2x128xbf16>, vector<32x128xbf16>, vector<2x32xf32> -> vector<2x32xf32>
    %476 = arith.addf %461, %475 : vector<2x32xf32>
    %477 = vector.extract_strided_slice %249 {offsets = [15, 0], sizes = [1, 256], strides = [1, 1]} : vector<32x256xf32> to vector<1x256xf32>
    %478 = vector.extract_strided_slice %249 {offsets = [31, 0], sizes = [1, 256], strides = [1, 1]} : vector<32x256xf32> to vector<1x256xf32>
    %479 = tpu.concatenate %477, %478 in 0 : vector<1x256xf32>, vector<1x256xf32> -> vector<2x256xf32>
    %480 = vector.extract_strided_slice %479 {offsets = [0, 0], sizes = [2, 128], strides = [1, 1]} : vector<2x256xf32> to vector<2x128xf32>
    %481 = arith.truncf %480 : vector<2x128xf32> to vector<2x128xbf16>
    %482 = vector.extract_strided_slice %479 {offsets = [0, 128], sizes = [2, 128], strides = [1, 1]} : vector<2x256xf32> to vector<2x128xf32>
    %483 = arith.truncf %482 : vector<2x128xf32> to vector<2x128xbf16>
    %c15_302 = arith.constant 15 : index
    %c0_303 = arith.constant 0 : index
    %c0_304 = arith.constant 0 : index
    %484 = vector.load %arg8[%c15_302, %c0_303, %c0_304] : memref<16x16x128xbf16, #tpu.memory_space<vmem>>, vector<1x16x128xbf16>
    %485 = vector.shape_cast %484 : vector<1x16x128xbf16> to vector<16x128xbf16>
    %cst_305 = arith.constant dense<0.000000e+00> : vector<2x16xf32>
    %486 = tpu.matmul %481, %485, %cst_305 {dimension_numbers = #tpu.dot_dimension_numbers<[1], [1], [0], [0], [0, 0, 1, 0], [], []>} : vector<2x128xbf16>, vector<16x128xbf16>, vector<2x16xf32> -> vector<2x16xf32>
    %487 = arith.addf %472, %486 : vector<2x16xf32>
    %c15_306 = arith.constant 15 : index
    %c0_307 = arith.constant 0 : index
    %c0_308 = arith.constant 0 : index
    %488 = vector.load %arg9[%c15_306, %c0_307, %c0_308] : memref<16x32x128xbf16, #tpu.memory_space<vmem>>, vector<1x32x128xbf16>
    %489 = vector.shape_cast %488 : vector<1x32x128xbf16> to vector<32x128xbf16>
    %cst_309 = arith.constant dense<0.000000e+00> : vector<2x32xf32>
    %490 = tpu.matmul %483, %489, %cst_309 {dimension_numbers = #tpu.dot_dimension_numbers<[1], [1], [0], [0], [0, 0, 1, 0], [], []>} : vector<2x128xbf16>, vector<32x128xbf16>, vector<2x32xf32> -> vector<2x32xf32>
    %491 = arith.addf %476, %490 : vector<2x32xf32>
    %492 = vector.extract_strided_slice %487 {offsets = [0, 0], sizes = [2, 10], strides = [1, 1]} : vector<2x16xf32> to vector<2x10xf32>
    %c26 = arith.constant 26 : index
    %c0_310 = arith.constant 0 : index
    %493 = vector.load %arg11[%c26, %c0_310] : memref<29x256xf32, #tpu.memory_space<vmem>>, vector<1x10xf32>
    %494 = vector.broadcast %493 : vector<1x10xf32> to vector<2x10xf32>
    %495 = arith.addf %492, %494 : vector<2x10xf32>
    %cst_311 = arith.constant dense<0xFF800000> : vector<2xf32>
    %496 = vector.multi_reduction <maximumf>, %495, %cst_311 [1] : vector<2x10xf32> to vector<2xf32>
    %497 = vector.shape_cast %496 : vector<2xf32> to vector<2x1xf32>
    %498 = vector.broadcast %497 : vector<2x1xf32> to vector<2x10xf32>
    %499 = arith.subf %495, %498 : vector<2x10xf32>
    %500 = math.exp %499 : vector<2x10xf32>
    %cst_312 = arith.constant dense<0.000000e+00> : vector<2xf32>
    %501 = vector.multi_reduction <add>, %500, %cst_312 [1] : vector<2x10xf32> to vector<2xf32>
    %502 = vector.shape_cast %501 : vector<2xf32> to vector<2x1xf32>
    %503 = math.log %502 : vector<2x1xf32>
    %504 = arith.addf %503, %497 : vector<2x1xf32>
    %505 = vector.broadcast %504 : vector<2x1xf32> to vector<2x10xf32>
    %506 = arith.subf %495, %505 : vector<2x10xf32>
    %c0_313 = arith.constant 0 : index
    %c0_314 = arith.constant 0 : index
    %507 = vector.load %arg12[%c0_313, %c0_314] : memref<2x10xf32, #tpu.memory_space<vmem>>, vector<2x10xf32>
    tpu.vector_store %arg12[%c0_313, %c0_314], %506 {strides = array<i32>} : memref<2x10xf32, #tpu.memory_space<vmem>>, vector<2x10xf32>,
    %c27 = arith.constant 27 : index
    %c0_315 = arith.constant 0 : index
    %508 = vector.load %arg11[%c27, %c0_315] : memref<29x256xf32, #tpu.memory_space<vmem>>, vector<1x32xf32>
    %509 = vector.broadcast %508 : vector<1x32xf32> to vector<2x32xf32>
    %510 = arith.addf %491, %509 : vector<2x32xf32>
    %cst_316 = arith.constant 0.000000e+00 : f32
    %511 = vector.broadcast %cst_316 : f32 to vector<2x32xf32>
    %512 = arith.maximumf %510, %511 : vector<2x32xf32>
    %c0_317 = arith.constant 0 : index
    %c0_318 = arith.constant 0 : index
    %513 = vector.load %arg10[%c0_317, %c0_318] : memref<32x8xbf16, #tpu.memory_space<vmem>>, vector<32x8xbf16>
    %514 = arith.truncf %512 : vector<2x32xf32> to vector<2x32xbf16>
    %cst_319 = arith.constant dense<0.000000e+00> : vector<2x8xf32>
    %515 = tpu.matmul %514, %513, %cst_319 {dimension_numbers = #tpu.dot_dimension_numbers<[1], [0], [0], [1], [0, 0, 1, 1], [], []>} : vector<2x32xbf16>, vector<32x8xbf16>, vector<2x8xf32> -> vector<2x8xf32>
    %c28 = arith.constant 28 : index
    %c0_320 = arith.constant 0 : index
    %516 = vector.load %arg11[%c28, %c0_320] : memref<29x256xf32, #tpu.memory_space<vmem>>, vector<1x8xf32>
    %517 = vector.broadcast %516 : vector<1x8xf32> to vector<2x8xf32>
    %518 = arith.addf %515, %517 : vector<2x8xf32>
    %519 = math.tanh %518 : vector<2x8xf32>
    %c0_321 = arith.constant 0 : index
    %c0_322 = arith.constant 0 : index
    %520 = vector.load %arg13[%c0_321, %c0_322] : memref<2x8xf32, #tpu.memory_space<vmem>>, vector<2x8xf32>
    tpu.vector_store %arg13[%c0_321, %c0_322], %519 {strides = array<i32>} : memref<2x8xf32, #tpu.memory_space<vmem>>, vector<2x8xf32>,
    return
  }
}

</mosaic_0001>

<bundles_post_ra>
// kernel: net_forward.1
= control target key start
LH: loop header
LB: loop body
LE: loop exit
PB: predicated region body
PF: predicated region fallthrough
CT: control target
= control target key end

     0   :  { %19 = vsyncpa [#allocation3], 0  ;;  %s9707_s0 = inlined_call_operand.vmem [shape: f32[2,28,16], index: 0, kind: input, shape index: {}]   ;;  %s9708_s1 = inlined_call_operand.hbm [shape: bf16[28,128], index: 1, kind: input, shape index: {}]   ;;  %s9709_s2 = inlined_call_operand.hbm [shape: bf16[3,2,128,128], index: 2, kind: input, shape index: {}]   ;;  %s9710_s3 = inlined_call_operand.hbm [shape: bf16[128,256], index: 3, kind: input, shape index: {}]   ;;  %s9711_s4 = inlined_call_operand.hbm [shape: bf16[5,2,256,256], index: 4, kind: input, shape index: {}]   ;;  %s9712_s5 = inlined_call_operand.hbm [shape: bf16[256,128], index: 5, kind: input, shape index: {}]   ;;  %s9713_s6 = inlined_call_operand.hbm [shape: bf16[3,2,128,128], index: 6, kind: input, shape index: {}]   ;;  %s9714_s7 = inlined_call_operand.hbm [shape: bf16[128,256], index: 7, kind: input, shape index: {}]   ;;  %s9715_s8 = inlined_call_operand.hbm [shape: bf16[16,16,128], index: 8, kind: input, shape index: {}]   ;;  %s9716_s9 = inlined_call_operand.hbm [shape: bf16[16,32,128], index: 9, kind: input, shape index: {}]   ;;  %s9717_s10 = inlined_call_operand.vmem [shape: bf16[32,8], index: 10, kind: input, shape index: {}]   ;;  %s9718_s11 = inlined_call_operand.hbm [shape: f32[29,256], index: 11, kind: input, shape index: {}]   ;;  %s9719_s12 = inlined_call_operand.hbm [shape: f32[2,10], index: 12, kind: output, shape index: {0}]   ;;  %s9720_s13 = inlined_call_operand.hbm [shape: f32[2,8], index: 13, kind: output, shape index: {1}]  }
   0x1   :  { %20 = vsyncpa [#allocation6], 0 }
   0x2   :  { %21 = vsyncpa [#allocation9], 0 }
   0x3   :  { %22 = vsyncpa [#allocation12], 0 }
   0x4   :  { %23 = vsyncpa [#allocation15], 0 }
   0x5   :  { %24 = vsyncpa [#allocation18], 0 }
   0x6   :  { %25 = vsyncpa [#allocation4], 0 }
   0x7   :  { %26 = vsyncpa [#allocation21], 0  ;;  %s46_s27 = sshll.u32 %s9709_s2, 4  ;;  %s8905_s28 = smov [#allocation5]   ;;  %s47_s27 = int_to_ptr.hbm [resolvable:$true] %s46_s27 }
   0x8   :  { %s48_s29 = sshll.u32 %s8905_s28, 4  ;;  %s8906_s30 = smov 64   ;;  %s49_s29 = int_to_ptr.vmem [resolvable:$true] %s48_s29 }
   0x9   :  { %s8907_s14 = smov 4   ;;  %s72_s17 = sshll.u32 %s9711_s4, 4  ;;  %s73_s17 = int_to_ptr.hbm [resolvable:$true] %s72_s17 }
   0xa   :  { %54 = dma.hbm_to_vmem [thread:$0]  %s47_s27, 6144, %s49_s29, [#allocation6], %s8906_s30, %s8906_s30, %s8907_s14  }
   0xb   :  { %s8908_s18 = smov [#allocation8]   ;;  %s98_s2 = sshll.u32 %s9713_s6, 4  ;;  %s99_s2 = int_to_ptr.hbm [resolvable:$true] %s98_s2 }
   0xc   :  { %s74_s19 = sshll.u32 %s8908_s18, 4  ;;  %s8909_s22 = smov 128   ;;  %s75_s19 = int_to_ptr.vmem [resolvable:$true] %s74_s19 }
   0xd   :  { %s8910_s23 = smov 8   ;;  %s124_s26 = sshll.u32 %s9715_s8, 4  ;;  %s125_s26 = int_to_ptr.hbm [resolvable:$true] %s124_s26 }
   0xe   :  { %80 = dma.hbm_to_vmem [thread:$0]  %s73_s17, 40960, %s75_s19, [#allocation9], %s8909_s22, %s8909_s22, %s8910_s23  }
   0xf   :  { %s8911_s4 = smov [#allocation11]   ;;  %s8912_s6 = smov [#allocation14]  }
  0x10   :  { %s100_s27 = sshll.u32 %s8911_s4, 4  ;;  %s126_s28 = sshll.u32 %s8912_s6, 4  ;;  %s101_s27 = int_to_ptr.vmem [resolvable:$true] %s100_s27  ;;  %s127_s28 = int_to_ptr.vmem [resolvable:$true] %s126_s28 }
  0x11   :  { %106 = dma.hbm_to_vmem [thread:$0]  %s99_s2, 6144, %s101_s27, [#allocation12], %s8906_s30, %s8906_s30, %s8907_s14  }
  0x12   :  { %s33_s16 = sshll.u32 %s9708_s1, 4  ;;  %s59_s18 = sshll.u32 %s9710_s3, 4  ;;  %s34_s16 = int_to_ptr.hbm [resolvable:$true] %s33_s16  ;;  %s60_s18 = int_to_ptr.hbm [resolvable:$true] %s59_s18 }
  0x13   :  { %132 = dma.hbm_to_vmem [thread:$0]  %s125_s26, 2048, %s127_s28, [#allocation15], %s8906_s30, %s8906_s30, %s8907_s14  }
  0x14   :  { %s8913_s19 = smov [#allocation2]   ;;  %s8914_s21 = smov [#allocation7]  }
  0x15   :  { %s35_s20 = sshll.u32 %s8913_s19, 4  ;;  %s61_s1 = sshll.u32 %s8914_s21, 4  ;;  %s36_s20 = int_to_ptr.vmem [resolvable:$true] %s35_s20  ;;  %s62_s1 = int_to_ptr.vmem [resolvable:$true] %s61_s1 }
  0x16   :  { %41 = dma.hbm_to_vmem [thread:$0]  %s34_s16, 256, %s36_s20, [#allocation3], %s8906_s30, %s8906_s30, %s8907_s14  }
  0x17   :  { %s85_s25 = sshll.u32 %s9712_s5, 4  ;;  %s111_s4 = sshll.u32 %s9714_s7, 4  ;;  %s86_s25 = int_to_ptr.hbm [resolvable:$true] %s85_s25  ;;  %s112_s4 = int_to_ptr.hbm [resolvable:$true] %s111_s4 }
  0x18   :  { %67 = dma.hbm_to_vmem [thread:$0]  %s60_s18, 2048, %s62_s1, [#allocation6], %s8909_s22, %s8909_s22, %s8910_s23  }
  0x19   :  { %s8915_s27 = smov [#allocation10]   ;;  %s8916_s28 = smov [#allocation13]  }
  0x1a   :  { %s87_s6 = sshll.u32 %s8915_s27, 4  ;;  %s113_s5 = sshll.u32 %s8916_s28, 4  ;;  %s88_s6 = int_to_ptr.vmem [resolvable:$true] %s87_s6  ;;  %s114_s5 = int_to_ptr.vmem [resolvable:$true] %s113_s5 }
  0x1b   :  { %93 = dma.hbm_to_vmem [thread:$0]  %s86_s25, 2048, %s88_s6, [#allocation9], %s8906_s30, %s8906_s30, %s8907_s14  }
  0x1c   :  { %s137_s16 = sshll.u32 %s9716_s9, 4  ;;  %s152_s17 = sshll.u32 %s9718_s11, 4  ;;  %s138_s16 = int_to_ptr.hbm [resolvable:$true] %s137_s16  ;;  %s153_s17 = int_to_ptr.hbm [resolvable:$true] %s152_s17 }
  0x1d   :  { %119 = dma.hbm_to_vmem [thread:$0]  %s112_s4, 2048, %s114_s5, [#allocation12], %s8909_s22, %s8909_s22, %s8910_s23  }
  0x1e   :  { %s8917_s18 = smov [#allocation16]   ;;  %s8918_s20 = smov [#allocation17]  }
  0x1f   :  { %s139_s19 = sshll.u32 %s8917_s18, 4  ;;  %s154_s9 = sshll.u32 %s8918_s20, 4  ;;  %s140_s19 = int_to_ptr.vmem [resolvable:$true] %s139_s19  ;;  %s155_s9 = int_to_ptr.vmem [resolvable:$true] %s154_s9 }
  0x20   :  { %145 = dma.hbm_to_vmem [thread:$0]  %s138_s16, 4096, %s140_s19, [#allocation15], %s8906_s30, %s8906_s30, %s8907_s14  }
  0x21   :  { %s8919_s21 = smov 256   ;;  %s8920_s1 = smov 16  }
  0x22   :  { %160 = dma.hbm_to_vmem [thread:$0]  %s153_s17, 1024, %s155_s9, [#allocation18], %s8919_s21, %s8919_s21, %s8920_s1  }
  0x23   :  { %8889 = dma.done.wait [#allocation3], 256  }
  0x24   :  { %8890 = vsyncadd [#allocation3], 4294967040 }
  0x25   :  { %8891 = dma.done.wait [#allocation6], 8192  }
  0x26   :  { %8892 = vsyncadd [#allocation6], 4294959104 }
  0x27   :  { %8893 = dma.done.wait [#allocation9], 43008  }
  0x28   :  { %8894 = vsyncadd [#allocation9], 4294924288 }
  0x29   :  { %8895 = dma.done.wait [#allocation12], 8192  }
  0x2a   :  { %8896 = vsyncadd [#allocation12], 4294959104 }
  0x2b   :  { %8897 = dma.done.wait [#allocation15], 6144  }
  0x2c   :  { %8898 = vsyncadd [#allocation15], 4294961152 }
  0x2d   :  { %8899 = dma.done.wait [#allocation18], 1024  }
  0x2e   :  { %8900 = vsyncadd [#allocation18], 4294966272  ;;  %v5998_v0 = vld [vmem:[%s9707_s0 + $0x20] sm:$0xff]  ;;  %v5999_v2 = vld [vmem:[%s9707_s0 + $0x28] sm:$0xff]  ;;  %vm258_vm0 = vcmask 1045504   ;;  %vm254_vm1 = vcmask 228352  }
  0x2f   :  { %v206_v1 = vld [vmem:[%s9707_s0] sm:$0xff]  ;;  %281 = vxpose.xlu1.b32.start [1/4] (short) (narrow) %v5998_v0, 16  ;;  %v207_v3 = vld [vmem:[%s9707_s0 + $0x8] sm:$0xff]  ;;  %v6000_v4 = vld [vmem:[%s9707_s0 + $0x30] sm:$0xff]  ;;  %vm4856_vm2 = vcmask 1040384   ;;  %vm5895_vm3 = vcmask 74752  }
  0x30   :  { %210 = vxpose.xlu0.b32.start [1/4] (short) (narrow) %v206_v1, 16  ;;  %v208_v5 = vld [vmem:[%s9707_s0 + $0x10] sm:$0xff]  ;;  %v6001_v6 = vld [vmem:[%s9707_s0 + $0x38] sm:$0xf]  ;;  %v5995_v8 = vld [vmem:[#allocation2 + $0x8] sm:$0xf] }
  0x31   :  { %v209_v7 = vld [vmem:[%s9707_s0 + $0x18] sm:$0xf]  ;;  %v8061_v9 = vld [vmem:[#allocation2 + $0x8] sm:$0x30]  ;;  %v8060_v12 = vld [vmem:[#allocation2] sm:$0xff]  ;;  %vm5931_vm4 = vcmask 261120  }
  0x32   :  { %v5996_v10 = vor.u32 %v8061_v9, %v5995_v8  ;;  %v8069_v13 = vld [vmem:[#allocation5 + $0x38] sm:$0xff]  ;;  %v8068_v14 = vld [vmem:[#allocation5 + $0x30] sm:$0xff]  ;;  %v8067_v15 = vld [vmem:[#allocation5 + $0x28] sm:$0xff]  ;;  %s5969_s19 = sshll.u32 %s9720_s13, 4  ;;  %vm5949_vm5 = vcmask 58368   ;;  %s8922_s20 = smov [#allocation19]   ;;  %s5970_s19 = int_to_ptr.hbm [resolvable:$true] %s5969_s19 }
  0x33   :  { %407 = vmatpush.bf16.msra.mxu2 %v8069_v13  ;;  %v8066_v16 = vld [vmem:[#allocation5 + $0x20] sm:$0xff]  ;;  %v8065_v23 = vld [vmem:[#allocation5 + $0x18] sm:$0xff]  ;;  %v8064_v24 = vld [vmem:[#allocation5 + $0x10] sm:$0xff]  ;;  %s5956_s9 = sshll.u32 %s8922_s20, 4  ;;  %s5958_s11 = sshll.u32 %s9719_s12, 4  ;;  %s5957_s9 = int_to_ptr.vmem [resolvable:$true] %s5956_s9  ;;  %s5959_s11 = int_to_ptr.hbm [resolvable:$true] %s5958_s11 }
  0x34   :  { %v260_v11 = vsel %vm258_vm0, %v5996_v10, 0  ;;  %v8063_v25 = vld [vmem:[#allocation5 + $0x8] sm:$0xff]  ;;  %v8062_v26 = vld [vmem:[#allocation5] sm:$0xff]  ;;  %v8077_v27 = vld [vmem:[#allocation5 + $0x78] sm:$0xff] }
  0x35   :  { %268 = vmatpush.bf16.msra.mxu0 %v260_v11  ;;  %323 = vmatpush.bf16.msra.mxu1 %v260_v11  ;;  %v8076_v29 = vld [vmem:[#allocation5 + $0x70] sm:$0xff]  ;;  %v331_v30 = vld [vmem:[#allocation17] ss:$0 sm:$0xff]  ;;  %v8075_v31 = vld [vmem:[#allocation5 + $0x68] sm:$0xff] }
  0x36   :  { %498 = vmatpush.bf16.msra.mxu3 %v8077_v27  ;;  %v8074_v36 = vld [vmem:[#allocation5 + $0x60] sm:$0xff]  ;;  %v8073_v46 = vld [vmem:[#allocation5 + $0x58] sm:$0xff]  ;;  %v8072_v47 = vld [vmem:[#allocation5 + $0x50] sm:$0xff] }
  0x37   :  { %282 = vxpose.xlu1.b32.cont [2/4] (short) (narrow) %v5999_v2, 16  ;;  %408 = vmatpush.bf16.msra.mxu2 %v8068_v14  ;;  %v8071_v48 = vld [vmem:[#allocation5 + $0x48] sm:$0xff]  ;;  %v8070_v49 = vld [vmem:[#allocation5 + $0x40] sm:$0xff]  ;;  %v8085_v50 = vld [vmem:[#allocation5 + $0xb8] sm:$0xff] }
  0x38   :  { %211 = vxpose.xlu0.b32.cont [2/4] (short) (narrow) %v207_v3, 16  ;;  %v8084_v52 = vld [vmem:[#allocation5 + $0xb0] sm:$0xff]  ;;  %v358_v53 = vld [vmem:[#allocation17 + $0x1] ss:$0 sm:$0xff]  ;;  %v8083_v54 = vld [vmem:[#allocation5 + $0xa8] sm:$0xff] }
  0x39   :  { %269 = vmatpush.bf16.msra.mxu0 %v8060_v12  ;;  %324 = vmatpush.bf16.msra.mxu1 %v8060_v12  ;;  %v8082_v58 = vld [vmem:[#allocation5 + $0xa0] sm:$0xff]  ;;  %v8093_v10 = vld [vmem:[#allocation5 + $0xf8] sm:$0xff]  ;;  %v8092_v12 = vld [vmem:[#allocation5 + $0xf0] sm:$0xff] }
  0x3a   :  { %499 = vmatpush.bf16.msra.mxu3 %v8076_v29  ;;  %v8078_v8 = vld [vmem:[#allocation5 + $0x80] sm:$0xff]  ;;  %v8091_v14 = vld [vmem:[#allocation5 + $0xe8] sm:$0xff] }
  0x3b   :  { %409 = vmatpush.bf16.msra.mxu2 %v8067_v15  ;;  %v449_v11 = vld [vmem:[#allocation17 + $0x2] ss:$0 sm:$0xff] }
  0x3d   :  { %593 = vmatpush.bf16.msrb.mxu0 %v8085_v50  ;;  %684 = vmatpush.bf16.msrb.mxu1 %v8093_v10 }
  0x3e   :  { %500 = vmatpush.bf16.msra.mxu3 %v8075_v31 }
  0x3f   :  { %283 = vxpose.xlu1.b32.cont [3/4] (short) (narrow) %v6000_v4, 16  ;;  %410 = vmatpush.bf16.msra.mxu2 %v8066_v16 }
  0x40   :  { %212 = vxpose.xlu0.b32.cont [3/4] (short) (narrow) %v208_v5, 16  ;;  %v8081_v5 = vld [vmem:[#allocation5 + $0x98] sm:$0xff] }
  0x41   :  { %594 = vmatpush.bf16.msrb.mxu0 %v8084_v52  ;;  %685 = vmatpush.bf16.msrb.mxu1 %v8092_v12 }
  0x42   :  { %501 = vmatpush.bf16.msra.mxu3 %v8074_v36  ;;  %v8101_v36 = vld [vmem:[#allocation5 + $0x138] sm:$0xff] }
  0x43   :  { %411 = vmatpush.bf16.msra.mxu2 %v8065_v23 }
  0x45   :  { %595 = vmatpush.bf16.msrb.mxu0 %v8083_v54  ;;  %686 = vmatpush.bf16.msrb.mxu1 %v8091_v14 }
  0x46   :  { %502 = vmatpush.bf16.msra.mxu3 %v8073_v46 }
  0x47   :  { %284 = vxpose.xlu1.b32.end [4/4] (short) (narrow) %v6001_v6, 16  ;;  %412 = vmatpush.bf16.msra.mxu2 %v8064_v24  ;;  %v8080_v6 = vld [vmem:[#allocation5 + $0x90] sm:$0xff] }
  0x48   :  { %213 = vxpose.xlu0.b32.end [4/4] (short) (narrow) %v209_v7, 16  ;;  %v8079_v7 = vld [vmem:[#allocation5 + $0x88] sm:$0xff] }
  0x49   :  { %596 = vmatpush.bf16.msrb.mxu0 %v8082_v58  ;;  %v8094_v58 = vld [vmem:[#allocation5 + $0x100] sm:$0xff] }
  0x4a   :  { %503 = vmatpush.bf16.msra.mxu3 %v8072_v47 }
  0x4b   :  { %413 = vmatpush.bf16.msra.mxu2 %v8063_v25 }
  0x4d   :  { %597 = vmatpush.bf16.msrb.mxu0 %v8081_v5  ;;  %v8106_v5 = vld [vmem:[#allocation5 + $0x160] sm:$0xff] }
  0x4e   :  { %504 = vmatpush.bf16.msra.mxu3 %v8071_v48 }
  0x4f   :  { %414 = vmatpush.bf16.msra.mxu2 %v8062_v26 }
  0x51   :  { %598 = vmatpush.bf16.msrb.mxu0 %v8080_v6 }
  0x52   :  { %505 = vmatpush.bf16.msra.mxu3 %v8070_v49 }
  0x53   :  { %779 = vmatpush.bf16.msrb.mxu2 %v8101_v36  ;;  %v8121_v36 = vld [vmem:[#allocation7 + $0x54] sm:$0xf0] }
  0x55   :  { %599 = vmatpush.bf16.msrb.mxu0 %v8079_v7 }
  0x59   :  { %600 = vmatpush.bf16.msrb.mxu0 %v8078_v8 }
  0xd3   :  { %v297_v17 = vpop.trf.xlu1 }
  0xd4   :  { %v226_v18 = vpop.trf.xlu0 }
  0xdb   :  { %v298_v19 = vpop.trf.xlu1 }
  0xdc   :  { %v227_v20 = vpop.trf.xlu0  ;;  %v313_v21 = vpack.c.bf16 %v298_v19, %v297_v17  ;;  %v8090_v19 = vld [vmem:[#allocation5 + $0xe0] sm:$0xff] }
  0xdd   :  { %v242_v22 = vpack.c.bf16 %v227_v20, %v226_v18  ;;  %687 = vmatpush.bf16.msrb.mxu1 %v8090_v19  ;;  %v8104_v19 = vld [vmem:[#allocation5 + $0x150] sm:$0xff] }
  0xde   :  { %6002 = vmatmul.msk.bf16.vlgmr.msra.gmra.mxu1 %vm254_vm1, %v313_v21 }
  0xdf   :  { %5997 = vmatmul.msk.bf16.vlgmr.msra.gmra.mxu0 %vm254_vm1, %v242_v22 }
 0x15b   :  { %v326_v33 = vpop.f32.mrf.mxu1 }
 0x15c   :  { %v271_v28 = vpop.f32.mrf.mxu0  ;;  %v9082_v41 = vadd.f32 %v331_v30, %v326_v33  ;;  %v8088_v33 = vld [vmem:[#allocation5 + $0xd0] sm:$0xff] }
 0x15d   :  { %v9074_v32 = vadd.f32 %v331_v30, %v271_v28 }
 0x15e   :  { %v338_v43 = vmax.f32 %v9082_v41, 0.0 }
 0x15f   :  { %v336_v37 = vmax.f32 %v9074_v32, 0.0  ;;  %v8089_v32 = vld [vmem:[#allocation5 + $0xd8] sm:$0xff] }
 0x160   :  { %688 = vmatpush.bf16.msrb.mxu1 %v8089_v32  ;;  %v6247_v32 = vld [vmem:[#allocation7 + $0x68] sm:$0xf0] }
 0x163   :  { %v328_v40 = vpop.f32.mrf.mxu1 }
 0x164   :  { %v273_v34 = vpop.f32.mrf.mxu0  ;;  %v9084_v42 = vadd.f32 %v331_v30, %v328_v40  ;;  %689 = vmatpush.bf16.msrb.mxu1 %v8088_v33  ;;  %v8099_v40 = vld [vmem:[#allocation5 + $0x128] sm:$0xff] }
 0x165   :  { %v9076_v35 = vadd.f32 %v331_v30, %v273_v34  ;;  %v8087_v34 = vld [vmem:[#allocation5 + $0xc8] sm:$0xff] }
 0x166   :  { %v339_v44 = vmax.f32 %v9084_v42, 0.0 }
 0x167   :  { %v337_v38 = vmax.f32 %v9076_v35, 0.0  ;;  %v8086_v35 = vld [vmem:[#allocation5 + $0xc0] sm:$0xff] }
 0x168   :  { %v357_v45 = vpack.c.bf16 %v339_v44, %v338_v43  ;;  %690 = vmatpush.bf16.msrb.mxu1 %v8087_v34 }
 0x169   :  { %v356_v39 = vpack.c.bf16 %v337_v38, %v336_v37 }
 0x16b   :  { %415 = vmatmul.bf16.vlgmr.msra.gmra.mxu2 %v356_v39  ;;  %v544_v39 = vld [vmem:[#allocation17 + $0x3] ss:$0 sm:$0xff] }
 0x16c   :  { %691 = vmatpush.bf16.msrb.mxu1 %v8086_v35  ;;  %v6237_v35 = vld [vmem:[#allocation7 + $0x50] sm:$0xf] }
 0x17b   :  { %420 = vmatmul.bf16.gmra.mxu2 %v357_v45 }
 0x1ee   :  { %v416_v51 = vpop.f32.mrf.mxu2 }
 0x1ef   :  { %v417_v55 = vadd.f32 %v416_v51, %v358_v53 }
 0x1f1   :  { %v426_v59 = vmax.f32 %v417_v55, 0.0  ;;  %v8097_v55 = vld [vmem:[#allocation5 + $0x118] sm:$0xff] }
 0x1f6   :  { %v418_v56 = vpop.f32.mrf.mxu2 }
 0x1f7   :  { %v419_v57 = vadd.f32 %v418_v56, %v358_v53  ;;  %v8096_v56 = vld [vmem:[#allocation5 + $0x110] sm:$0xff] }
 0x1f9   :  { %v427_v60 = vmax.f32 %v419_v57, 0.0  ;;  %v8095_v57 = vld [vmem:[#allocation5 + $0x108] sm:$0xff] }
 0x1fb   :  { %v447_v61 = vpack.c.bf16 %v427_v60, %v426_v59  ;;  %v8109_v60 = vld [vmem:[#allocation5 + $0x178] sm:$0xff] }
 0x1fc   :  { %870 = vmatpush.bf16.msrb.mxu3 %v8109_v60 }
 0x1fd   :  { %506 = vmatmul.bf16.vlgmr.msra.gmra.mxu3 %v447_v61  ;;  %v635_v61 = vld [vmem:[#allocation17 + $0x4] ss:$0 sm:$0xff] }
 0x1fe   :  { %v421_v62 = vpop.f32.mrf.mxu2 }
 0x1ff   :  { %v422_v63 = vadd.f32 %v421_v62, %v358_v53  ;;  %v8108_v62 = vld [vmem:[#allocation5 + $0x170] sm:$0xff] }
 0x200   :  { %871 = vmatpush.bf16.msrb.mxu3 %v8108_v62  ;;  %v8117_v62 = vld [vmem:[#allocation7 + $0x34] sm:$0xf0] }
 0x201   :  { %v428_v2 = vmax.f32 %v422_v63, 0.0 }
 0x206   :  { %v423_v0 = vpop.f32.mrf.mxu2 }
 0x207   :  { %v424_v1 = vadd.f32 %v423_v0, %v358_v53  ;;  %v8107_v0 = vld [vmem:[#allocation5 + $0x168] sm:$0xff] }
 0x208   :  { %872 = vmatpush.bf16.msrb.mxu3 %v8107_v0 }
 0x209   :  { %v429_v3 = vmax.f32 %v424_v1, 0.0 }
 0x20b   :  { %v448_v4 = vpack.c.bf16 %v429_v3, %v428_v2 }
 0x20c   :  { %873 = vmatpush.bf16.msrb.mxu3 %v8106_v5  ;;  %v6213_v5 = vld [vmem:[#allocation7 + $0x20] sm:$0xf] }
 0x20d   :  { %511 = vmatmul.bf16.gmra.mxu3 %v448_v4 }
 0x280   :  { %v507_v9 = vpop.f32.mrf.mxu3 }
 0x281   :  { %v508_v13 = vadd.f32 %v507_v9, %v449_v11  ;;  %v8105_v9 = vld [vmem:[#allocation5 + $0x158] sm:$0xff] }
 0x282   :  { %874 = vmatpush.bf16.msrb.mxu3 %v8105_v9  ;;  %v8114_v9 = vld [vmem:[#allocation7 + $0x24] sm:$0xf] }
 0x283   :  { %v9092_v16 = vadd.f32 %v508_v13, %v336_v37 }
 0x285   :  { %v521_v20 = vmax.f32 %v9092_v16, 0.0 }
 0x286   :  { %875 = vmatpush.bf16.msrb.mxu3 %v8104_v19  ;;  %v8112_v19 = vld [vmem:[#allocation7 + $0x14] sm:$0xf] }
 0x288   :  { %v509_v15 = vpop.f32.mrf.mxu3 }
 0x289   :  { %v510_v17 = vadd.f32 %v509_v15, %v449_v11 }
 0x28b   :  { %v9096_v18 = vadd.f32 %v510_v17, %v337_v38  ;;  %v8100_v38 = vld [vmem:[#allocation5 + $0x130] sm:$0xff] }
 0x28c   :  { %780 = vmatpush.bf16.msrb.mxu2 %v8100_v38  ;;  %v8120_v38 = vld [vmem:[#allocation7 + $0x54] sm:$0xf] }
 0x28d   :  { %v522_v21 = vmax.f32 %v9096_v18, 0.0 }
 0x28f   :  { %v542_v22 = vpack.c.bf16 %v522_v21, %v521_v20 }
 0x290   :  { %v512_v23 = vpop.f32.mrf.mxu3  ;;  %781 = vmatpush.bf16.msrb.mxu2 %v8099_v40  ;;  %v6238_v40 = vor.u32 %v8121_v36, %v6237_v35  ;;  %v8157_v35 = vld [vmem:[#allocation8 + $0xf4] sm:$0xf0]  ;;  %v8140_v36 = vld [vmem:[#allocation8 + $0x74] sm:$0xf] }
 0x291   :  { %601 = vmatmul.bf16.vlgmr.msrb.gmra.mxu0 %v542_v22  ;;  %v513_v24 = vadd.f32 %v512_v23, %v449_v11  ;;  %v6253_v22 = vld [vmem:[#allocation7 + $0x70] sm:$0xf]  ;;  %v8125_v23 = vld [vmem:[#allocation7 + $0x74] sm:$0xf0] }
 0x293   :  { %v9106_v26 = vadd.f32 %v513_v24, %v338_v43  ;;  %v8124_v24 = vld [vmem:[#allocation7 + $0x74] sm:$0xf] }
 0x295   :  { %v523_v29 = vmax.f32 %v9106_v26, 0.0  ;;  %v6254_v26 = vor.u32 %v8125_v23, %v6253_v22  ;;  %v6197_v23 = vld [vmem:[#allocation7] sm:$0xf] }
 0x297   :  { %1002 = vmatpush.bf16.msra.mxu0 %v6254_v26 }
 0x298   :  { %v514_v25 = vpop.f32.mrf.mxu3 }
 0x299   :  { %v515_v27 = vadd.f32 %v514_v25, %v449_v11 }
 0x29b   :  { %v9110_v28 = vadd.f32 %v515_v27, %v339_v44  ;;  %v8098_v44 = vld [vmem:[#allocation5 + $0x120] sm:$0xff]  ;;  %v6255_v27 = vld [vmem:[#allocation7 + $0x78] sm:$0xf0] }
 0x29c   :  { %782 = vmatpush.bf16.msrb.mxu2 %v8098_v44  ;;  %v8119_v44 = vld [vmem:[#allocation7 + $0x44] sm:$0xf0] }
 0x29d   :  { %v524_v30 = vmax.f32 %v9110_v28, 0.0  ;;  %v6245_v28 = vld [vmem:[#allocation7 + $0x60] sm:$0xf] }
 0x29f   :  { %v543_v31 = vpack.c.bf16 %v524_v30, %v523_v29 }
 0x2a0   :  { %783 = vmatpush.bf16.msrb.mxu2 %v8097_v55 }
 0x2a1   :  { %606 = vmatmul.bf16.gmra.mxu0 %v543_v31  ;;  %v8122_v31 = vld [vmem:[#allocation7 + $0x64] sm:$0xf] }
 0x2a2   :  { %v6250_v34 = vor.u32 %v8122_v31, %v6247_v32  ;;  %v6317_v31 = vld [vmem:[#allocation8 + $0x70] sm:$0xf]  ;;  %v8141_v32 = vld [vmem:[#allocation8 + $0x74] sm:$0xf0] }
 0x2a4   :  { %784 = vmatpush.bf16.msrb.mxu2 %v8096_v56 }
 0x2a8   :  { %785 = vmatpush.bf16.msrb.mxu2 %v8095_v57 }
 0x2ac   :  { %786 = vmatpush.bf16.msrb.mxu2 %v8094_v58 }
 0x30e   :  { %v602_v37 = vpop.f32.mrf.mxu0 }
 0x30f   :  { %v603_v41 = vadd.f32 %v602_v37, %v544_v39  ;;  %v730_v37 = vld [vmem:[#allocation17 + $0x5] ss:$0 sm:$0xff] }
 0x311   :  { %v612_v45 = vmax.f32 %v603_v41, 0.0 }
 0x316   :  { %v604_v42 = vpop.f32.mrf.mxu0 }
 0x317   :  { %v605_v43 = vadd.f32 %v604_v42, %v544_v39 }
 0x319   :  { %v613_v46 = vmax.f32 %v605_v43, 0.0  ;;  %v6229_v43 = vld [vmem:[#allocation7 + $0x40] sm:$0xf] }
 0x31b   :  { %v633_v47 = vpack.c.bf16 %v613_v46, %v612_v45  ;;  %v8118_v46 = vld [vmem:[#allocation7 + $0x44] sm:$0xf] }
 0x31d   :  { %692 = vmatmul.bf16.vlgmr.msrb.gmra.mxu1 %v633_v47  ;;  %v6231_v47 = vld [vmem:[#allocation7 + $0x48] sm:$0xf0] }
 0x31e   :  { %v607_v48 = vpop.f32.mrf.mxu0 }
 0x31f   :  { %v608_v49 = vadd.f32 %v607_v48, %v544_v39 }
 0x321   :  { %v614_v52 = vmax.f32 %v608_v49, 0.0  ;;  %v6230_v49 = vor.u32 %v8119_v44, %v6229_v43 }
 0x326   :  { %v609_v50 = vpop.f32.mrf.mxu0 }
 0x327   :  { %v610_v51 = vadd.f32 %v609_v50, %v544_v39  ;;  %v6239_v39 = vld [vmem:[#allocation7 + $0x58] sm:$0xf0] }
 0x328   :  { %v6242_v42 = vor.u32 %v8120_v38, %v6239_v39 }
 0x329   :  { %v615_v53 = vmax.f32 %v610_v51, 0.0 }
 0x32b   :  { %v634_v54 = vpack.c.bf16 %v615_v53, %v614_v52  ;;  %v6234_v52 = vor.u32 %v8118_v46, %v6231_v47  ;;  %v6373_v46 = vld [vmem:[#allocation8 + $0xe0] sm:$0xf]  ;;  %v8155_v47 = vld [vmem:[#allocation8 + $0xe4] sm:$0xf0] }
 0x32d   :  { %697 = vmatmul.bf16.gmra.mxu1 %v634_v54 }
 0x39a   :  { %v693_v59 = vpop.f32.mrf.mxu1 }
 0x39b   :  { %v694_v63 = vadd.f32 %v693_v59, %v635_v61 }
 0x39d   :  { %v9120_v2 = vadd.f32 %v694_v63, %v521_v20  ;;  %v8103_v20 = vld [vmem:[#allocation5 + $0x148] sm:$0xff]  ;;  %v8116_v63 = vld [vmem:[#allocation7 + $0x34] sm:$0xf] }
 0x39e   :  { %876 = vmatpush.bf16.msrb.mxu3 %v8103_v20 }
 0x39f   :  { %v707_v6 = vmax.f32 %v9120_v2, 0.0 }
 0x3a2   :  { %v695_v1 = vpop.f32.mrf.mxu1 }
 0x3a3   :  { %v696_v3 = vadd.f32 %v695_v1, %v635_v61  ;;  %v6223_v1 = vld [vmem:[#allocation7 + $0x38] sm:$0xf0] }
 0x3a5   :  { %v9124_v4 = vadd.f32 %v696_v3, %v522_v21  ;;  %v8102_v21 = vld [vmem:[#allocation5 + $0x140] sm:$0xff]  ;;  %v6226_v3 = vor.u32 %v8116_v63, %v6223_v1  ;;  %v8136_v63 = vld [vmem:[#allocation8 + $0x54] sm:$0xf] }
 0x3a6   :  { %877 = vmatpush.bf16.msrb.mxu3 %v8102_v21  ;;  %v6207_v21 = vld [vmem:[#allocation7 + $0x18] sm:$0xf0]  ;;  %v8152_v1 = vld [vmem:[#allocation8 + $0xd4] sm:$0xf] }
 0x3a7   :  { %v708_v7 = vmax.f32 %v9124_v4, 0.0  ;;  %v6210_v22 = vor.u32 %v8112_v19, %v6207_v21  ;;  %v6295_v19 = vld [vmem:[#allocation8 + $0x48] sm:$0xf0]  ;;  %v8150_v21 = vld [vmem:[#allocation8 + $0xc4] sm:$0xf] }
 0x3a9   :  { %v728_v8 = vpack.c.bf16 %v708_v7, %v707_v6 }
 0x3aa   :  { %v698_v10 = vpop.f32.mrf.mxu1 }
 0x3ab   :  { %787 = vmatmul.bf16.vlgmr.msrb.gmra.mxu2 %v728_v8  ;;  %v699_v11 = vadd.f32 %v698_v10, %v635_v61  ;;  %v8115_v8 = vld [vmem:[#allocation7 + $0x24] sm:$0xf0] }
 0x3ac   :  { %v6214_v10 = vor.u32 %v8115_v8, %v6213_v5 }
 0x3ad   :  { %v9134_v13 = vadd.f32 %v699_v11, %v523_v29  ;;  %v8123_v29 = vld [vmem:[#allocation7 + $0x64] sm:$0xf0]  ;;  %v6215_v11 = vld [vmem:[#allocation7 + $0x28] sm:$0xf0] }
 0x3ae   :  { %v6246_v33 = vor.u32 %v8123_v29, %v6245_v28  ;;  %v9146_v29 = vld [vmem:[#allocation17 + $0x6] ss:$0 sm:$0xff] }
 0x3af   :  { %v709_v16 = vmax.f32 %v9134_v13, 0.0 }
 0x3b0   :  { %1003 = vmatpush.bf16.msra.mxu0 %v6246_v33  ;;  %v6381_v33 = vld [vmem:[#allocation8 + $0xf0] sm:$0xf] }
 0x3b1   :  { %v6382_v38 = vor.u32 %v8157_v35, %v6381_v33 }
 0x3b2   :  { %v700_v12 = vpop.f32.mrf.mxu1 }
 0x3b3   :  { %v701_v14 = vadd.f32 %v700_v12, %v635_v61  ;;  %v6221_v61 = vld [vmem:[#allocation7 + $0x30] sm:$0xf]  ;;  %v6218_v12 = vor.u32 %v8114_v9, %v6215_v11  ;;  %1270 = vmatpush.bf16.msra.mxu3 %v6382_v38  ;;  %v6367_v9 = vld [vmem:[#allocation8 + $0xd8] sm:$0xf0]  ;;  %v8135_v11 = vld [vmem:[#allocation8 + $0x44] sm:$0xf0] }
 0x3b4   :  { %1004 = vmatpush.bf16.msra.mxu0 %v6238_v40  ;;  %v6222_v0 = vor.u32 %v8117_v62, %v6221_v61  ;;  %v8156_v40 = vld [vmem:[#allocation8 + $0xf4] sm:$0xf] }
 0x3b5   :  { %v9138_v15 = vadd.f32 %v701_v14, %v524_v30  ;;  %v6258_v30 = vor.u32 %v8124_v24, %v6255_v27  ;;  %v6205_v14 = vld [vmem:[#allocation7 + $0x10] sm:$0xf]  ;;  %v8111_v24 = vld [vmem:[#allocation7 + $0x4] sm:$0xf0]  ;;  %v6199_v27 = vld [vmem:[#allocation7 + $0x8] sm:$0xf0] }
 0x3b6   :  { %v6198_v26 = vor.u32 %v8111_v24, %v6197_v23 }
 0x3b7   :  { %v710_v17 = vmax.f32 %v9138_v15, 0.0  ;;  %1021 = vmatpush.bf16.msra.mxu1 %v6258_v30  ;;  %v8131_v15 = vld [vmem:[#allocation8 + $0x24] sm:$0xf0] }
 0x3b8   :  { %1005 = vmatpush.bf16.msra.mxu0 %v6230_v49  ;;  %v6374_v49 = vor.u32 %v8155_v47, %v6373_v46  ;;  %v6351_v46 = vld [vmem:[#allocation8 + $0xb8] sm:$0xf0] }
 0x3b9   :  { %v729_v18 = vpack.c.bf16 %v710_v17, %v709_v16 }
 0x3ba   :  { %1271 = vmatpush.bf16.msra.mxu3 %v6374_v49  ;;  %v8130_v49 = vld [vmem:[#allocation8 + $0x24] sm:$0xf] }
 0x3bb   :  { %792 = vmatmul.bf16.gmra.mxu2 %v729_v18  ;;  %1022 = vmatpush.bf16.msra.mxu1 %v6250_v34  ;;  %v8113_v18 = vld [vmem:[#allocation7 + $0x14] sm:$0xf0]  ;;  %v6318_v34 = vor.u32 %v8141_v32, %v6317_v31 }
 0x3bc   :  { %1006 = vmatpush.bf16.msra.mxu0 %v6222_v0  ;;  %v6206_v20 = vor.u32 %v8113_v18, %v6205_v14  ;;  %v6303_v0 = vld [vmem:[#allocation8 + $0x58] sm:$0xf0]  ;;  %v6357_v14 = vld [vmem:[#allocation8 + $0xc0] sm:$0xf]  ;;  %v8134_v18 = vld [vmem:[#allocation8 + $0x44] sm:$0xf] }
 0x3bd   :  { %1251 = vmatpush.bf16.msra.mxu2 %v6318_v34  ;;  %v6306_v8 = vor.u32 %v8136_v63, %v6303_v0  ;;  %v6271_v63 = vld [vmem:[#allocation8 + $0x18] sm:$0xf0]  ;;  %v8144_v0 = vld [vmem:[#allocation8 + $0x94] sm:$0xf] }
 0x3bf   :  { %1023 = vmatpush.bf16.msra.mxu1 %v6242_v42  ;;  %v6309_v42 = vld [vmem:[#allocation8 + $0x60] sm:$0xf] }
 0x3c0   :  { %1007 = vmatpush.bf16.msra.mxu0 %v6214_v10  ;;  %v6293_v10 = vld [vmem:[#allocation8 + $0x40] sm:$0xf] }
 0x3c3   :  { %1024 = vmatpush.bf16.msra.mxu1 %v6234_v52 }
 0x3c4   :  { %1008 = vmatpush.bf16.msra.mxu0 %v6206_v20  ;;  %v6294_v20 = vor.u32 %v8135_v11, %v6293_v10  ;;  %v6325_v10 = vld [vmem:[#allocation8 + $0x80] sm:$0xf] }
 0x3c7   :  { %1025 = vmatpush.bf16.msra.mxu1 %v6226_v3 }
 0x3c8   :  { %1009 = vmatpush.bf16.msra.mxu0 %v6198_v26  ;;  %v8133_v26 = vld [vmem:[#allocation8 + $0x34] sm:$0xf0] }
 0x3cb   :  { %1026 = vmatpush.bf16.msra.mxu1 %v6218_v12  ;;  %v6370_v12 = vor.u32 %v8152_v1, %v6367_v9  ;;  %v6335_v1 = vld [vmem:[#allocation8 + $0x98] sm:$0xf0]  ;;  %v8127_v9 = vld [vmem:[#allocation8 + $0x4] sm:$0xf0] }
 0x3cf   :  { %1027 = vmatpush.bf16.msra.mxu1 %v6210_v22  ;;  %v6359_v22 = vld [vmem:[#allocation8 + $0xc8] sm:$0xf0] }
 0x3d0   :  { %v6362_v31 = vor.u32 %v8150_v21, %v6359_v22  ;;  %v916_v22 = vld [vmem:[#allocation17 + $0x7] ss:$8 sm:$0x3] }
 0x42e   :  { %v788_v25 = vpop.f32.mrf.mxu2 }
 0x42f   :  { %v789_v41 = vadd.f32 %v788_v25, %v730_v37  ;;  %v8110_v25 = vld [vmem:[#allocation7 + $0x4] sm:$0xf] }
 0x430   :  { %v6202_v28 = vor.u32 %v8110_v25, %v6199_v27  ;;  %v6285_v25 = vld [vmem:[#allocation8 + $0x30] sm:$0xf] }
 0x431   :  { %v798_v50 = vmax.f32 %v789_v41, 0.0  ;;  %v6383_v41 = vld [vmem:[#allocation8 + $0xf8] sm:$0xf0] }
 0x432   :  { %1028 = vmatpush.bf16.msra.mxu1 %v6202_v28  ;;  %v6386_v44 = vor.u32 %v8156_v40, %v6383_v41  ;;  %v6298_v28 = vor.u32 %v8134_v18, %v6295_v19  ;;  %v6349_v40 = vld [vmem:[#allocation8 + $0xb0] sm:$0xf]  ;;  %v8149_v41 = vld [vmem:[#allocation8 + $0xb4] sm:$0xf0]  ;;  %v8142_v19 = vld [vmem:[#allocation8 + $0x84] sm:$0xf] }
 0x436   :  { %v790_v45 = vpop.f32.mrf.mxu2  ;;  %1308 = vmatpush.bf16.msrb.mxu1 %v6386_v44  ;;  %v6287_v44 = vld [vmem:[#allocation8 + $0x38] sm:$0xf0] }
 0x437   :  { %v791_v48 = vadd.f32 %v790_v45, %v730_v37  ;;  %v8139_v45 = vld [vmem:[#allocation8 + $0x64] sm:$0xf0] }
 0x439   :  { %v799_v51 = vmax.f32 %v791_v48, 0.0  ;;  %v6310_v48 = vor.u32 %v8139_v45, %v6309_v42  ;;  %v8132_v42 = vld [vmem:[#allocation8 + $0x34] sm:$0xf] }
 0x43a   :  { %v8148_v45 = vld [vmem:[#allocation8 + $0xb4] sm:$0xf]  ;;  %v6290_v47 = vor.u32 %v8132_v42, %v6287_v44  ;;  %v6447_v42 = vld [vmem:[#allocation8 + $0x178] sm:$0xf0]  ;;  %v8185_v44 = vld [vmem:[#allocation8 + $0x1d4] sm:$0xf0] }
 0x43b   :  { %v819_v53 = vpack.c.bf16 %v799_v51, %v798_v50  ;;  %v8138_v50 = vld [vmem:[#allocation8 + $0x64] sm:$0xf]  ;;  %v6311_v51 = vld [vmem:[#allocation8 + $0x68] sm:$0xf0]  ;;  %1252 = vmatpush.bf16.msra.mxu2 %v6310_v48  ;;  %v6354_v13 = vor.u32 %v8148_v45, %v6351_v46  ;;  %v8147_v48 = vld [vmem:[#allocation8 + $0xa4] sm:$0xf0] }
 0x43c   :  { %v6314_v52 = vor.u32 %v8138_v50, %v6311_v51  ;;  %v6279_v50 = vld [vmem:[#allocation8 + $0x28] sm:$0xf0]  ;;  %v8184_v46 = vld [vmem:[#allocation8 + $0x1d4] sm:$0xf] }
 0x43d   :  { %878 = vmatmul.bf16.vlgmr.msrb.gmra.mxu3 %v819_v53  ;;  %v8154_v53 = vld [vmem:[#allocation8 + $0xe4] sm:$0xf] }
 0x43e   :  { %v793_v54 = vpop.f32.mrf.mxu2 }
 0x43f   :  { %v794_v55 = vadd.f32 %v793_v54, %v730_v37  ;;  %v6375_v54 = vld [vmem:[#allocation8 + $0xe8] sm:$0xf0] }
 0x441   :  { %v800_v58 = vmax.f32 %v794_v55, 0.0  ;;  %v6301_v55 = vld [vmem:[#allocation8 + $0x50] sm:$0xf] }
 0x446   :  { %v795_v56 = vpop.f32.mrf.mxu2 }
 0x447   :  { %v796_v57 = vadd.f32 %v795_v56, %v730_v37  ;;  %v6319_v37 = vld [vmem:[#allocation8 + $0x78] sm:$0xf0]  ;;  %v6378_v56 = vor.u32 %v8154_v53, %v6375_v54  ;;  %v8146_v53 = vld [vmem:[#allocation8 + $0xa4] sm:$0xf]  ;;  %v6343_v54 = vld [vmem:[#allocation8 + $0xa8] sm:$0xf0] }
 0x448   :  { %v6322_v39 = vor.u32 %v8140_v36, %v6319_v37 }
 0x449   :  { %v801_v59 = vmax.f32 %v796_v57, 0.0  ;;  %v8137_v57 = vld [vmem:[#allocation8 + $0x54] sm:$0xf0]  ;;  %1309 = vmatpush.bf16.msrb.mxu1 %v6378_v56  ;;  %v6346_v56 = vor.u32 %v8146_v53, %v6343_v54 }
 0x44a   :  { %1289 = vmatpush.bf16.msrb.mxu0 %v6322_v39  ;;  %v6302_v62 = vor.u32 %v8137_v57, %v6301_v55  ;;  %v6269_v55 = vld [vmem:[#allocation8 + $0x10] sm:$0xf]  ;;  %v8129_v57 = vld [vmem:[#allocation8 + $0x14] sm:$0xf0] }
 0x44b   :  { %v820_v60 = vpack.c.bf16 %v801_v59, %v800_v58  ;;  %v6365_v58 = vld [vmem:[#allocation8 + $0xd0] sm:$0xf]  ;;  %v8153_v59 = vld [vmem:[#allocation8 + $0xd4] sm:$0xf0] }
 0x44c   :  { %v6366_v5 = vor.u32 %v8153_v59, %v6365_v58  ;;  %1253 = vmatpush.bf16.msra.mxu2 %v6302_v62  ;;  %v6270_v58 = vor.u32 %v8129_v57, %v6269_v55  ;;  %v6333_v59 = vld [vmem:[#allocation8 + $0x90] sm:$0xf] }
 0x44d   :  { %883 = vmatmul.bf16.gmra.mxu3 %v820_v60  ;;  %1310 = vmatpush.bf16.msrb.mxu1 %v6370_v12  ;;  %v8143_v12 = vld [vmem:[#allocation8 + $0x84] sm:$0xf0]  ;;  %v6429_v55 = vld [vmem:[#allocation8 + $0x150] sm:$0xf] }
 0x44e   :  { %1290 = vmatpush.bf16.msrb.mxu0 %v6314_v52  ;;  %1272 = vmatpush.bf16.msra.mxu3 %v6366_v5  ;;  %v6282_v52 = vor.u32 %v8130_v49, %v6279_v50  ;;  %v6338_v5 = vor.u32 %v8144_v0, %v6335_v1 }
 0x450   :  { %1254 = vmatpush.bf16.msra.mxu2 %v6294_v20  ;;  %v6327_v20 = vld [vmem:[#allocation8 + $0x88] sm:$0xf0] }
 0x451   :  { %1311 = vmatpush.bf16.msrb.mxu1 %v6362_v31  ;;  %v6330_v21 = vor.u32 %v8142_v19, %v6327_v20 }
 0x452   :  { %1291 = vmatpush.bf16.msrb.mxu0 %v6306_v8  ;;  %v6261_v8 = vld [vmem:[#allocation8] sm:$0xf] }
 0x453   :  { %v6262_v11 = vor.u32 %v8127_v9, %v6261_v8 }
 0x455   :  { %1312 = vmatpush.bf16.msrb.mxu1 %v6354_v13  ;;  %v6437_v13 = vld [vmem:[#allocation8 + $0x160] sm:$0xf] }
 0x456   :  { %1292 = vmatpush.bf16.msrb.mxu0 %v6298_v28  ;;  %v8189_v28 = vld [vmem:[#allocation8 + $0x1f4] sm:$0xf0] }
 0x459   :  { %1313 = vmatpush.bf16.msrb.mxu1 %v6346_v56  ;;  %v8169_v56 = vld [vmem:[#allocation8 + $0x154] sm:$0xf0] }
 0x45a   :  { %1293 = vmatpush.bf16.msrb.mxu0 %v6290_v47  ;;  %v6495_v47 = vld [vmem:[#allocation8 + $0x1d8] sm:$0xf0] }
 0x45b   :  { %v6498_v54 = vor.u32 %v8184_v46, %v6495_v47  ;;  %v6471_v46 = vld [vmem:[#allocation8 + $0x1a8] sm:$0xf0] }
 0x45d   :  { %1314 = vmatpush.bf16.msrb.mxu1 %v6338_v5 }
 0x45e   :  { %1294 = vmatpush.bf16.msrb.mxu0 %v6282_v52 }
 0x461   :  { %1315 = vmatpush.bf16.msrb.mxu1 %v6330_v21 }
 0x4c0   :  { %v879_v30 = vpop.f32.mrf.mxu3 }
 0x4c1   :  { %v880_v43 = vadd.f32 %v879_v30, %v9146_v29 }
 0x4c3   :  { %v889_v60 = vadd.f32 %v880_v43, %v707_v6  ;;  %v8151_v6 = vld [vmem:[#allocation8 + $0xc4] sm:$0xf0]  ;;  %v6350_v43 = vor.u32 %v8149_v41, %v6349_v40 }
 0x4c4   :  { %v6358_v27 = vor.u32 %v8151_v6, %v6357_v14  ;;  %v8126_v14 = vld [vmem:[#allocation8 + $0x4] sm:$0xf]  ;;  %v6326_v6 = vor.u32 %v8143_v12, %v6325_v10 }
 0x4c5   :  { %v893_v23 = vmax.f32 %v889_v60, 0.0  ;;  %v8145_v60 = vld [vmem:[#allocation8 + $0x94] sm:$0xf0] }
 0x4c6   :  { %1273 = vmatpush.bf16.msra.mxu3 %v6358_v27  ;;  %v6334_v62 = vor.u32 %v8145_v60, %v6333_v59  ;;  %v6509_v27 = vld [vmem:[#allocation8 + $0x1f0] sm:$0xf]  ;;  %v6485_v59 = vld [vmem:[#allocation8 + $0x1c0] sm:$0xf]  ;;  %v8183_v60 = vld [vmem:[#allocation8 + $0x1c4] sm:$0xf0] }
 0x4c7   :  { %v6510_v31 = vor.u32 %v8189_v28, %v6509_v27  ;;  %v6486_v10 = vor.u32 %v8183_v60, %v6485_v59  ;;  %v6405_v59 = vld [vmem:[#allocation8 + $0x120] sm:$0xf]  ;;  %v8163_v60 = vld [vmem:[#allocation8 + $0x124] sm:$0xf0] }
 0x4c8   :  { %v881_v61 = vpop.f32.mrf.mxu3 }
 0x4c9   :  { %v882_v3 = vadd.f32 %v881_v61, %v9146_v29  ;;  %v8128_v61 = vld [vmem:[#allocation8 + $0x14] sm:$0xf] }
 0x4ca   :  { %1274 = vmatpush.bf16.msra.mxu3 %v6350_v43  ;;  %v6493_v43 = vld [vmem:[#allocation8 + $0x1d0] sm:$0xf] }
 0x4cb   :  { %v890_v2 = vadd.f32 %v882_v3, %v708_v7  ;;  %v6286_v7 = vor.u32 %v8133_v26, %v6285_v25  ;;  %v6274_v3 = vor.u32 %v8128_v61, %v6271_v63  ;;  %v6494_v49 = vor.u32 %v8185_v44, %v6493_v43  ;;  %v8182_v61 = vld [vmem:[#allocation8 + $0x1c4] sm:$0xf]  ;;  %v8179_v43 = vld [vmem:[#allocation8 + $0x1a4] sm:$0xf0] }
 0x4cc   :  { %v6430_v63 = vor.u32 %v8169_v56, %v6429_v55  ;;  %v8178_v44 = vld [vmem:[#allocation8 + $0x1a4] sm:$0xf]  ;;  %v6463_v55 = vld [vmem:[#allocation8 + $0x198] sm:$0xf0] }
 0x4cd   :  { %v894_v24 = vmax.f32 %v890_v2, 0.0  ;;  %1255 = vmatpush.bf16.msra.mxu2 %v6286_v7  ;;  %1295 = vmatpush.bf16.msrb.mxu0 %v6274_v3  ;;  %v6263_v2 = vld [vmem:[#allocation8 + $0x8] sm:$0xf0]  ;;  %v6501_v7 = vld [vmem:[#allocation8 + $0x1e0] sm:$0xf]  ;;  %v6474_v47 = vor.u32 %v8178_v44, %v6471_v46 }
 0x4ce   :  { %v6266_v18 = vor.u32 %v8126_v14, %v6263_v2  ;;  %v6637_v44 = vld [vmem:[#allocation8 + $0x2f0] sm:$0xf]  ;;  %v8220_v46 = vld [vmem:[#allocation8 + $0x2f4] sm:$0xf] }
 0x4cf   :  { %v913_v30 = vpack.c.bf16 %v894_v24, %v893_v23  ;;  %v9160_v23 = vperm.slane %v916_v22, 0  ;;  %v9162_v24 = vperm.slane %v916_v22, 1 }
 0x4d0   :  { %v884_v4 = vpop.f32.mrf.mxu3 }
 0x4d1   :  { %1010 = vmatmul.bf16.vlgmr.msra.gmra.mxu0 %v913_v30  ;;  %1029 = vmatmul.bf16.vlgmr.msra.gmra.mxu1 %v913_v30  ;;  %v885_v32 = vadd.f32 %v884_v4, %v9146_v29  ;;  %v8188_v30 = vld [vmem:[#allocation8 + $0x1f4] sm:$0xf]  ;;  %v6511_v4 = vld [vmem:[#allocation8 + $0x1f8] sm:$0xf0] }
 0x4d2   :  { %1296 = vmatpush.bf16.msrb.mxu0 %v6266_v18 }
 0x4d3   :  { %v891_v34 = vadd.f32 %v885_v32, %v709_v16  ;;  %v6277_v16 = vld [vmem:[#allocation8 + $0x20] sm:$0xf]  ;;  %v8187_v32 = vld [vmem:[#allocation8 + $0x1e4] sm:$0xf0] }
 0x4d5   :  { %v895_v37 = vmax.f32 %v891_v34, 0.0  ;;  %v8186_v34 = vld [vmem:[#allocation8 + $0x1e4] sm:$0xf] }
 0x4d8   :  { %v886_v33 = vpop.f32.mrf.mxu3 }
 0x4d9   :  { %v887_v35 = vadd.f32 %v886_v33, %v9146_v29  ;;  %v6278_v29 = vor.u32 %v8131_v15, %v6277_v16  ;;  %v6514_v33 = vor.u32 %v8188_v30, %v6511_v4  ;;  %v6431_v30 = vld [vmem:[#allocation8 + $0x158] sm:$0xf0]  ;;  %v6477_v4 = vld [vmem:[#allocation8 + $0x1b0] sm:$0xf] }
 0x4db   :  { %v892_v36 = vadd.f32 %v887_v35, %v710_v17  ;;  %v6341_v17 = vld [vmem:[#allocation8 + $0xa0] sm:$0xf]  ;;  %1256 = vmatpush.bf16.msra.mxu2 %v6278_v29  ;;  %v6503_v35 = vld [vmem:[#allocation8 + $0x1e8] sm:$0xf0]  ;;  %1596 = vmatpush.bf16.msra.mxu1 %v6514_v33  ;;  %v8170_v29 = vld [vmem:[#allocation8 + $0x164] sm:$0xf] }
 0x4dc   :  { %v6342_v51 = vor.u32 %v8147_v48, %v6341_v17  ;;  %v6506_v40 = vor.u32 %v8186_v34, %v6503_v35  ;;  %v8171_v17 = vld [vmem:[#allocation8 + $0x164] sm:$0xf0]  ;;  %v6439_v48 = vld [vmem:[#allocation8 + $0x168] sm:$0xf0]  ;;  %v6479_v34 = vld [vmem:[#allocation8 + $0x1b8] sm:$0xf0] }
 0x4dd   :  { %v896_v38 = vmax.f32 %v892_v36, 0.0  ;;  %v6445_v36 = vld [vmem:[#allocation8 + $0x170] sm:$0xf]  ;;  %v6438_v50 = vor.u32 %v8171_v17, %v6437_v13  ;;  %v8165_v17 = vld [vmem:[#allocation8 + $0x134] sm:$0xf0] }
 0x4de   :  { %1275 = vmatpush.bf16.msra.mxu3 %v6342_v51  ;;  %v6442_v51 = vor.u32 %v8170_v29, %v6439_v48  ;;  %v6413_v13 = vld [vmem:[#allocation8 + $0x130] sm:$0xf]  ;;  %v8164_v48 = vld [vmem:[#allocation8 + $0x134] sm:$0xf] }
 0x4df   :  { %v914_v39 = vpack.c.bf16 %v896_v38, %v895_v37  ;;  %1257 = vmatpush.bf16.msra.mxu2 %v6270_v58  ;;  %v6502_v37 = vor.u32 %v8187_v32, %v6501_v7  ;;  %v8173_v38 = vld [vmem:[#allocation8 + $0x174] sm:$0xf0]  ;;  %1597 = vmatpush.bf16.msra.mxu1 %v6506_v40  ;;  %v8180_v32 = vld [vmem:[#allocation8 + $0x1b4] sm:$0xf]  ;;  %v6423_v40 = vld [vmem:[#allocation8 + $0x148] sm:$0xf0]  ;;  %v6414_v29 = vor.u32 %v8165_v17, %v6413_v13 }
 0x4e0   :  { %v6446_v41 = vor.u32 %v8173_v38, %v6445_v36  ;;  %v8181_v7 = vld [vmem:[#allocation8 + $0x1b4] sm:$0xf0]  ;;  %v6482_v35 = vor.u32 %v8180_v32, %v6479_v34  ;;  %v6421_v36 = vld [vmem:[#allocation8 + $0x140] sm:$0xf]  ;;  %v8166_v38 = vld [vmem:[#allocation8 + $0x144] sm:$0xf] }
 0x4e1   :  { %1015 = vmatmul.bf16.gmra.mxu0 %v914_v39  ;;  %1034 = vmatmul.bf16.gmra.mxu1 %v914_v39  ;;  %v8172_v39 = vld [vmem:[#allocation8 + $0x174] sm:$0xf]  ;;  %v6478_v33 = vor.u32 %v8181_v7, %v6477_v4  ;;  %v6389_v4 = vld [vmem:[#allocation8 + $0x100] sm:$0xf]  ;;  %v8159_v7 = vld [vmem:[#allocation8 + $0x104] sm:$0xf0] }
 0x4e2   :  { %1276 = vmatpush.bf16.msra.mxu3 %v6334_v62  ;;  %v6450_v45 = vor.u32 %v8172_v39, %v6447_v42  ;;  %v6487_v62 = vld [vmem:[#allocation8 + $0x1c8] sm:$0xf0]  ;;  %v6469_v42 = vld [vmem:[#allocation8 + $0x1a0] sm:$0xf]  ;;  %v8158_v32 = vld [vmem:[#allocation8 + $0x104] sm:$0xf] }
 0x4e3   :  { %1258 = vmatpush.bf16.msra.mxu2 %v6262_v11  ;;  %1598 = vmatpush.bf16.msra.mxu1 %v6498_v54  ;;  %v6490_v11 = vor.u32 %v8182_v61, %v6487_v62  ;;  %v8162_v61 = vld [vmem:[#allocation8 + $0x124] sm:$0xf]  ;;  %v6406_v62 = vor.u32 %v8163_v60, %v6405_v59  ;;  %v6391_v34 = vld [vmem:[#allocation8 + $0x108] sm:$0xf0]  ;;  %v6639_v13 = vld [vmem:[#allocation8 + $0x2f8] sm:$0xf0] }
 0x4e4   :  { %1577 = vmatpush.bf16.msra.mxu0 %v6450_v45  ;;  %v6470_v45 = vor.u32 %v8179_v43, %v6469_v42  ;;  %v6629_v17 = vld [vmem:[#allocation8 + $0x2e0] sm:$0xf]  ;;  %v8205_v59 = vld [vmem:[#allocation8 + $0x274] sm:$0xf0] }
 0x4e6   :  { %1277 = vmatpush.bf16.msra.mxu3 %v6326_v6 }
 0x4e7   :  { %1539 = vmatpush.bf16.msrb.mxu2 %v6446_v41  ;;  %1599 = vmatpush.bf16.msra.mxu1 %v6490_v11  ;;  %v6426_v41 = vor.u32 %v8166_v38, %v6423_v40  ;;  %v8174_v11 = vld [vmem:[#allocation8 + $0x184] sm:$0xf] }
 0x4e8   :  { %1578 = vmatpush.bf16.msra.mxu0 %v6442_v51  ;;  %v6461_v51 = vld [vmem:[#allocation8 + $0x190] sm:$0xf] }
 0x4ea   :  { %1558 = vmatpush.bf16.msrb.mxu3 %v6510_v31 }
 0x4eb   :  { %1540 = vmatpush.bf16.msrb.mxu2 %v6438_v50  ;;  %1600 = vmatpush.bf16.msra.mxu1 %v6482_v35  ;;  %v6394_v35 = vor.u32 %v8158_v32, %v6391_v34 }
 0x4ee   :  { %1559 = vmatpush.bf16.msrb.mxu3 %v6502_v37  ;;  %v8167_v37 = vld [vmem:[#allocation8 + $0x144] sm:$0xf0] }
 0x4ef   :  { %1541 = vmatpush.bf16.msrb.mxu2 %v6430_v63  ;;  %v6422_v39 = vor.u32 %v8167_v37, %v6421_v36  ;;  %1601 = vmatpush.bf16.msra.mxu1 %v6474_v47  ;;  %v6407_v63 = vld [vmem:[#allocation8 + $0x128] sm:$0xf0]  ;;  %v1085_v36 = vld [vmem:[#allocation17 + $0x10] ss:$8 sm:$0x3] }
 0x4f2   :  { %1560 = vmatpush.bf16.msrb.mxu3 %v6494_v49  ;;  %v6415_v49 = vld [vmem:[#allocation8 + $0x138] sm:$0xf0] }
 0x4f3   :  { %1542 = vmatpush.bf16.msrb.mxu2 %v6422_v39  ;;  %v6418_v50 = vor.u32 %v8164_v48, %v6415_v49  ;;  %v1088_v39 = vperm.slane %v1085_v36, 1 }
 0x4f6   :  { %1561 = vmatpush.bf16.msrb.mxu3 %v6486_v10  ;;  %v8175_v10 = vld [vmem:[#allocation8 + $0x184] sm:$0xf0] }
 0x4f7   :  { %1543 = vmatpush.bf16.msrb.mxu2 %v6414_v29  ;;  %v8219_v29 = vld [vmem:[#allocation8 + $0x2e4] sm:$0xf0] }
 0x4fa   :  { %1562 = vmatpush.bf16.msrb.mxu3 %v6478_v33  ;;  %v6390_v33 = vor.u32 %v8159_v7, %v6389_v4 }
 0x4fb   :  { %1544 = vmatpush.bf16.msrb.mxu2 %v6406_v62 }
 0x4fe   :  { %1563 = vmatpush.bf16.msrb.mxu3 %v6470_v45  ;;  %v8221_v45 = vld [vmem:[#allocation8 + $0x2f4] sm:$0xf0] }
 0x4ff   :  { %v6638_v47 = vor.u32 %v8221_v45, %v6637_v44 }
 0x54e   :  { %v1011_v25 = vpop.f32.mrf.mxu0  ;;  %v1030_v26 = vpop.f32.mrf.mxu1 }
 0x54f   :  { %v9165_v16 = vadd.f32 %v1011_v25, %v9160_v23  ;;  %v9168_v15 = vadd.f32 %v1030_v26, %v9162_v24 }
 0x551   :  { %v1040_v0 = vmax.f32 %v9165_v16, 0.0  ;;  %v1041_v1 = vmax.f32 %v9168_v15, 0.0 }
 0x556   :  { %v1013_v52 = vpop.f32.mrf.mxu0  ;;  %v1032_v53 = vpop.f32.mrf.mxu1 }
 0x557   :  { %v9171_v57 = vadd.f32 %v1013_v52, %v9160_v23  ;;  %v9174_v58 = vadd.f32 %v1032_v53, %v9162_v24  ;;  %v8177_v52 = vld [vmem:[#allocation8 + $0x194] sm:$0xf0]  ;;  %v8176_v53 = vld [vmem:[#allocation8 + $0x194] sm:$0xf] }
 0x558   :  { %v6462_v54 = vor.u32 %v8177_v52, %v6461_v51  ;;  %v6466_v56 = vor.u32 %v8176_v53, %v6463_v55  ;;  %v8218_v51 = vld [vmem:[#allocation8 + $0x2e4] sm:$0xf]  ;;  %v6631_v52 = vld [vmem:[#allocation8 + $0x2e8] sm:$0xf0]  ;;  %v6573_v53 = vld [vmem:[#allocation8 + $0x270] sm:$0xf] }
 0x559   :  { %v1042_v3 = vmax.f32 %v9171_v57, 0.0  ;;  %v1043_v5 = vmax.f32 %v9174_v58, 0.0  ;;  %v6574_v62 = vor.u32 %v8205_v59, %v6573_v53  ;;  %v8216_v53 = vld [vmem:[#allocation8 + $0x2d4] sm:$0xf] }
 0x55a   :  { %1564 = vmatpush.bf16.msrb.mxu3 %v6462_v54  ;;  %1602 = vmatpush.bf16.msra.mxu1 %v6466_v56  ;;  %v6630_v56 = vor.u32 %v8219_v29, %v6629_v17 }
 0x55b   :  { %v1080_v8 = vpack.c.bf16 %v1042_v3, %v1040_v0  ;;  %v1081_v9 = vpack.c.bf16 %v1043_v5, %v1041_v1 }
 0x55d   :  { %1259 = vmatmul.bf16.vlgmr.msra.gmra.mxu2 %v1080_v8  ;;  %1278 = vmatmul.bf16.vlgmr.msra.gmra.mxu3 %v1081_v9 }
 0x55e   :  { %1297 = vmatmul.bf16.vlgmr.msrb.gmra.mxu0 %v1080_v8  ;;  %1316 = vmatmul.bf16.vlgmr.msrb.gmra.mxu1 %v1081_v9  ;;  %v1016_v12 = vpop.f32.mrf.mxu0  ;;  %v1035_v14 = vpop.f32.mrf.mxu1  ;;  %v6410_v8 = vor.u32 %v8162_v61, %v6407_v63  ;;  %v6453_v9 = vld [vmem:[#allocation8 + $0x180] sm:$0xf]  ;;  %v6634_v61 = vor.u32 %v8218_v51, %v6631_v52  ;;  %v6621_v51 = vld [vmem:[#allocation8 + $0x2d0] sm:$0xf]  ;;  %v8217_v52 = vld [vmem:[#allocation8 + $0x2d4] sm:$0xf0] }
 0x55f   :  { %v9189_v2 = vadd.f32 %v1016_v12, %v9160_v23  ;;  %v9192_v6 = vadd.f32 %v1035_v14, %v9162_v24  ;;  %v6454_v12 = vor.u32 %v8175_v10, %v6453_v9  ;;  %v6455_v14 = vld [vmem:[#allocation8 + $0x188] sm:$0xf0] }
 0x561   :  { %v1044_v22 = vmax.f32 %v9189_v2, 0.0  ;;  %v1045_v25 = vmax.f32 %v9192_v6, 0.0  ;;  %1565 = vmatpush.bf16.msrb.mxu3 %v6454_v12  ;;  %v6749_v2 = vld [vmem:[#allocation8 + $0x3d0] sm:$0xf] }
 0x565   :  { %1854 = vmatpush.bf16.msra.mxu3 %v6638_v47 }
 0x566   :  { %v1018_v18 = vpop.f32.mrf.mxu0  ;;  %v1037_v19 = vpop.f32.mrf.mxu1 }
 0x567   :  { %v9195_v20 = vadd.f32 %v1018_v18, %v9160_v23  ;;  %v9198_v21 = vadd.f32 %v1037_v19, %v9162_v24  ;;  %v8168_v24 = vld [vmem:[#allocation8 + $0x154] sm:$0xf]  ;;  %v6458_v18 = vor.u32 %v8174_v11, %v6455_v14  ;;  %v6397_v19 = vld [vmem:[#allocation8 + $0x110] sm:$0xf] }
 0x568   :  { %v6434_v31 = vor.u32 %v8168_v24, %v6431_v30  ;;  %v6399_v30 = vld [vmem:[#allocation8 + $0x118] sm:$0xf0] }
 0x569   :  { %v1046_v26 = vmax.f32 %v9195_v20, 0.0  ;;  %v1047_v27 = vmax.f32 %v9198_v21, 0.0  ;;  %1603 = vmatpush.bf16.msra.mxu1 %v6458_v18  ;;  %1855 = vmatpush.bf16.msra.mxu3 %v6630_v56  ;;  %v8203_v56 = vld [vmem:[#allocation8 + $0x264] sm:$0xf0]  ;;  %v6693_v20 = vld [vmem:[#allocation8 + $0x360] sm:$0xf] }
 0x56a   :  { %1579 = vmatpush.bf16.msra.mxu0 %v6434_v31 }
 0x56b   :  { %v1082_v28 = vpack.c.bf16 %v1046_v26, %v1044_v22  ;;  %v1083_v23 = vpack.c.bf16 %v1047_v27, %v1045_v25 }
 0x56d   :  { %1264 = vmatmul.bf16.gmra.mxu2 %v1082_v28  ;;  %1283 = vmatmul.bf16.gmra.mxu3 %v1083_v23 }
 0x56e   :  { %1302 = vmatmul.bf16.gmra.mxu0 %v1082_v28  ;;  %1321 = vmatmul.bf16.gmra.mxu1 %v1083_v23  ;;  %v8161_v28 = vld [vmem:[#allocation8 + $0x114] sm:$0xf0]  ;;  %v8160_v23 = vld [vmem:[#allocation8 + $0x114] sm:$0xf] }
 0x56f   :  { %1580 = vmatpush.bf16.msra.mxu0 %v6426_v41  ;;  %v6398_v24 = vor.u32 %v8161_v28, %v6397_v19  ;;  %v6402_v31 = vor.u32 %v8160_v23, %v6399_v30  ;;  %v1087_v41 = vperm.slane %v1085_v36, 0 }
 0x571   :  { %1545 = vmatpush.bf16.msrb.mxu2 %v6398_v24 }
 0x573   :  { %1581 = vmatpush.bf16.msra.mxu0 %v6418_v50  ;;  %v6642_v50 = vor.u32 %v8220_v46, %v6639_v13 }
 0x575   :  { %1546 = vmatpush.bf16.msrb.mxu2 %v6390_v33  ;;  %1892 = vmatpush.bf16.msrb.mxu1 %v6642_v50 }
 0x577   :  { %1582 = vmatpush.bf16.msra.mxu0 %v6410_v8 }
 0x579   :  { %1835 = vmatpush.bf16.msra.mxu2 %v6574_v62  ;;  %1893 = vmatpush.bf16.msrb.mxu1 %v6634_v61  ;;  %v8202_v61 = vld [vmem:[#allocation8 + $0x264] sm:$0xf]  ;;  %v6567_v62 = vld [vmem:[#allocation8 + $0x268] sm:$0xf0] }
 0x57b   :  { %1583 = vmatpush.bf16.msra.mxu0 %v6402_v31 }
 0x57f   :  { %1584 = vmatpush.bf16.msra.mxu0 %v6394_v35 }
 0x5db   :  { %v1298_v37 = vpop.f32.mrf.mxu0  ;;  %v1317_v38 = vpop.f32.mrf.mxu1 }
 0x5dc   :  { %v1299_v40 = vadd.f32 %v1298_v37, %v1088_v39 }
 0x5de   :  { %v1318_v54 = vadd.f32 %v1317_v38, %v1299_v40 }
 0x5e0   :  { %v1260_v42 = vpop.f32.mrf.mxu2  ;;  %v1279_v43 = vpop.f32.mrf.mxu3  ;;  %v1328_v8 = vmax.f32 %v1318_v54, 0.0  ;;  %v6622_v54 = vor.u32 %v8217_v52, %v6621_v51  ;;  %v6589_v51 = vld [vmem:[#allocation8 + $0x290] sm:$0xf]  ;;  %v8209_v52 = vld [vmem:[#allocation8 + $0x294] sm:$0xf0] }
 0x5e1   :  { %v1261_v60 = vadd.f32 %v1260_v42, %v1087_v41 }
 0x5e2   :  { %1856 = vmatpush.bf16.msra.mxu3 %v6622_v54  ;;  %v6590_v54 = vor.u32 %v8209_v52, %v6589_v51  ;;  %v6757_v51 = vld [vmem:[#allocation8 + $0x3e0] sm:$0xf]  ;;  %v8251_v52 = vld [vmem:[#allocation8 + $0x3e4] sm:$0xf0] }
 0x5e3   :  { %v1300_v48 = vpop.f32.mrf.mxu0  ;;  %v1319_v49 = vpop.f32.mrf.mxu1  ;;  %v1280_v12 = vadd.f32 %v1279_v43, %v1261_v60 }
 0x5e4   :  { %v1301_v55 = vadd.f32 %v1300_v48, %v1088_v39 }
 0x5e5   :  { %v1327_v24 = vmax.f32 %v1280_v12, 0.0  ;;  %v6615_v12 = vld [vmem:[#allocation8 + $0x2c8] sm:$0xf0] }
 0x5e6   :  { %v1320_v63 = vadd.f32 %v1319_v49, %v1301_v55  ;;  %v8204_v49 = vld [vmem:[#allocation8 + $0x274] sm:$0xf]  ;;  %v6623_v55 = vld [vmem:[#allocation8 + $0x2d8] sm:$0xf0] }
 0x5e7   :  { %v6626_v59 = vor.u32 %v8216_v53, %v6623_v55  ;;  %v8208_v53 = vld [vmem:[#allocation8 + $0x294] sm:$0xf]  ;;  %v6591_v55 = vld [vmem:[#allocation8 + $0x298] sm:$0xf0] }
 0x5e8   :  { %v1330_v9 = vmax.f32 %v1320_v63, 0.0  ;;  %v1262_v10 = vpop.f32.mrf.mxu2  ;;  %v1281_v11 = vpop.f32.mrf.mxu3  ;;  %v6570_v63 = vor.u32 %v8202_v61, %v6567_v62  ;;  %v6535_v62 = vld [vmem:[#allocation8 + $0x228] sm:$0xf0] }
 0x5e9   :  { %v1263_v14 = vadd.f32 %v1262_v10, %v1087_v41  ;;  %1894 = vmatpush.bf16.msrb.mxu1 %v6626_v59  ;;  %v8214_v10 = vld [vmem:[#allocation8 + $0x2c4] sm:$0xf]  ;;  %v8195_v59 = vld [vmem:[#allocation8 + $0x224] sm:$0xf0] }
 0x5ea   :  { %v1369_v18 = vpack.c.bf16 %v1330_v9, %v1328_v8  ;;  %v6613_v8 = vld [vmem:[#allocation8 + $0x2c0] sm:$0xf]  ;;  %v8215_v9 = vld [vmem:[#allocation8 + $0x2c4] sm:$0xf0] }
 0x5eb   :  { %v1282_v19 = vadd.f32 %v1281_v11, %v1263_v14  ;;  %v1303_v28 = vpop.f32.mrf.mxu0  ;;  %v1322_v23 = vpop.f32.mrf.mxu1  ;;  %v6614_v11 = vor.u32 %v8215_v9, %v6613_v8  ;;  %v6618_v14 = vor.u32 %v8214_v10, %v6615_v12  ;;  %v6581_v8 = vld [vmem:[#allocation8 + $0x280] sm:$0xf]  ;;  %v8207_v9 = vld [vmem:[#allocation8 + $0x284] sm:$0xf0]  ;;  %v8206_v10 = vld [vmem:[#allocation8 + $0x284] sm:$0xf] }
 0x5ec   :  { %1566 = vmatmul.bf16.vlgmr.msrb.gmra.mxu3 %v1369_v18  ;;  %1604 = vmatmul.bf16.vlgmr.msra.gmra.mxu1 %v1369_v18  ;;  %v1304_v4 = vadd.f32 %v1303_v28, %v1088_v39  ;;  %v6557_v18 = vld [vmem:[#allocation8 + $0x250] sm:$0xf]  ;;  %v6583_v12 = vld [vmem:[#allocation8 + $0x288] sm:$0xf0] }
 0x5ed   :  { %v1329_v30 = vmax.f32 %v1282_v19, 0.0  ;;  %v8201_v19 = vld [vmem:[#allocation8 + $0x254] sm:$0xf0]  ;;  %1857 = vmatpush.bf16.msra.mxu3 %v6614_v11  ;;  %1895 = vmatpush.bf16.msrb.mxu1 %v6618_v14  ;;  %v6582_v11 = vor.u32 %v8207_v9, %v6581_v8  ;;  %v6586_v14 = vor.u32 %v8206_v10, %v6583_v12  ;;  %v8236_v8 = vld [vmem:[#allocation8 + $0x374] sm:$0xf] }
 0x5ee   :  { %v1323_v34 = vadd.f32 %v1322_v23, %v1304_v4  ;;  %v6558_v28 = vor.u32 %v8201_v19, %v6557_v18  ;;  %v8200_v23 = vld [vmem:[#allocation8 + $0x254] sm:$0xf]  ;;  %v8213_v4 = vld [vmem:[#allocation8 + $0x2b4] sm:$0xf0]  ;;  %v6525_v18 = vld [vmem:[#allocation8 + $0x210] sm:$0xf] }
 0x5ef   :  { %v1368_v31 = vpack.c.bf16 %v1329_v30, %v1327_v24  ;;  %v6559_v24 = vld [vmem:[#allocation8 + $0x258] sm:$0xf0]  ;;  %v8193_v19 = vld [vmem:[#allocation8 + $0x214] sm:$0xf0] }
 0x5f0   :  { %v1265_v7 = vpop.f32.mrf.mxu2  ;;  %v1284_v32 = vpop.f32.mrf.mxu3  ;;  %v1332_v40 = vmax.f32 %v1323_v34, 0.0  ;;  %v6562_v30 = vor.u32 %v8200_v23, %v6559_v24  ;;  %v6526_v23 = vor.u32 %v8193_v19, %v6525_v18  ;;  %v6527_v24 = vld [vmem:[#allocation8 + $0x218] sm:$0xf0] }
 0x5f1   :  { %1547 = vmatmul.bf16.vlgmr.msrb.gmra.mxu2 %v1368_v31  ;;  %1585 = vmatmul.bf16.vlgmr.msra.gmra.mxu0 %v1368_v31  ;;  %v1266_v36 = vadd.f32 %v1265_v7, %v1087_v41  ;;  %v6605_v31 = vld [vmem:[#allocation8 + $0x2b0] sm:$0xf]  ;;  %v8212_v7 = vld [vmem:[#allocation8 + $0x2b4] sm:$0xf]  ;;  %v6703_v9 = vld [vmem:[#allocation8 + $0x378] sm:$0xf0] }
 0x5f3   :  { %v1305_v33 = vpop.f32.mrf.mxu0  ;;  %v1324_v37 = vpop.f32.mrf.mxu1  ;;  %v1285_v44 = vadd.f32 %v1284_v32, %v1266_v36  ;;  %v6606_v32 = vor.u32 %v8213_v4, %v6605_v31  ;;  %v8199_v36 = vld [vmem:[#allocation8 + $0x244] sm:$0xf0]  ;;  %v6517_v31 = vld [vmem:[#allocation8 + $0x200] sm:$0xf] }
 0x5f4   :  { %v1306_v35 = vadd.f32 %v1305_v33, %v1088_v39  ;;  %v6575_v39 = vld [vmem:[#allocation8 + $0x278] sm:$0xf0]  ;;  %v8191_v4 = vld [vmem:[#allocation8 + $0x204] sm:$0xf0] }
 0x5f5   :  { %v1331_v17 = vmax.f32 %v1285_v44, 0.0  ;;  %v6578_v50 = vor.u32 %v8204_v49, %v6575_v39  ;;  %v6607_v33 = vld [vmem:[#allocation8 + $0x2b8] sm:$0xf0]  ;;  %1858 = vmatpush.bf16.msra.mxu3 %v6606_v32  ;;  %v8211_v44 = vld [vmem:[#allocation8 + $0x2a4] sm:$0xf0]  ;;  %v6518_v32 = vor.u32 %v8191_v4, %v6517_v31 }
 0x5f6   :  { %v1325_v38 = vadd.f32 %v1324_v37, %v1306_v35  ;;  %v6610_v34 = vor.u32 %v8212_v7, %v6607_v33  ;;  %v6549_v35 = vld [vmem:[#allocation8 + $0x240] sm:$0xf]  ;;  %v8198_v37 = vld [vmem:[#allocation8 + $0x244] sm:$0xf]  ;;  %v6543_v39 = vld [vmem:[#allocation8 + $0x238] sm:$0xf0] }
 0x5f7   :  { %1873 = vmatpush.bf16.msrb.mxu0 %v6578_v50  ;;  %v8190_v7 = vld [vmem:[#allocation8 + $0x204] sm:$0xf]  ;;  %v6519_v33 = vld [vmem:[#allocation8 + $0x208] sm:$0xf0] }
 0x5f8   :  { %v1334_v42 = vmax.f32 %v1325_v38, 0.0  ;;  %v1267_v43 = vpop.f32.mrf.mxu2  ;;  %v1286_v46 = vpop.f32.mrf.mxu3  ;;  %v6550_v38 = vor.u32 %v8199_v36, %v6549_v35  ;;  %1896 = vmatpush.bf16.msrb.mxu1 %v6610_v34  ;;  %v6522_v34 = vor.u32 %v8190_v7, %v6519_v33  ;;  %v1373_v36 = vld [vmem:[#allocation17 + $0x11] ss:$8 sm:$0x3] }
 0x5f9   :  { %v1268_v45 = vadd.f32 %v1267_v43, %v1087_v41  ;;  %v6565_v41 = vld [vmem:[#allocation8 + $0x260] sm:$0xf] }
 0x5fa   :  { %v1371_v47 = vpack.c.bf16 %v1334_v42, %v1332_v40  ;;  %v6566_v60 = vor.u32 %v8203_v56, %v6565_v41  ;;  %v6551_v40 = vld [vmem:[#allocation8 + $0x248] sm:$0xf0]  ;;  %v6597_v43 = vld [vmem:[#allocation8 + $0x2a0] sm:$0xf]  ;;  %v6594_v41 = vor.u32 %v8208_v53, %v6591_v55 }
 0x5fb   :  { %v1287_v13 = vadd.f32 %v1286_v46, %v1268_v45  ;;  %1874 = vmatpush.bf16.msrb.mxu0 %v6570_v63  ;;  %v6554_v42 = vor.u32 %v8198_v37, %v6551_v40  ;;  %v6598_v45 = vor.u32 %v8211_v44, %v6597_v43  ;;  %v8210_v46 = vld [vmem:[#allocation8 + $0x2a4] sm:$0xf]  ;;  %v6533_v56 = vld [vmem:[#allocation8 + $0x220] sm:$0xf]  ;;  %v1376_v37 = vperm.slane %v1373_v36, 1 }
 0x5fc   :  { %1571 = vmatmul.bf16.gmra.mxu3 %v1371_v47  ;;  %1609 = vmatmul.bf16.gmra.mxu1 %v1371_v47  ;;  %v6599_v47 = vld [vmem:[#allocation8 + $0x2a8] sm:$0xf0]  ;;  %v6534_v61 = vor.u32 %v8195_v59, %v6533_v56  ;;  %v9212_v43 = vperm.slane %v1373_v36, 0  ;;  %v6701_v59 = vld [vmem:[#allocation8 + $0x370] sm:$0xf] }
 0x5fd   :  { %v1333_v29 = vmax.f32 %v1287_v13, 0.0  ;;  %1836 = vmatpush.bf16.msra.mxu2 %v6566_v60  ;;  %v6602_v13 = vor.u32 %v8210_v46, %v6599_v47  ;;  %1859 = vmatpush.bf16.msra.mxu3 %v6598_v45  ;;  %v8194_v60 = vld [vmem:[#allocation8 + $0x224] sm:$0xf]  ;;  %v6759_v56 = vld [vmem:[#allocation8 + $0x3e8] sm:$0xf0] }
 0x5fe   :  { %v6538_v63 = vor.u32 %v8194_v60, %v6535_v62  ;;  %v6758_v62 = vor.u32 %v8251_v52, %v6757_v51  ;;  %v6695_v52 = vld [vmem:[#allocation8 + $0x368] sm:$0xf0] }
 0x5ff   :  { %v1370_v48 = vpack.c.bf16 %v1333_v29, %v1331_v17  ;;  %1875 = vmatpush.bf16.msrb.mxu0 %v6562_v30  ;;  %v6541_v17 = vld [vmem:[#allocation8 + $0x230] sm:$0xf]  ;;  %v8197_v29 = vld [vmem:[#allocation8 + $0x234] sm:$0xf0]  ;;  %1897 = vmatpush.bf16.msrb.mxu1 %v6602_v13 }
 0x600   :  { %v6542_v49 = vor.u32 %v8197_v29, %v6541_v17  ;;  %v6765_v29 = vld [vmem:[#allocation8 + $0x3f0] sm:$0xf] }
 0x601   :  { %1552 = vmatmul.bf16.gmra.mxu2 %v1370_v48  ;;  %1590 = vmatmul.bf16.gmra.mxu0 %v1370_v48  ;;  %v8196_v48 = vld [vmem:[#allocation8 + $0x234] sm:$0xf] }
 0x602   :  { %1837 = vmatpush.bf16.msra.mxu2 %v6558_v28  ;;  %v6546_v50 = vor.u32 %v8196_v48, %v6543_v39  ;;  %1860 = vmatpush.bf16.msra.mxu3 %v6590_v54  ;;  %v8192_v28 = vld [vmem:[#allocation8 + $0x214] sm:$0xf]  ;;  %v8253_v48 = vld [vmem:[#allocation8 + $0x3f4] sm:$0xf0] }
 0x603   :  { %1876 = vmatpush.bf16.msrb.mxu0 %v6554_v42  ;;  %1898 = vmatpush.bf16.msrb.mxu1 %v6594_v41  ;;  %v6530_v30 = vor.u32 %v8192_v28, %v6527_v24  ;;  %v6766_v39 = vor.u32 %v8253_v48, %v6765_v29  ;;  %v8250_v41 = vld [vmem:[#allocation8 + $0x3e4] sm:$0xf]  ;;  %v8248_v29 = vld [vmem:[#allocation8 + $0x3d4] sm:$0xf] }
 0x604   :  { %v6762_v15 = vor.u32 %v8250_v41, %v6759_v56 }
 0x606   :  { %1838 = vmatpush.bf16.msra.mxu2 %v6550_v38  ;;  %1861 = vmatpush.bf16.msra.mxu3 %v6582_v11  ;;  %v6706_v11 = vor.u32 %v8236_v8, %v6703_v9  ;;  %v8232_v9 = vld [vmem:[#allocation8 + $0x354] sm:$0xf] }
 0x607   :  { %1877 = vmatpush.bf16.msrb.mxu0 %v6546_v50  ;;  %1899 = vmatpush.bf16.msrb.mxu1 %v6586_v14  ;;  %v6767_v50 = vld [vmem:[#allocation8 + $0x3f8] sm:$0xf0] }
 0x60a   :  { %1839 = vmatpush.bf16.msra.mxu2 %v6542_v49  ;;  %v8252_v49 = vld [vmem:[#allocation8 + $0x3f4] sm:$0xf]  ;;  %2142 = vmatpush.bf16.msrb.mxu3 %v6766_v39 }
 0x60b   :  { %1878 = vmatpush.bf16.msrb.mxu0 %v6538_v63  ;;  %v6770_v55 = vor.u32 %v8252_v49, %v6767_v50  ;;  %v8237_v63 = vld [vmem:[#allocation8 + $0x374] sm:$0xf0]  ;;  %v6751_v49 = vld [vmem:[#allocation8 + $0x3d8] sm:$0xf0]  ;;  %v8234_v50 = vld [vmem:[#allocation8 + $0x364] sm:$0xf] }
 0x60c   :  { %v6754_v39 = vor.u32 %v8248_v29, %v6751_v49  ;;  %v6698_v41 = vor.u32 %v8234_v50, %v6695_v52  ;;  %v8240_v29 = vld [vmem:[#allocation8 + $0x394] sm:$0xf]  ;;  %v6719_v49 = vld [vmem:[#allocation8 + $0x398] sm:$0xf0]  ;;  %v8226_v50 = vld [vmem:[#allocation8 + $0x324] sm:$0xf] }
 0x60d   :  { %2180 = vmatpush.bf16.msra.mxu1 %v6770_v55  ;;  %v8247_v55 = vld [vmem:[#allocation8 + $0x3c4] sm:$0xf0]  ;;  %v6663_v52 = vld [vmem:[#allocation8 + $0x328] sm:$0xf0] }
 0x60e   :  { %1840 = vmatpush.bf16.msra.mxu2 %v6534_v61  ;;  %2143 = vmatpush.bf16.msrb.mxu3 %v6758_v62 }
 0x60f   :  { %1879 = vmatpush.bf16.msrb.mxu0 %v6530_v30 }
 0x611   :  { %2181 = vmatpush.bf16.msra.mxu1 %v6762_v15  ;;  %v6687_v15 = vld [vmem:[#allocation8 + $0x358] sm:$0xf0] }
 0x612   :  { %1841 = vmatpush.bf16.msra.mxu2 %v6526_v23 }
 0x613   :  { %1880 = vmatpush.bf16.msrb.mxu0 %v6522_v34 }
 0x615   :  { %2182 = vmatpush.bf16.msra.mxu1 %v6754_v39  ;;  %v6722_v39 = vor.u32 %v8240_v29, %v6719_v49  ;;  %v8282_v29 = vld [vmem:[#allocation8 + $0x4e4] sm:$0xf]  ;;  %v6829_v49 = vld [vmem:[#allocation8 + $0x470] sm:$0xf] }
 0x616   :  { %1842 = vmatpush.bf16.msra.mxu2 %v6518_v32 }
 0x617   :  { %2161 = vmatpush.bf16.msra.mxu0 %v6706_v11  ;;  %v6733_v11 = vld [vmem:[#allocation8 + $0x3b0] sm:$0xf] }
 0x61b   :  { %2162 = vmatpush.bf16.msra.mxu0 %v6698_v41  ;;  %v8239_v41 = vld [vmem:[#allocation8 + $0x384] sm:$0xf0] }
 0x669   :  { %v1605_v35 = vpop.f32.mrf.mxu1 }
 0x66e   :  { %v1586_v38 = vpop.f32.mrf.mxu0 }
 0x66f   :  { %v1567_v40 = vpop.f32.mrf.mxu3  ;;  %v1587_v42 = vadd.f32 %v1586_v38, %v1376_v37 }
 0x671   :  { %v1607_v44 = vpop.f32.mrf.mxu1  ;;  %v1606_v46 = vadd.f32 %v1605_v35, %v1587_v42 }
 0x673   :  { %v9217_v53 = vadd.f32 %v1606_v46, %v1041_v1  ;;  %v6702_v1 = vor.u32 %v8237_v63, %v6701_v59  ;;  %v8246_v59 = vld [vmem:[#allocation8 + $0x3c4] sm:$0xf]  ;;  %v8233_v63 = vld [vmem:[#allocation8 + $0x354] sm:$0xf0] }
 0x674   :  { %v1548_v45 = vpop.f32.mrf.mxu2 }
 0x675   :  { %v1549_v47 = vadd.f32 %v1548_v45, %v9212_v43  ;;  %v1624_v14 = vmax.f32 %v9217_v53, 0.0  ;;  %2123 = vmatpush.bf16.msrb.mxu2 %v6702_v1  ;;  %v6690_v1 = vor.u32 %v8232_v9, %v6687_v15  ;;  %v6655_v15 = vld [vmem:[#allocation8 + $0x318] sm:$0xf0] }
 0x676   :  { %v1588_v13 = vpop.f32.mrf.mxu0 }
 0x677   :  { %v1589_v17 = vadd.f32 %v1588_v13, %v1376_v37  ;;  %v1568_v60 = vadd.f32 %v1567_v40, %v1549_v47  ;;  %v1569_v61 = vpop.f32.mrf.mxu3  ;;  %2163 = vmatpush.bf16.msra.mxu0 %v6690_v1 }
 0x679   :  { %v1608_v54 = vadd.f32 %v1607_v44, %v1589_v17  ;;  %v1610_v28 = vpop.f32.mrf.mxu1  ;;  %v9228_v58 = vadd.f32 %v1568_v60, %v1040_v0  ;;  %v6743_v60 = vld [vmem:[#allocation8 + $0x3c8] sm:$0xf0] }
 0x67a   :  { %v6746_v62 = vor.u32 %v8246_v59, %v6743_v60  ;;  %v6711_v60 = vld [vmem:[#allocation8 + $0x388] sm:$0xf0] }
 0x67b   :  { %v9221_v10 = vadd.f32 %v1608_v54, %v1043_v5  ;;  %v1623_v4 = vmax.f32 %v9228_v58, 0.0  ;;  %v6741_v54 = vld [vmem:[#allocation8 + $0x3c0] sm:$0xf] }
 0x67c   :  { %v1550_v12 = vpop.f32.mrf.mxu2  ;;  %v6742_v56 = vor.u32 %v8247_v55, %v6741_v54  ;;  %2183 = vmatpush.bf16.msra.mxu1 %v6746_v62  ;;  %v6666_v54 = vor.u32 %v8226_v50, %v6663_v52  ;;  %v6709_v55 = vld [vmem:[#allocation8 + $0x380] sm:$0xf]  ;;  %v6653_v62 = vld [vmem:[#allocation8 + $0x310] sm:$0xf] }
 0x67d   :  { %v1626_v18 = vmax.f32 %v9221_v10, 0.0  ;;  %v1551_v19 = vadd.f32 %v1550_v12, %v9212_v43  ;;  %v8245_v12 = vld [vmem:[#allocation8 + $0x3b4] sm:$0xf0]  ;;  %v6710_v59 = vor.u32 %v8239_v41, %v6709_v55 }
 0x67e   :  { %v1591_v23 = vpop.f32.mrf.mxu0 }
 0x67f   :  { %v1570_v5 = vadd.f32 %v1569_v61, %v1551_v19  ;;  %v1665_v24 = vpack.c.bf16 %v1626_v18, %v1624_v14  ;;  %v1592_v31 = vadd.f32 %v1591_v23, %v1376_v37  ;;  %v1572_v0 = vpop.f32.mrf.mxu3  ;;  %v6685_v61 = vld [vmem:[#allocation8 + $0x350] sm:$0xf]  ;;  %v6734_v19 = vor.u32 %v8245_v12, %v6733_v11  ;;  %v6735_v23 = vld [vmem:[#allocation8 + $0x3b8] sm:$0xf0]  ;;  %v6645_v11 = vld [vmem:[#allocation8 + $0x300] sm:$0xf] }
 0x680   :  { %v6686_v8 = vor.u32 %v8233_v63, %v6685_v61  ;;  %v8225_v63 = vld [vmem:[#allocation8 + $0x314] sm:$0xf0]  ;;  %v8223_v12 = vld [vmem:[#allocation8 + $0x304] sm:$0xf0] }
 0x681   :  { %v9236_v30 = vadd.f32 %v1570_v5, %v1042_v3  ;;  %1862 = vmatmul.bf16.vlgmr.msra.gmra.mxu3 %v1665_v24  ;;  %1900 = vmatmul.bf16.vlgmr.msrb.gmra.mxu1 %v1665_v24  ;;  %v1611_v32 = vadd.f32 %v1610_v28, %v1592_v31  ;;  %v1612_v35 = vpop.f32.mrf.mxu1  ;;  %v8244_v28 = vld [vmem:[#allocation8 + $0x3b4] sm:$0xf]  ;;  %v6677_v24 = vld [vmem:[#allocation8 + $0x340] sm:$0xf]  ;;  %v8231_v31 = vld [vmem:[#allocation8 + $0x344] sm:$0xf0]  ;;  %v6654_v9 = vor.u32 %v8225_v63, %v6653_v62 }
 0x682   :  { %v6738_v5 = vor.u32 %v8244_v28, %v6735_v23  ;;  %v6646_v28 = vor.u32 %v8223_v12, %v6645_v11  ;;  %v6647_v23 = vld [vmem:[#allocation8 + $0x308] sm:$0xf0] }
 0x683   :  { %v1625_v16 = vmax.f32 %v9236_v30, 0.0  ;;  %v9247_v38 = vadd.f32 %v1611_v32, %v1045_v25  ;;  %v6679_v32 = vld [vmem:[#allocation8 + $0x348] sm:$0xf0] }
 0x684   :  { %v1553_v7 = vpop.f32.mrf.mxu2  ;;  %2184 = vmatpush.bf16.msra.mxu1 %v6738_v5 }
 0x685   :  { %v1664_v33 = vpack.c.bf16 %v1625_v16, %v1623_v4  ;;  %v1554_v57 = vadd.f32 %v1553_v7, %v9212_v43  ;;  %v1628_v46 = vmax.f32 %v9247_v38, 0.0  ;;  %v6678_v7 = vor.u32 %v8231_v31, %v6677_v24  ;;  %v1669_v31 = vld [vmem:[#allocation17 + $0x12] ss:$8 sm:$0x3] }
 0x686   :  { %v1593_v34 = vpop.f32.mrf.mxu0 }
 0x687   :  { %v1594_v3 = vadd.f32 %v1593_v34, %v1376_v37  ;;  %1843 = vmatmul.bf16.vlgmr.msra.gmra.mxu2 %v1664_v33  ;;  %1881 = vmatmul.bf16.vlgmr.msrb.gmra.mxu0 %v1664_v33  ;;  %v1573_v40 = vadd.f32 %v1572_v0, %v1554_v57  ;;  %v1574_v47 = vpop.f32.mrf.mxu3  ;;  %v8230_v0 = vld [vmem:[#allocation8 + $0x344] sm:$0xf]  ;;  %v6725_v34 = vld [vmem:[#allocation8 + $0x3a0] sm:$0xf]  ;;  %v8243_v57 = vld [vmem:[#allocation8 + $0x3a4] sm:$0xf0] }
 0x688   :  { %v6682_v33 = vor.u32 %v8230_v0, %v6679_v32 }
 0x689   :  { %v1613_v36 = vadd.f32 %v1612_v35, %v1594_v3  ;;  %v9262_v25 = vadd.f32 %v1573_v40, %v1044_v22  ;;  %v8249_v22 = vld [vmem:[#allocation8 + $0x3d4] sm:$0xf0]  ;;  %v8242_v3 = vld [vmem:[#allocation8 + $0x3a4] sm:$0xf]  ;;  %v6726_v35 = vor.u32 %v8243_v57, %v6725_v34  ;;  %v1671_v57 = vperm.slane %v1669_v31, 0 }
 0x68a   :  { %v6750_v48 = vor.u32 %v8249_v22, %v6749_v2  ;;  %2164 = vmatpush.bf16.msra.mxu0 %v6682_v33  ;;  %v6717_v2 = vld [vmem:[#allocation8 + $0x390] sm:$0xf]  ;;  %v8241_v22 = vld [vmem:[#allocation8 + $0x394] sm:$0xf0] }
 0x68b   :  { %v9251_v42 = vadd.f32 %v1613_v36, %v1047_v27  ;;  %v1627_v27 = vmax.f32 %v9262_v25, 0.0  ;;  %v6727_v36 = vld [vmem:[#allocation8 + $0x3a8] sm:$0xf0] }
 0x68c   :  { %v1555_v44 = vpop.f32.mrf.mxu2  ;;  %2144 = vmatpush.bf16.msrb.mxu3 %v6750_v48  ;;  %v6730_v40 = vor.u32 %v8242_v3, %v6727_v36  ;;  %v6718_v48 = vor.u32 %v8241_v22, %v6717_v2  ;;  %v8285_v36 = vld [vmem:[#allocation8 + $0x4f4] sm:$0xf0] }
 0x68d   :  { %v1556_v45 = vadd.f32 %v1555_v44, %v9212_v43  ;;  %v1630_v37 = vmax.f32 %v9251_v42, 0.0  ;;  %v6669_v44 = vld [vmem:[#allocation8 + $0x330] sm:$0xf] }
 0x68e   :  { %2185 = vmatpush.bf16.msra.mxu1 %v6730_v40  ;;  %v8284_v40 = vld [vmem:[#allocation8 + $0x4f4] sm:$0xf] }
 0x68f   :  { %v1575_v13 = vadd.f32 %v1574_v47, %v1556_v45  ;;  %v1667_v6 = vpack.c.bf16 %v1630_v37, %v1628_v46  ;;  %v8229_v45 = vld [vmem:[#allocation8 + $0x334] sm:$0xf0]  ;;  %v8228_v47 = vld [vmem:[#allocation8 + $0x334] sm:$0xf] }
 0x690   :  { %2145 = vmatpush.bf16.msrb.mxu3 %v6742_v56  ;;  %v8238_v56 = vld [vmem:[#allocation8 + $0x384] sm:$0xf] }
 0x691   :  { %1867 = vmatmul.bf16.gmra.mxu3 %v1667_v6  ;;  %1905 = vmatmul.bf16.gmra.mxu1 %v1667_v6  ;;  %v9266_v21 = vadd.f32 %v1575_v13, %v1046_v26  ;;  %v8235_v26 = vld [vmem:[#allocation8 + $0x364] sm:$0xf0]  ;;  %v6670_v13 = vor.u32 %v8229_v45, %v6669_v44  ;;  %v6671_v6 = vld [vmem:[#allocation8 + $0x338] sm:$0xf0]  ;;  %v6714_v61 = vor.u32 %v8238_v56, %v6711_v60 }
 0x692   :  { %v6694_v51 = vor.u32 %v8235_v26, %v6693_v20  ;;  %v6661_v20 = vld [vmem:[#allocation8 + $0x320] sm:$0xf]  ;;  %v8227_v26 = vld [vmem:[#allocation8 + $0x324] sm:$0xf0]  ;;  %2186 = vmatpush.bf16.msra.mxu1 %v6722_v39 }
 0x693   :  { %v1629_v43 = vmax.f32 %v9266_v21, 0.0  ;;  %v7007_v21 = vld [vmem:[#allocation8 + $0x5d8] sm:$0xf0] }
 0x694   :  { %2124 = vmatpush.bf16.msrb.mxu2 %v6694_v51  ;;  %2146 = vmatpush.bf16.msrb.mxu3 %v6734_v19  ;;  %v6662_v51 = vor.u32 %v8227_v26, %v6661_v20  ;;  %v8222_v19 = vld [vmem:[#allocation8 + $0x304] sm:$0xf]  ;;  %v8269_v20 = vld [vmem:[#allocation8 + $0x474] sm:$0xf0] }
 0x695   :  { %v1666_v17 = vpack.c.bf16 %v1629_v43, %v1627_v27  ;;  %v6650_v5 = vor.u32 %v8222_v19, %v6647_v23  ;;  %v6830_v52 = vor.u32 %v8269_v20, %v6829_v49  ;;  %v6879_v49 = vld [vmem:[#allocation8 + $0x4d8] sm:$0xf0] }
 0x696   :  { %2187 = vmatpush.bf16.msra.mxu1 %v6714_v61 }
 0x697   :  { %1848 = vmatmul.bf16.gmra.mxu2 %v1666_v17  ;;  %1886 = vmatmul.bf16.gmra.mxu0 %v1666_v17  ;;  %v6674_v17 = vor.u32 %v8228_v47, %v6671_v6  ;;  %v6895_v47 = vld [vmem:[#allocation8 + $0x4f8] sm:$0xf0]  ;;  %v8283_v6 = vld [vmem:[#allocation8 + $0x4e4] sm:$0xf0] }
 0x698   :  { %2125 = vmatpush.bf16.msrb.mxu2 %v6686_v8  ;;  %2147 = vmatpush.bf16.msrb.mxu3 %v6726_v35  ;;  %v8224_v8 = vld [vmem:[#allocation8 + $0x314] sm:$0xf]  ;;  %v6893_v35 = vld [vmem:[#allocation8 + $0x4f0] sm:$0xf]  ;;  %v6898_v22 = vor.u32 %v8284_v40, %v6895_v47 }
 0x699   :  { %2165 = vmatpush.bf16.msra.mxu0 %v6674_v17  ;;  %v6658_v1 = vor.u32 %v8224_v8, %v6655_v15  ;;  %v6894_v45 = vor.u32 %v8285_v36, %v6893_v35 }
 0x69a   :  { %2476 = vmatpush.bf16.msrb.mxu1 %v6898_v22  ;;  %v8281_v22 = vld [vmem:[#allocation8 + $0x4d4] sm:$0xf0] }
 0x69c   :  { %2126 = vmatpush.bf16.msrb.mxu2 %v6678_v7  ;;  %2148 = vmatpush.bf16.msrb.mxu3 %v6718_v48  ;;  %v1672_v7 = vperm.slane %v1669_v31, 1  ;;  %v6887_v48 = vld [vmem:[#allocation8 + $0x4e8] sm:$0xf0] }
 0x69d   :  { %2166 = vmatpush.bf16.msra.mxu0 %v6666_v54 }
 0x6a0   :  { %2127 = vmatpush.bf16.msrb.mxu2 %v6670_v13  ;;  %2149 = vmatpush.bf16.msrb.mxu3 %v6710_v59  ;;  %v6885_v13 = vld [vmem:[#allocation8 + $0x4e0] sm:$0xf] }
 0x6a1   :  { %2167 = vmatpush.bf16.msra.mxu0 %v6658_v1  ;;  %v6886_v39 = vor.u32 %v8283_v6, %v6885_v13  ;;  %v8268_v6 = vld [vmem:[#allocation8 + $0x474] sm:$0xf] }
 0x6a4   :  { %2128 = vmatpush.bf16.msrb.mxu2 %v6662_v51  ;;  %2438 = vmatpush.bf16.msra.mxu3 %v6894_v45  ;;  %v6890_v51 = vor.u32 %v8282_v29, %v6887_v48  ;;  %v8280_v29 = vld [vmem:[#allocation8 + $0x4d4] sm:$0xf] }
 0x6a5   :  { %2168 = vmatpush.bf16.msra.mxu0 %v6650_v5  ;;  %v6882_v20 = vor.u32 %v8280_v29, %v6879_v49  ;;  %v8272_v29 = vld [vmem:[#allocation8 + $0x494] sm:$0xf]  ;;  %v6847_v49 = vld [vmem:[#allocation8 + $0x498] sm:$0xf0] }
 0x6a6   :  { %2477 = vmatpush.bf16.msrb.mxu1 %v6890_v51  ;;  %v6823_v51 = vld [vmem:[#allocation8 + $0x468] sm:$0xf0] }
 0x6a8   :  { %2129 = vmatpush.bf16.msrb.mxu2 %v6654_v9  ;;  %2439 = vmatpush.bf16.msra.mxu3 %v6886_v39  ;;  %v8267_v39 = vld [vmem:[#allocation8 + $0x464] sm:$0xf0] }
 0x6aa   :  { %2478 = vmatpush.bf16.msrb.mxu1 %v6882_v20  ;;  %v8259_v20 = vld [vmem:[#allocation8 + $0x424] sm:$0xf0] }
 0x6ac   :  { %2130 = vmatpush.bf16.msrb.mxu2 %v6646_v28 }
 0x6b0   :  { %2419 = vmatpush.bf16.msra.mxu2 %v6830_v52 }
 0x6fe   :  { %v1901_v24 = vpop.f32.mrf.mxu1 }
 0x704   :  { %v1882_v0 = vpop.f32.mrf.mxu0  ;;  %v1863_v32 = vpop.f32.mrf.mxu3 }
 0x705   :  { %v1883_v33 = vadd.f32 %v1882_v0, %v1672_v7 }
 0x706   :  { %v1903_v34 = vpop.f32.mrf.mxu1 }
 0x707   :  { %v1902_v17 = vadd.f32 %v1901_v24, %v1883_v33 }
 0x709   :  { %v1912_v55 = vmax.f32 %v1902_v17, 0.0 }
 0x70a   :  { %v1844_v3 = vpop.f32.mrf.mxu2 }
 0x70b   :  { %v1845_v26 = vadd.f32 %v1844_v3, %v1671_v57 }
 0x70c   :  { %v1884_v44 = vpop.f32.mrf.mxu0  ;;  %v1865_v54 = vpop.f32.mrf.mxu3 }
 0x70d   :  { %v1885_v2 = vadd.f32 %v1884_v44, %v1672_v7  ;;  %v1864_v59 = vadd.f32 %v1863_v32, %v1845_v26 }
 0x70e   :  { %v1906_v62 = vpop.f32.mrf.mxu1 }
 0x70f   :  { %v1904_v50 = vadd.f32 %v1903_v34, %v1885_v2  ;;  %v1911_v9 = vmax.f32 %v1864_v59, 0.0  ;;  %v6877_v2 = vld [vmem:[#allocation8 + $0x4d0] sm:$0xf]  ;;  %v6871_v59 = vld [vmem:[#allocation8 + $0x4c8] sm:$0xf0] }
 0x710   :  { %v6878_v48 = vor.u32 %v8281_v22, %v6877_v2  ;;  %v6845_v2 = vld [vmem:[#allocation8 + $0x490] sm:$0xf]  ;;  %v8273_v22 = vld [vmem:[#allocation8 + $0x494] sm:$0xf0] }
 0x711   :  { %v1914_v41 = vmax.f32 %v1904_v50, 0.0  ;;  %v8266_v50 = vld [vmem:[#allocation8 + $0x464] sm:$0xf] }
 0x712   :  { %v1846_v56 = vpop.f32.mrf.mxu2  ;;  %2440 = vmatpush.bf16.msra.mxu3 %v6878_v48  ;;  %v6826_v52 = vor.u32 %v8266_v50, %v6823_v51  ;;  %v6846_v48 = vor.u32 %v8273_v22, %v6845_v2  ;;  %v6791_v51 = vld [vmem:[#allocation8 + $0x428] sm:$0xf0]  ;;  %v7013_v2 = vld [vmem:[#allocation8 + $0x5e0] sm:$0xf]  ;;  %v8315_v22 = vld [vmem:[#allocation8 + $0x5e4] sm:$0xf0] }
 0x713   :  { %v1953_v60 = vpack.c.bf16 %v1914_v41, %v1912_v55  ;;  %v1847_v61 = vadd.f32 %v1846_v56, %v1671_v57  ;;  %v8279_v55 = vld [vmem:[#allocation8 + $0x4c4] sm:$0xf0]  ;;  %v8278_v41 = vld [vmem:[#allocation8 + $0x4c4] sm:$0xf] }
 0x714   :  { %v1887_v63 = vpop.f32.mrf.mxu0  ;;  %v1868_v12 = vpop.f32.mrf.mxu3 }
 0x715   :  { %v1866_v8 = vadd.f32 %v1865_v54, %v1847_v61  ;;  %2150 = vmatmul.bf16.vlgmr.msrb.gmra.mxu3 %v1953_v60  ;;  %2188 = vmatmul.bf16.vlgmr.msra.gmra.mxu1 %v1953_v60  ;;  %v1888_v11 = vadd.f32 %v1887_v63, %v1672_v7  ;;  %v6869_v54 = vld [vmem:[#allocation8 + $0x4c0] sm:$0xf]  ;;  %v6874_v60 = vor.u32 %v8278_v41, %v6871_v59  ;;  %v6813_v61 = vld [vmem:[#allocation8 + $0x450] sm:$0xf]  ;;  %v8270_v41 = vld [vmem:[#allocation8 + $0x484] sm:$0xf] }
 0x716   :  { %v1908_v24 = vpop.f32.mrf.mxu1  ;;  %v6870_v56 = vor.u32 %v8279_v55, %v6869_v54  ;;  %v6837_v54 = vld [vmem:[#allocation8 + $0x480] sm:$0xf]  ;;  %v8271_v55 = vld [vmem:[#allocation8 + $0x484] sm:$0xf0]  ;;  %v6839_v59 = vld [vmem:[#allocation8 + $0x488] sm:$0xf0] }
 0x717   :  { %v1913_v15 = vmax.f32 %v1866_v8, 0.0  ;;  %v1907_v23 = vadd.f32 %v1906_v62, %v1888_v11  ;;  %v8265_v62 = vld [vmem:[#allocation8 + $0x454] sm:$0xf0]  ;;  %v8264_v8 = vld [vmem:[#allocation8 + $0x454] sm:$0xf]  ;;  %2479 = vmatpush.bf16.msrb.mxu1 %v6874_v60  ;;  %v6842_v60 = vor.u32 %v8270_v41, %v6839_v59 }
 0x718   :  { %2441 = vmatpush.bf16.msra.mxu3 %v6870_v56  ;;  %v6814_v63 = vor.u32 %v8265_v62, %v6813_v61  ;;  %v8277_v11 = vld [vmem:[#allocation8 + $0x4b4] sm:$0xf0]  ;;  %v6838_v56 = vor.u32 %v8271_v55, %v6837_v54  ;;  %v6781_v61 = vld [vmem:[#allocation8 + $0x410] sm:$0xf]  ;;  %v8300_v54 = vld [vmem:[#allocation8 + $0x574] sm:$0xf] }
 0x719   :  { %v1952_v1 = vpack.c.bf16 %v1913_v15, %v1911_v9  ;;  %v1916_v32 = vmax.f32 %v1907_v23, 0.0  ;;  %v6815_v9 = vld [vmem:[#allocation8 + $0x458] sm:$0xf0]  ;;  %v8257_v62 = vld [vmem:[#allocation8 + $0x414] sm:$0xf0] }
 0x71a   :  { %v1849_v19 = vpop.f32.mrf.mxu2  ;;  %v6818_v15 = vor.u32 %v8264_v8, %v6815_v9  ;;  %v6782_v8 = vor.u32 %v8257_v62, %v6781_v61  ;;  %v6783_v9 = vld [vmem:[#allocation8 + $0x418] sm:$0xf0] }
 0x71b   :  { %2131 = vmatmul.bf16.vlgmr.msrb.gmra.mxu2 %v1952_v1  ;;  %2169 = vmatmul.bf16.vlgmr.msra.gmra.mxu0 %v1952_v1  ;;  %v1850_v31 = vadd.f32 %v1849_v19, %v1671_v57  ;;  %v6861_v1 = vld [vmem:[#allocation8 + $0x4b0] sm:$0xf]  ;;  %v6959_v55 = vld [vmem:[#allocation8 + $0x578] sm:$0xf0] }
 0x71c   :  { %v1889_v28 = vpop.f32.mrf.mxu0  ;;  %v1870_v40 = vpop.f32.mrf.mxu3  ;;  %v6862_v19 = vor.u32 %v8277_v11, %v6861_v1  ;;  %v6773_v1 = vld [vmem:[#allocation8 + $0x400] sm:$0xf]  ;;  %v8255_v11 = vld [vmem:[#allocation8 + $0x404] sm:$0xf0] }
 0x71d   :  { %v1890_v5 = vadd.f32 %v1889_v28, %v1672_v7  ;;  %v1869_v3 = vadd.f32 %v1868_v12, %v1850_v31  ;;  %v6831_v7 = vld [vmem:[#allocation8 + $0x478] sm:$0xf0]  ;;  %v8276_v12 = vld [vmem:[#allocation8 + $0x4b4] sm:$0xf]  ;;  %v8262_v31 = vld [vmem:[#allocation8 + $0x444] sm:$0xf] }
 0x71e   :  { %v6834_v17 = vor.u32 %v8268_v6, %v6831_v7  ;;  %v6863_v28 = vld [vmem:[#allocation8 + $0x4b8] sm:$0xf0]  ;;  %2442 = vmatpush.bf16.msra.mxu3 %v6862_v19  ;;  %v6774_v19 = vor.u32 %v8255_v11, %v6773_v1 }
 0x71f   :  { %v1909_v0 = vadd.f32 %v1908_v24, %v1890_v5  ;;  %v1915_v45 = vmax.f32 %v1869_v3, 0.0  ;;  %v6866_v23 = vor.u32 %v8276_v12, %v6863_v28  ;;  %v6805_v5 = vld [vmem:[#allocation8 + $0x440] sm:$0xf]  ;;  %v8263_v24 = vld [vmem:[#allocation8 + $0x444] sm:$0xf0] }
 0x720   :  { %2457 = vmatpush.bf16.msrb.mxu0 %v6834_v17  ;;  %v8275_v3 = vld [vmem:[#allocation8 + $0x4a4] sm:$0xf0]  ;;  %v6799_v7 = vld [vmem:[#allocation8 + $0x438] sm:$0xf0]  ;;  %v8254_v12 = vld [vmem:[#allocation8 + $0x404] sm:$0xf] }
 0x721   :  { %v1918_v33 = vmax.f32 %v1909_v0, 0.0  ;;  %v6806_v0 = vor.u32 %v8263_v24, %v6805_v5  ;;  %2480 = vmatpush.bf16.msrb.mxu1 %v6866_v23  ;;  %v6775_v28 = vld [vmem:[#allocation8 + $0x408] sm:$0xf0]  ;;  %v1957_v24 = vld [vmem:[#allocation17 + $0x13] ss:$8 sm:$0x3] }
 0x722   :  { %v1851_v34 = vpop.f32.mrf.mxu2  ;;  %v6778_v23 = vor.u32 %v8254_v12, %v6775_v28 }
 0x723   :  { %v1852_v35 = vadd.f32 %v1851_v34, %v1671_v57  ;;  %v1955_v36 = vpack.c.bf16 %v1918_v33, %v1916_v32  ;;  %v6821_v57 = vld [vmem:[#allocation8 + $0x460] sm:$0xf]  ;;  %v6807_v32 = vld [vmem:[#allocation8 + $0x448] sm:$0xf0] }
 0x724   :  { %v6822_v26 = vor.u32 %v8267_v39, %v6821_v57  ;;  %2458 = vmatpush.bf16.msrb.mxu0 %v6826_v52  ;;  %v6810_v33 = vor.u32 %v8262_v31, %v6807_v32  ;;  %v6853_v34 = vld [vmem:[#allocation8 + $0x4a0] sm:$0xf]  ;;  %v6850_v57 = vor.u32 %v8272_v29, %v6847_v49  ;;  %v1960_v31 = vperm.slane %v1957_v24, 1 }
 0x725   :  { %v1871_v44 = vadd.f32 %v1870_v40, %v1852_v35  ;;  %2155 = vmatmul.bf16.gmra.mxu3 %v1955_v36  ;;  %2193 = vmatmul.bf16.gmra.mxu1 %v1955_v36  ;;  %v6854_v35 = vor.u32 %v8275_v3, %v6853_v34  ;;  %v8274_v36 = vld [vmem:[#allocation8 + $0x4a4] sm:$0xf]  ;;  %v6855_v40 = vld [vmem:[#allocation8 + $0x4a8] sm:$0xf0]  ;;  %v6789_v39 = vld [vmem:[#allocation8 + $0x420] sm:$0xf] }
 0x726   :  { %2420 = vmatpush.bf16.msra.mxu2 %v6822_v26  ;;  %v8258_v26 = vld [vmem:[#allocation8 + $0x424] sm:$0xf]  ;;  %v6790_v50 = vor.u32 %v8259_v20, %v6789_v39  ;;  %v9274_v34 = vperm.slane %v1957_v24, 0  ;;  %v7015_v39 = vld [vmem:[#allocation8 + $0x5e8] sm:$0xf0] }
 0x727   :  { %v1917_v47 = vmax.f32 %v1871_v44, 0.0  ;;  %v6858_v44 = vor.u32 %v8274_v36, %v6855_v40  ;;  %2443 = vmatpush.bf16.msra.mxu3 %v6854_v35  ;;  %v6794_v52 = vor.u32 %v8258_v26, %v6791_v51  ;;  %v6957_v20 = vld [vmem:[#allocation8 + $0x570] sm:$0xf]  ;;  %v7014_v51 = vor.u32 %v8315_v22, %v7013_v2  ;;  %v6951_v22 = vld [vmem:[#allocation8 + $0x568] sm:$0xf0] }
 0x728   :  { %2459 = vmatpush.bf16.msrb.mxu0 %v6818_v15 }
 0x729   :  { %v1954_v13 = vpack.c.bf16 %v1917_v47, %v1915_v45  ;;  %v6797_v45 = vld [vmem:[#allocation8 + $0x430] sm:$0xf]  ;;  %v8261_v47 = vld [vmem:[#allocation8 + $0x434] sm:$0xf0]  ;;  %2481 = vmatpush.bf16.msrb.mxu1 %v6858_v44 }
 0x72a   :  { %2421 = vmatpush.bf16.msra.mxu2 %v6814_v63  ;;  %v6798_v6 = vor.u32 %v8261_v47, %v6797_v45  ;;  %v8256_v63 = vld [vmem:[#allocation8 + $0x414] sm:$0xf]  ;;  %v7021_v47 = vld [vmem:[#allocation8 + $0x5f0] sm:$0xf] }
 0x72b   :  { %2136 = vmatmul.bf16.gmra.mxu2 %v1954_v13  ;;  %2174 = vmatmul.bf16.gmra.mxu0 %v1954_v13  ;;  %v8260_v13 = vld [vmem:[#allocation8 + $0x434] sm:$0xf]  ;;  %v6786_v15 = vor.u32 %v8256_v63, %v6783_v9 }
 0x72c   :  { %2460 = vmatpush.bf16.msrb.mxu0 %v6810_v33  ;;  %v6802_v17 = vor.u32 %v8260_v13, %v6799_v7  ;;  %2444 = vmatpush.bf16.msra.mxu3 %v6846_v48  ;;  %v8317_v13 = vld [vmem:[#allocation8 + $0x5f4] sm:$0xf0] }
 0x72d   :  { %2482 = vmatpush.bf16.msrb.mxu1 %v6850_v57  ;;  %v7022_v7 = vor.u32 %v8317_v13, %v7021_v47  ;;  %v8314_v57 = vld [vmem:[#allocation8 + $0x5e4] sm:$0xf]  ;;  %v8312_v47 = vld [vmem:[#allocation8 + $0x5d4] sm:$0xf] }
 0x72e   :  { %2422 = vmatpush.bf16.msra.mxu2 %v6806_v0  ;;  %v7018_v53 = vor.u32 %v8314_v57, %v7015_v39 }
 0x730   :  { %2461 = vmatpush.bf16.msrb.mxu0 %v6802_v17  ;;  %2445 = vmatpush.bf16.msra.mxu3 %v6838_v56  ;;  %v7023_v17 = vld [vmem:[#allocation8 + $0x5f8] sm:$0xf0]  ;;  %v6962_v56 = vor.u32 %v8300_v54, %v6959_v55  ;;  %v8296_v55 = vld [vmem:[#allocation8 + $0x554] sm:$0xf] }
 0x731   :  { %2483 = vmatpush.bf16.msrb.mxu1 %v6842_v60 }
 0x732   :  { %2423 = vmatpush.bf16.msra.mxu2 %v6798_v6  ;;  %v8316_v6 = vld [vmem:[#allocation8 + $0x5f4] sm:$0xf] }
 0x733   :  { %v7026_v49 = vor.u32 %v8316_v6, %v7023_v17  ;;  %v6949_v6 = vld [vmem:[#allocation8 + $0x560] sm:$0xf]  ;;  %v8298_v17 = vld [vmem:[#allocation8 + $0x564] sm:$0xf] }
 0x734   :  { %2462 = vmatpush.bf16.msrb.mxu0 %v6794_v52  ;;  %2726 = vmatpush.bf16.msrb.mxu3 %v7022_v7  ;;  %v8301_v52 = vld [vmem:[#allocation8 + $0x574] sm:$0xf0]  ;;  %v8299_v7 = vld [vmem:[#allocation8 + $0x564] sm:$0xf0]  ;;  %v6954_v57 = vor.u32 %v8298_v17, %v6951_v22  ;;  %v8290_v17 = vld [vmem:[#allocation8 + $0x524] sm:$0xf] }
 0x735   :  { %2764 = vmatpush.bf16.msra.mxu1 %v7026_v49  ;;  %v6950_v2 = vor.u32 %v8299_v7, %v6949_v6  ;;  %v8311_v49 = vld [vmem:[#allocation8 + $0x5c4] sm:$0xf0]  ;;  %v6917_v6 = vld [vmem:[#allocation8 + $0x520] sm:$0xf]  ;;  %v6919_v22 = vld [vmem:[#allocation8 + $0x528] sm:$0xf0] }
 0x736   :  { %2424 = vmatpush.bf16.msra.mxu2 %v6790_v50  ;;  %v8291_v7 = vld [vmem:[#allocation8 + $0x524] sm:$0xf0] }
 0x738   :  { %2463 = vmatpush.bf16.msrb.mxu0 %v6786_v15  ;;  %2727 = vmatpush.bf16.msrb.mxu3 %v7014_v51 }
 0x739   :  { %2765 = vmatpush.bf16.msra.mxu1 %v7018_v53  ;;  %v6943_v53 = vld [vmem:[#allocation8 + $0x558] sm:$0xf0] }
 0x73a   :  { %2425 = vmatpush.bf16.msra.mxu2 %v6782_v8 }
 0x73c   :  { %2464 = vmatpush.bf16.msrb.mxu0 %v6778_v23 }
 0x73e   :  { %2426 = vmatpush.bf16.msra.mxu2 %v6774_v19 }
 0x740   :  { %2745 = vmatpush.bf16.msra.mxu0 %v6962_v56  ;;  %v6989_v56 = vld [vmem:[#allocation8 + $0x5b0] sm:$0xf] }
 0x744   :  { %2746 = vmatpush.bf16.msra.mxu0 %v6954_v57  ;;  %v8303_v57 = vld [vmem:[#allocation8 + $0x584] sm:$0xf0] }
 0x792   :  { %v2189_v5 = vpop.f32.mrf.mxu1 }
 0x798   :  { %v2170_v0 = vpop.f32.mrf.mxu0  ;;  %v2151_v32 = vpop.f32.mrf.mxu3 }
 0x799   :  { %v2171_v33 = vadd.f32 %v2170_v0, %v1960_v31 }
 0x79a   :  { %v2191_v3 = vpop.f32.mrf.mxu1 }
 0x79b   :  { %v2190_v36 = vadd.f32 %v2189_v5, %v2171_v33 }
 0x79d   :  { %v9279_v29 = vadd.f32 %v2190_v36, %v1624_v14  ;;  %v6958_v14 = vor.u32 %v8301_v52, %v6957_v20  ;;  %v8310_v20 = vld [vmem:[#allocation8 + $0x5c4] sm:$0xf]  ;;  %v8297_v52 = vld [vmem:[#allocation8 + $0x554] sm:$0xf0] }
 0x79e   :  { %v2132_v35 = vpop.f32.mrf.mxu2 }
 0x79f   :  { %v2133_v40 = vadd.f32 %v2132_v35, %v9274_v34  ;;  %v2208_v60 = vmax.f32 %v9279_v29, 0.0  ;;  %2707 = vmatpush.bf16.msrb.mxu2 %v6958_v14  ;;  %v6946_v14 = vor.u32 %v8296_v55, %v6943_v53  ;;  %v6911_v53 = vld [vmem:[#allocation8 + $0x518] sm:$0xf0] }
 0x7a0   :  { %v2172_v44 = vpop.f32.mrf.mxu0  ;;  %v2153_v50 = vpop.f32.mrf.mxu3 }
 0x7a1   :  { %v2173_v45 = vadd.f32 %v2172_v44, %v1960_v31  ;;  %v2152_v26 = vadd.f32 %v2151_v32, %v2133_v40  ;;  %2747 = vmatpush.bf16.msra.mxu0 %v6946_v14 }
 0x7a2   :  { %v2194_v63 = vpop.f32.mrf.mxu1 }
 0x7a3   :  { %v2192_v48 = vadd.f32 %v2191_v3, %v2173_v45  ;;  %v9290_v10 = vadd.f32 %v2152_v26, %v1623_v4  ;;  %v8313_v45 = vld [vmem:[#allocation8 + $0x5d4] sm:$0xf0]  ;;  %v6999_v26 = vld [vmem:[#allocation8 + $0x5c8] sm:$0xf0]  ;;  %2708 = vmatpush.bf16.msrb.mxu2 %v6950_v2  ;;  %v6918_v2 = vor.u32 %v8291_v7, %v6917_v6 }
 0x7a4   :  { %v7002_v51 = vor.u32 %v8310_v20, %v6999_v26  ;;  %v6967_v26 = vld [vmem:[#allocation8 + $0x588] sm:$0xf0]  ;;  %v8333_v6 = vld [vmem:[#allocation8 + $0x674] sm:$0xf0] }
 0x7a5   :  { %v9283_v41 = vadd.f32 %v2192_v48, %v1626_v18  ;;  %v2207_v11 = vmax.f32 %v9290_v10, 0.0  ;;  %v6997_v48 = vld [vmem:[#allocation8 + $0x5c0] sm:$0xf] }
 0x7a6   :  { %v2134_v59 = vpop.f32.mrf.mxu2  ;;  %v6998_v39 = vor.u32 %v8311_v49, %v6997_v48  ;;  %v6922_v48 = vor.u32 %v8290_v17, %v6919_v22  ;;  %v6965_v49 = vld [vmem:[#allocation8 + $0x580] sm:$0xf] }
 0x7a7   :  { %v2210_v61 = vmax.f32 %v9283_v41, 0.0  ;;  %v2135_v62 = vadd.f32 %v2134_v59, %v9274_v34  ;;  %v8309_v59 = vld [vmem:[#allocation8 + $0x5b4] sm:$0xf0]  ;;  %v6966_v20 = vor.u32 %v8303_v57, %v6965_v49 }
 0x7a8   :  { %v2175_v8 = vpop.f32.mrf.mxu0  ;;  %v2156_v4 = vpop.f32.mrf.mxu3 }
 0x7a9   :  { %v2249_v18 = vpack.c.bf16 %v2210_v61, %v2208_v60  ;;  %v2154_v9 = vadd.f32 %v2153_v50, %v2135_v62  ;;  %v2176_v1 = vadd.f32 %v2175_v8, %v1960_v31  ;;  %v6941_v50 = vld [vmem:[#allocation8 + $0x550] sm:$0xf]  ;;  %v6990_v62 = vor.u32 %v8309_v59, %v6989_v56  ;;  %v6991_v8 = vld [vmem:[#allocation8 + $0x5b8] sm:$0xf0]  ;;  %v6901_v56 = vld [vmem:[#allocation8 + $0x500] sm:$0xf] }
 0x7aa   :  { %v2196_v5 = vpop.f32.mrf.mxu1  ;;  %v6942_v54 = vor.u32 %v8297_v52, %v6941_v50  ;;  %v8289_v52 = vld [vmem:[#allocation8 + $0x514] sm:$0xf0]  ;;  %v8287_v59 = vld [vmem:[#allocation8 + $0x504] sm:$0xf0] }
 0x7ab   :  { %v9298_v15 = vadd.f32 %v2154_v9, %v1625_v16  ;;  %2446 = vmatmul.bf16.vlgmr.msra.gmra.mxu3 %v2249_v18  ;;  %2484 = vmatmul.bf16.vlgmr.msrb.gmra.mxu1 %v2249_v18  ;;  %v2195_v28 = vadd.f32 %v2194_v63, %v2176_v1  ;;  %v8308_v63 = vld [vmem:[#allocation8 + $0x5b4] sm:$0xf]  ;;  %v6933_v9 = vld [vmem:[#allocation8 + $0x540] sm:$0xf]  ;;  %v8295_v1 = vld [vmem:[#allocation8 + $0x544] sm:$0xf0] }
 0x7ac   :  { %2709 = vmatpush.bf16.msrb.mxu2 %v6942_v54  ;;  %v6994_v18 = vor.u32 %v8308_v63, %v6991_v8  ;;  %v8288_v54 = vld [vmem:[#allocation8 + $0x514] sm:$0xf]  ;;  %v6902_v63 = vor.u32 %v8287_v59, %v6901_v56  ;;  %v6903_v8 = vld [vmem:[#allocation8 + $0x508] sm:$0xf0] }
 0x7ad   :  { %v2209_v58 = vmax.f32 %v9298_v15, 0.0  ;;  %v9309_v24 = vadd.f32 %v2195_v28, %v1628_v46  ;;  %v6914_v14 = vor.u32 %v8288_v54, %v6911_v53 }
 0x7ae   :  { %v2137_v12 = vpop.f32.mrf.mxu2 }
 0x7af   :  { %v2248_v19 = vpack.c.bf16 %v2209_v58, %v2207_v11  ;;  %v2138_v30 = vadd.f32 %v2137_v12, %v9274_v34  ;;  %v2212_v35 = vmax.f32 %v9309_v24, 0.0  ;;  %v6934_v12 = vor.u32 %v8295_v1, %v6933_v9  ;;  %v2253_v1 = vld [vmem:[#allocation17 + $0x14] ss:$8 sm:$0x3] }
 0x7b0   :  { %v2177_v23 = vpop.f32.mrf.mxu0  ;;  %v2158_v40 = vpop.f32.mrf.mxu3 }
 0x7b1   :  { %v2178_v16 = vadd.f32 %v2177_v23, %v1960_v31  ;;  %2427 = vmatmul.bf16.vlgmr.msra.gmra.mxu2 %v2248_v19  ;;  %2465 = vmatmul.bf16.vlgmr.msrb.gmra.mxu0 %v2248_v19  ;;  %v2157_v32 = vadd.f32 %v2156_v4, %v2138_v30  ;;  %v8294_v4 = vld [vmem:[#allocation8 + $0x544] sm:$0xf]  ;;  %v6935_v19 = vld [vmem:[#allocation8 + $0x548] sm:$0xf0]  ;;  %v6981_v23 = vld [vmem:[#allocation8 + $0x5a0] sm:$0xf] }
 0x7b2   :  { %v6938_v28 = vor.u32 %v8294_v4, %v6935_v19  ;;  %v8307_v30 = vld [vmem:[#allocation8 + $0x5a4] sm:$0xf0]  ;;  %2710 = vmatpush.bf16.msrb.mxu2 %v6934_v12  ;;  %v2256_v12 = vperm.slane %v2253_v1, 1 }
 0x7b3   :  { %v2197_v0 = vadd.f32 %v2196_v5, %v2178_v16  ;;  %v9320_v44 = vadd.f32 %v2157_v32, %v1627_v27  ;;  %v7005_v27 = vld [vmem:[#allocation8 + $0x5d0] sm:$0xf]  ;;  %v8306_v16 = vld [vmem:[#allocation8 + $0x5a4] sm:$0xf]  ;;  %v6982_v5 = vor.u32 %v8307_v30, %v6981_v23  ;;  %v2255_v30 = vperm.slane %v2253_v1, 0 }
 0x7b4   :  { %v7006_v13 = vor.u32 %v8313_v45, %v7005_v27  ;;  %2748 = vmatpush.bf16.msra.mxu0 %v6938_v28  ;;  %v6973_v27 = vld [vmem:[#allocation8 + $0x590] sm:$0xf]  ;;  %v8305_v45 = vld [vmem:[#allocation8 + $0x594] sm:$0xf0] }
 0x7b5   :  { %v9313_v33 = vadd.f32 %v2197_v0, %v1630_v37  ;;  %v2211_v37 = vmax.f32 %v9320_v44, 0.0  ;;  %v6983_v0 = vld [vmem:[#allocation8 + $0x5a8] sm:$0xf0] }
 0x7b6   :  { %v2139_v3 = vpop.f32.mrf.mxu2  ;;  %2728 = vmatpush.bf16.msrb.mxu3 %v7006_v13  ;;  %v6986_v32 = vor.u32 %v8306_v16, %v6983_v0  ;;  %v6974_v13 = vor.u32 %v8305_v45, %v6973_v27  ;;  %v8349_v0 = vld [vmem:[#allocation8 + $0x6f4] sm:$0xf0] }
 0x7b7   :  { %v2140_v36 = vadd.f32 %v2139_v3, %v9274_v34  ;;  %v2214_v31 = vmax.f32 %v9313_v33, 0.0  ;;  %v6925_v3 = vld [vmem:[#allocation8 + $0x530] sm:$0xf] }
 0x7b9   :  { %v2159_v38 = vadd.f32 %v2158_v40, %v2140_v36  ;;  %v2251_v42 = vpack.c.bf16 %v2214_v31, %v2212_v35  ;;  %v8293_v36 = vld [vmem:[#allocation8 + $0x534] sm:$0xf0]  ;;  %v8292_v40 = vld [vmem:[#allocation8 + $0x534] sm:$0xf] }
 0x7ba   :  { %2729 = vmatpush.bf16.msrb.mxu3 %v6998_v39  ;;  %v8302_v39 = vld [vmem:[#allocation8 + $0x584] sm:$0xf] }
 0x7bb   :  { %v9328_v46 = vadd.f32 %v2159_v38, %v1629_v43  ;;  %2451 = vmatmul.bf16.gmra.mxu3 %v2251_v42  ;;  %2489 = vmatmul.bf16.gmra.mxu1 %v2251_v42  ;;  %v7010_v43 = vor.u32 %v8312_v47, %v7007_v21  ;;  %v6926_v38 = vor.u32 %v8293_v36, %v6925_v3  ;;  %v6927_v42 = vld [vmem:[#allocation8 + $0x538] sm:$0xf0]  ;;  %v8304_v47 = vld [vmem:[#allocation8 + $0x594] sm:$0xf] }
 0x7bc   :  { %v6975_v21 = vld [vmem:[#allocation8 + $0x598] sm:$0xf0]  ;;  %v6970_v50 = vor.u32 %v8302_v39, %v6967_v26 }
 0x7bd   :  { %v2213_v34 = vmax.f32 %v9328_v46, 0.0  ;;  %2766 = vmatpush.bf16.msra.mxu1 %v7010_v43  ;;  %2711 = vmatpush.bf16.msrb.mxu2 %v6926_v38  ;;  %v6978_v43 = vor.u32 %v8304_v47, %v6975_v21  ;;  %v7141_v38 = vld [vmem:[#allocation8 + $0x6e0] sm:$0xf]  ;;  %v8346_v47 = vld [vmem:[#allocation8 + $0x6e4] sm:$0xf] }
 0x7be   :  { %2730 = vmatpush.bf16.msrb.mxu3 %v6990_v62  ;;  %v8286_v62 = vld [vmem:[#allocation8 + $0x504] sm:$0xf]  ;;  %v7085_v21 = vld [vmem:[#allocation8 + $0x670] sm:$0xf]  ;;  %v7263_v46 = vld [vmem:[#allocation8 + $0x7d8] sm:$0xf0] }
 0x7bf   :  { %v2250_v25 = vpack.c.bf16 %v2213_v34, %v2211_v37  ;;  %v7086_v22 = vor.u32 %v8333_v6, %v7085_v21  ;;  %v7135_v21 = vld [vmem:[#allocation8 + $0x6d8] sm:$0xf0] }
 0x7c1   :  { %2432 = vmatmul.bf16.gmra.mxu2 %v2250_v25  ;;  %2470 = vmatmul.bf16.gmra.mxu0 %v2250_v25  ;;  %v6930_v25 = vor.u32 %v8292_v40, %v6927_v42  ;;  %v7151_v40 = vld [vmem:[#allocation8 + $0x6f8] sm:$0xf0]  ;;  %v8347_v42 = vld [vmem:[#allocation8 + $0x6e4] sm:$0xf0] }
 0x7c2   :  { %2767 = vmatpush.bf16.msra.mxu1 %v7002_v51  ;;  %2731 = vmatpush.bf16.msrb.mxu3 %v6982_v5  ;;  %v6909_v51 = vld [vmem:[#allocation8 + $0x510] sm:$0xf] }
 0x7c3   :  { %2749 = vmatpush.bf16.msra.mxu0 %v6930_v25  ;;  %2712 = vmatpush.bf16.msrb.mxu2 %v6918_v2  ;;  %v6910_v55 = vor.u32 %v8289_v52, %v6909_v51  ;;  %v7149_v5 = vld [vmem:[#allocation8 + $0x6f0] sm:$0xf] }
 0x7c4   :  { %v7150_v36 = vor.u32 %v8349_v0, %v7149_v5 }
 0x7c6   :  { %2768 = vmatpush.bf16.msra.mxu1 %v6994_v18  ;;  %2732 = vmatpush.bf16.msrb.mxu3 %v6974_v13  ;;  %v6906_v18 = vor.u32 %v8286_v62, %v6903_v8  ;;  %v7143_v13 = vld [vmem:[#allocation8 + $0x6e8] sm:$0xf0] }
 0x7c7   :  { %2750 = vmatpush.bf16.msra.mxu0 %v6922_v48  ;;  %2713 = vmatpush.bf16.msrb.mxu2 %v6910_v55  ;;  %v7146_v2 = vor.u32 %v8346_v47, %v7143_v13  ;;  %v8344_v47 = vld [vmem:[#allocation8 + $0x6d4] sm:$0xf] }
 0x7c8   :  { %v7138_v6 = vor.u32 %v8344_v47, %v7135_v21  ;;  %v8336_v47 = vld [vmem:[#allocation8 + $0x694] sm:$0xf]  ;;  %v7103_v21 = vld [vmem:[#allocation8 + $0x698] sm:$0xf0] }
 0x7ca   :  { %2769 = vmatpush.bf16.msra.mxu1 %v6986_v32  ;;  %2733 = vmatpush.bf16.msrb.mxu3 %v6966_v20  ;;  %v8348_v32 = vld [vmem:[#allocation8 + $0x6f4] sm:$0xf] }
 0x7cb   :  { %2751 = vmatpush.bf16.msra.mxu0 %v6914_v14  ;;  %2714 = vmatpush.bf16.msrb.mxu2 %v6902_v63  ;;  %v7154_v45 = vor.u32 %v8348_v32, %v7151_v40 }
 0x7ce   :  { %2770 = vmatpush.bf16.msra.mxu1 %v6978_v43  ;;  %3022 = vmatpush.bf16.msra.mxu3 %v7150_v36  ;;  %v7142_v43 = vor.u32 %v8347_v42, %v7141_v38  ;;  %v8332_v42 = vld [vmem:[#allocation8 + $0x674] sm:$0xf] }
 0x7cf   :  { %2752 = vmatpush.bf16.msra.mxu0 %v6906_v18  ;;  %3003 = vmatpush.bf16.msra.mxu2 %v7086_v22 }
 0x7d2   :  { %2771 = vmatpush.bf16.msra.mxu1 %v6970_v50  ;;  %3023 = vmatpush.bf16.msra.mxu3 %v7142_v43  ;;  %v8331_v43 = vld [vmem:[#allocation8 + $0x664] sm:$0xf0] }
 0x7d6   :  { %3060 = vmatpush.bf16.msrb.mxu1 %v7154_v45  ;;  %v8345_v45 = vld [vmem:[#allocation8 + $0x6d4] sm:$0xf0] }
 0x7da   :  { %3061 = vmatpush.bf16.msrb.mxu1 %v7146_v2  ;;  %v7079_v2 = vld [vmem:[#allocation8 + $0x668] sm:$0xf0] }
 0x7de   :  { %3062 = vmatpush.bf16.msrb.mxu1 %v7138_v6  ;;  %v8323_v6 = vld [vmem:[#allocation8 + $0x624] sm:$0xf0] }
 0x828   :  { %v2485_v9 = vpop.f32.mrf.mxu1 }
 0x82e   :  { %v2466_v4 = vpop.f32.mrf.mxu0  ;;  %v2447_v19 = vpop.f32.mrf.mxu3 }
 0x82f   :  { %v2467_v28 = vadd.f32 %v2466_v4, %v2256_v12 }
 0x830   :  { %v2487_v23 = vpop.f32.mrf.mxu1 }
 0x831   :  { %v2486_v25 = vadd.f32 %v2485_v9, %v2467_v28 }
 0x833   :  { %v2496_v49 = vmax.f32 %v2486_v25, 0.0 }
 0x834   :  { %v2428_v16 = vpop.f32.mrf.mxu2 }
 0x835   :  { %v2429_v7 = vadd.f32 %v2428_v16, %v2255_v30 }
 0x836   :  { %v2468_v3 = vpop.f32.mrf.mxu0  ;;  %v2449_v48 = vpop.f32.mrf.mxu3 }
 0x837   :  { %v2469_v27 = vadd.f32 %v2468_v3, %v2256_v12  ;;  %v2448_v20 = vadd.f32 %v2447_v19, %v2429_v7 }
 0x838   :  { %v2490_v51 = vpop.f32.mrf.mxu1 }
 0x839   :  { %v2488_v17 = vadd.f32 %v2487_v23, %v2469_v27  ;;  %v2495_v55 = vmax.f32 %v2448_v20, 0.0  ;;  %v7133_v27 = vld [vmem:[#allocation8 + $0x6d0] sm:$0xf]  ;;  %v7127_v20 = vld [vmem:[#allocation8 + $0x6c8] sm:$0xf0] }
 0x83a   :  { %v7134_v13 = vor.u32 %v8345_v45, %v7133_v27  ;;  %v7101_v27 = vld [vmem:[#allocation8 + $0x690] sm:$0xf]  ;;  %v8337_v45 = vld [vmem:[#allocation8 + $0x694] sm:$0xf0] }
 0x83b   :  { %v2498_v57 = vmax.f32 %v2488_v17, 0.0  ;;  %v8330_v17 = vld [vmem:[#allocation8 + $0x664] sm:$0xf] }
 0x83c   :  { %v2430_v39 = vpop.f32.mrf.mxu2  ;;  %3024 = vmatpush.bf16.msra.mxu3 %v7134_v13  ;;  %v7082_v22 = vor.u32 %v8330_v17, %v7079_v2  ;;  %v7102_v13 = vor.u32 %v8337_v45, %v7101_v27  ;;  %v7047_v2 = vld [vmem:[#allocation8 + $0x628] sm:$0xf0]  ;;  %v7269_v27 = vld [vmem:[#allocation8 + $0x7e0] sm:$0xf]  ;;  %v8379_v45 = vld [vmem:[#allocation8 + $0x7e4] sm:$0xf0] }
 0x83d   :  { %v2537_v26 = vpack.c.bf16 %v2498_v57, %v2496_v49  ;;  %v2431_v50 = vadd.f32 %v2430_v39, %v2255_v30  ;;  %v8343_v49 = vld [vmem:[#allocation8 + $0x6c4] sm:$0xf0]  ;;  %v8342_v57 = vld [vmem:[#allocation8 + $0x6c4] sm:$0xf] }
 0x83e   :  { %v2471_v52 = vpop.f32.mrf.mxu0  ;;  %v2452_v59 = vpop.f32.mrf.mxu3 }
 0x83f   :  { %v2450_v54 = vadd.f32 %v2449_v48, %v2431_v50  ;;  %2734 = vmatmul.bf16.vlgmr.msrb.gmra.mxu3 %v2537_v26  ;;  %2772 = vmatmul.bf16.vlgmr.msra.gmra.mxu1 %v2537_v26  ;;  %v2472_v56 = vadd.f32 %v2471_v52, %v2256_v12  ;;  %v7125_v48 = vld [vmem:[#allocation8 + $0x6c0] sm:$0xf]  ;;  %v7130_v26 = vor.u32 %v8342_v57, %v7127_v20  ;;  %v7069_v50 = vld [vmem:[#allocation8 + $0x650] sm:$0xf]  ;;  %v8334_v57 = vld [vmem:[#allocation8 + $0x684] sm:$0xf] }
 0x840   :  { %v2492_v9 = vpop.f32.mrf.mxu1  ;;  %v7126_v39 = vor.u32 %v8343_v49, %v7125_v48  ;;  %v7093_v48 = vld [vmem:[#allocation8 + $0x680] sm:$0xf]  ;;  %v8335_v49 = vld [vmem:[#allocation8 + $0x684] sm:$0xf0]  ;;  %v7095_v20 = vld [vmem:[#allocation8 + $0x688] sm:$0xf0] }
 0x841   :  { %v2497_v53 = vmax.f32 %v2450_v54, 0.0  ;;  %v2491_v8 = vadd.f32 %v2490_v51, %v2472_v56  ;;  %v8329_v51 = vld [vmem:[#allocation8 + $0x654] sm:$0xf0]  ;;  %v8328_v54 = vld [vmem:[#allocation8 + $0x654] sm:$0xf]  ;;  %3063 = vmatpush.bf16.msrb.mxu1 %v7130_v26  ;;  %v7098_v26 = vor.u32 %v8334_v57, %v7095_v20 }
 0x842   :  { %3025 = vmatpush.bf16.msra.mxu3 %v7126_v39  ;;  %v7070_v52 = vor.u32 %v8329_v51, %v7069_v50  ;;  %v8341_v56 = vld [vmem:[#allocation8 + $0x6b4] sm:$0xf0]  ;;  %v7094_v39 = vor.u32 %v8335_v49, %v7093_v48  ;;  %v7037_v50 = vld [vmem:[#allocation8 + $0x610] sm:$0xf]  ;;  %v8364_v48 = vld [vmem:[#allocation8 + $0x774] sm:$0xf] }
 0x843   :  { %v2536_v14 = vpack.c.bf16 %v2497_v53, %v2495_v55  ;;  %v2500_v19 = vmax.f32 %v2491_v8, 0.0  ;;  %v7071_v55 = vld [vmem:[#allocation8 + $0x658] sm:$0xf0]  ;;  %v8321_v51 = vld [vmem:[#allocation8 + $0x614] sm:$0xf0] }
 0x844   :  { %v2433_v62 = vpop.f32.mrf.mxu2  ;;  %v7074_v53 = vor.u32 %v8328_v54, %v7071_v55  ;;  %v7038_v54 = vor.u32 %v8321_v51, %v7037_v50  ;;  %v7039_v55 = vld [vmem:[#allocation8 + $0x618] sm:$0xf0] }
 0x845   :  { %2715 = vmatmul.bf16.vlgmr.msrb.gmra.mxu2 %v2536_v14  ;;  %2753 = vmatmul.bf16.vlgmr.msra.gmra.mxu0 %v2536_v14  ;;  %v2434_v1 = vadd.f32 %v2433_v62, %v2255_v30  ;;  %v7117_v14 = vld [vmem:[#allocation8 + $0x6b0] sm:$0xf]  ;;  %v7215_v49 = vld [vmem:[#allocation8 + $0x778] sm:$0xf0] }
 0x846   :  { %v2473_v63 = vpop.f32.mrf.mxu0  ;;  %v2454_v32 = vpop.f32.mrf.mxu3  ;;  %v7118_v62 = vor.u32 %v8341_v56, %v7117_v14  ;;  %v7029_v14 = vld [vmem:[#allocation8 + $0x600] sm:$0xf]  ;;  %v8319_v56 = vld [vmem:[#allocation8 + $0x604] sm:$0xf0] }
 0x847   :  { %v2474_v18 = vadd.f32 %v2473_v63, %v2256_v12  ;;  %v2453_v16 = vadd.f32 %v2452_v59, %v2434_v1  ;;  %v7087_v12 = vld [vmem:[#allocation8 + $0x678] sm:$0xf0]  ;;  %v8340_v59 = vld [vmem:[#allocation8 + $0x6b4] sm:$0xf]  ;;  %v8326_v1 = vld [vmem:[#allocation8 + $0x644] sm:$0xf] }
 0x848   :  { %v7090_v25 = vor.u32 %v8332_v42, %v7087_v12  ;;  %v7119_v63 = vld [vmem:[#allocation8 + $0x6b8] sm:$0xf0]  ;;  %3026 = vmatpush.bf16.msra.mxu3 %v7118_v62  ;;  %v7030_v62 = vor.u32 %v8319_v56, %v7029_v14 }
 0x849   :  { %v2493_v4 = vadd.f32 %v2492_v9, %v2474_v18  ;;  %v2499_v36 = vmax.f32 %v2453_v16, 0.0  ;;  %v7122_v8 = vor.u32 %v8340_v59, %v7119_v63  ;;  %v7061_v18 = vld [vmem:[#allocation8 + $0x640] sm:$0xf]  ;;  %v8327_v9 = vld [vmem:[#allocation8 + $0x644] sm:$0xf0] }
 0x84a   :  { %3041 = vmatpush.bf16.msrb.mxu0 %v7090_v25  ;;  %v8339_v16 = vld [vmem:[#allocation8 + $0x6a4] sm:$0xf0]  ;;  %v7055_v12 = vld [vmem:[#allocation8 + $0x638] sm:$0xf0]  ;;  %v8318_v59 = vld [vmem:[#allocation8 + $0x604] sm:$0xf] }
 0x84b   :  { %v2502_v28 = vmax.f32 %v2493_v4, 0.0  ;;  %v7062_v4 = vor.u32 %v8327_v9, %v7061_v18  ;;  %3064 = vmatpush.bf16.msrb.mxu1 %v7122_v8  ;;  %v7031_v63 = vld [vmem:[#allocation8 + $0x608] sm:$0xf0]  ;;  %v2541_v9 = vld [vmem:[#allocation17 + $0x15] ss:$8 sm:$0x3] }
 0x84c   :  { %v2435_v23 = vpop.f32.mrf.mxu2  ;;  %v7034_v8 = vor.u32 %v8318_v59, %v7031_v63 }
 0x84d   :  { %v2436_v5 = vadd.f32 %v2435_v23, %v2255_v30  ;;  %v2539_v0 = vpack.c.bf16 %v2502_v28, %v2500_v19  ;;  %v7077_v30 = vld [vmem:[#allocation8 + $0x660] sm:$0xf]  ;;  %v7063_v19 = vld [vmem:[#allocation8 + $0x648] sm:$0xf0] }
 0x84e   :  { %v7078_v7 = vor.u32 %v8331_v43, %v7077_v30  ;;  %3042 = vmatpush.bf16.msrb.mxu0 %v7082_v22  ;;  %v7066_v28 = vor.u32 %v8326_v1, %v7063_v19  ;;  %v7109_v23 = vld [vmem:[#allocation8 + $0x6a0] sm:$0xf]  ;;  %v7106_v30 = vor.u32 %v8336_v47, %v7103_v21  ;;  %v2544_v1 = vperm.slane %v2541_v9, 1 }
 0x84f   :  { %v2455_v3 = vadd.f32 %v2454_v32, %v2436_v5  ;;  %2739 = vmatmul.bf16.gmra.mxu3 %v2539_v0  ;;  %2777 = vmatmul.bf16.gmra.mxu1 %v2539_v0  ;;  %v7110_v5 = vor.u32 %v8339_v16, %v7109_v23  ;;  %v8338_v0 = vld [vmem:[#allocation8 + $0x6a4] sm:$0xf]  ;;  %v7111_v32 = vld [vmem:[#allocation8 + $0x6a8] sm:$0xf0]  ;;  %v7045_v43 = vld [vmem:[#allocation8 + $0x620] sm:$0xf] }
 0x850   :  { %3004 = vmatpush.bf16.msra.mxu2 %v7078_v7  ;;  %v8322_v7 = vld [vmem:[#allocation8 + $0x624] sm:$0xf]  ;;  %v7046_v17 = vor.u32 %v8323_v6, %v7045_v43  ;;  %v9336_v23 = vperm.slane %v2541_v9, 0  ;;  %v7271_v43 = vld [vmem:[#allocation8 + $0x7e8] sm:$0xf0] }
 0x851   :  { %v2501_v40 = vmax.f32 %v2455_v3, 0.0  ;;  %v7114_v3 = vor.u32 %v8338_v0, %v7111_v32  ;;  %3027 = vmatpush.bf16.msra.mxu3 %v7110_v5  ;;  %v7050_v22 = vor.u32 %v8322_v7, %v7047_v2  ;;  %v7213_v6 = vld [vmem:[#allocation8 + $0x770] sm:$0xf]  ;;  %v7270_v2 = vor.u32 %v8379_v45, %v7269_v27  ;;  %v7207_v45 = vld [vmem:[#allocation8 + $0x768] sm:$0xf0] }
 0x852   :  { %3043 = vmatpush.bf16.msrb.mxu0 %v7074_v53 }
 0x853   :  { %v2538_v38 = vpack.c.bf16 %v2501_v40, %v2499_v36  ;;  %v7053_v36 = vld [vmem:[#allocation8 + $0x630] sm:$0xf]  ;;  %v8325_v40 = vld [vmem:[#allocation8 + $0x634] sm:$0xf0]  ;;  %3065 = vmatpush.bf16.msrb.mxu1 %v7114_v3 }
 0x854   :  { %3005 = vmatpush.bf16.msra.mxu2 %v7070_v52  ;;  %v7054_v42 = vor.u32 %v8325_v40, %v7053_v36  ;;  %v8320_v52 = vld [vmem:[#allocation8 + $0x614] sm:$0xf]  ;;  %v7277_v40 = vld [vmem:[#allocation8 + $0x7f0] sm:$0xf] }
 0x855   :  { %2720 = vmatmul.bf16.gmra.mxu2 %v2538_v38  ;;  %2758 = vmatmul.bf16.gmra.mxu0 %v2538_v38  ;;  %v8324_v38 = vld [vmem:[#allocation8 + $0x634] sm:$0xf]  ;;  %v7042_v53 = vor.u32 %v8320_v52, %v7039_v55 }
 0x856   :  { %3044 = vmatpush.bf16.msrb.mxu0 %v7066_v28  ;;  %v7058_v25 = vor.u32 %v8324_v38, %v7055_v12  ;;  %3028 = vmatpush.bf16.msra.mxu3 %v7102_v13  ;;  %v8381_v38 = vld [vmem:[#allocation8 + $0x7f4] sm:$0xf0] }
 0x857   :  { %3066 = vmatpush.bf16.msrb.mxu1 %v7106_v30  ;;  %v7278_v12 = vor.u32 %v8381_v38, %v7277_v40  ;;  %v8378_v30 = vld [vmem:[#allocation8 + $0x7e4] sm:$0xf]  ;;  %v8376_v40 = vld [vmem:[#allocation8 + $0x7d4] sm:$0xf] }
 0x858   :  { %3006 = vmatpush.bf16.msra.mxu2 %v7062_v4  ;;  %v7274_v29 = vor.u32 %v8378_v30, %v7271_v43 }
 0x85a   :  { %3045 = vmatpush.bf16.msrb.mxu0 %v7058_v25  ;;  %3029 = vmatpush.bf16.msra.mxu3 %v7094_v39  ;;  %v7279_v25 = vld [vmem:[#allocation8 + $0x7f8] sm:$0xf0]  ;;  %v7218_v39 = vor.u32 %v8364_v48, %v7215_v49  ;;  %v8360_v49 = vld [vmem:[#allocation8 + $0x754] sm:$0xf] }
 0x85b   :  { %3067 = vmatpush.bf16.msrb.mxu1 %v7098_v26 }
 0x85c   :  { %3007 = vmatpush.bf16.msra.mxu2 %v7054_v42  ;;  %v8380_v42 = vld [vmem:[#allocation8 + $0x7f4] sm:$0xf] }
 0x85d   :  { %v7282_v21 = vor.u32 %v8380_v42, %v7279_v25  ;;  %v7205_v42 = vld [vmem:[#allocation8 + $0x760] sm:$0xf]  ;;  %v8362_v25 = vld [vmem:[#allocation8 + $0x764] sm:$0xf] }
 0x85e   :  { %3046 = vmatpush.bf16.msrb.mxu0 %v7050_v22  ;;  %3310 = vmatpush.bf16.msrb.mxu3 %v7278_v12  ;;  %v8365_v22 = vld [vmem:[#allocation8 + $0x774] sm:$0xf0]  ;;  %v8363_v12 = vld [vmem:[#allocation8 + $0x764] sm:$0xf0]  ;;  %v7210_v30 = vor.u32 %v8362_v25, %v7207_v45  ;;  %v8354_v25 = vld [vmem:[#allocation8 + $0x724] sm:$0xf] }
 0x85f   :  { %3348 = vmatpush.bf16.msra.mxu1 %v7282_v21  ;;  %v7206_v27 = vor.u32 %v8363_v12, %v7205_v42  ;;  %v8375_v21 = vld [vmem:[#allocation8 + $0x7c4] sm:$0xf0]  ;;  %v7173_v42 = vld [vmem:[#allocation8 + $0x720] sm:$0xf]  ;;  %v7175_v45 = vld [vmem:[#allocation8 + $0x728] sm:$0xf0] }
 0x860   :  { %3008 = vmatpush.bf16.msra.mxu2 %v7046_v17  ;;  %v8355_v12 = vld [vmem:[#allocation8 + $0x724] sm:$0xf0] }
 0x862   :  { %3047 = vmatpush.bf16.msrb.mxu0 %v7042_v53  ;;  %3311 = vmatpush.bf16.msrb.mxu3 %v7270_v2 }
 0x863   :  { %3349 = vmatpush.bf16.msra.mxu1 %v7274_v29  ;;  %v7199_v29 = vld [vmem:[#allocation8 + $0x758] sm:$0xf0] }
 0x864   :  { %3009 = vmatpush.bf16.msra.mxu2 %v7038_v54 }
 0x866   :  { %3048 = vmatpush.bf16.msrb.mxu0 %v7034_v8 }
 0x868   :  { %3010 = vmatpush.bf16.msra.mxu2 %v7030_v62 }
 0x86a   :  { %3329 = vmatpush.bf16.msra.mxu0 %v7218_v39  ;;  %v7245_v39 = vld [vmem:[#allocation8 + $0x7b0] sm:$0xf] }
 0x86e   :  { %3330 = vmatpush.bf16.msra.mxu0 %v7210_v30  ;;  %v8367_v30 = vld [vmem:[#allocation8 + $0x784] sm:$0xf0] }
 0x8bc   :  { %v2773_v18 = vpop.f32.mrf.mxu1 }
 0x8c2   :  { %v2754_v4 = vpop.f32.mrf.mxu0  ;;  %v2735_v19 = vpop.f32.mrf.mxu3 }
 0x8c3   :  { %v2755_v28 = vadd.f32 %v2754_v4, %v2544_v1 }
 0x8c4   :  { %v2775_v16 = vpop.f32.mrf.mxu1 }
 0x8c5   :  { %v2774_v0 = vadd.f32 %v2773_v18, %v2755_v28 }
 0x8c7   :  { %v9341_v47 = vadd.f32 %v2774_v0, %v2208_v60  ;;  %v7214_v60 = vor.u32 %v8365_v22, %v7213_v6  ;;  %v8374_v6 = vld [vmem:[#allocation8 + $0x7c4] sm:$0xf]  ;;  %v8361_v22 = vld [vmem:[#allocation8 + $0x754] sm:$0xf0] }
 0x8c8   :  { %v2716_v5 = vpop.f32.mrf.mxu2 }
 0x8c9   :  { %v2717_v32 = vadd.f32 %v2716_v5, %v9336_v23  ;;  %v2792_v26 = vmax.f32 %v9341_v47, 0.0  ;;  %3291 = vmatpush.bf16.msrb.mxu2 %v7214_v60  ;;  %v7202_v60 = vor.u32 %v8360_v49, %v7199_v29  ;;  %v7167_v29 = vld [vmem:[#allocation8 + $0x718] sm:$0xf0] }
 0x8ca   :  { %v2756_v3 = vpop.f32.mrf.mxu0  ;;  %v2737_v17 = vpop.f32.mrf.mxu3 }
 0x8cb   :  { %v2757_v36 = vadd.f32 %v2756_v3, %v2544_v1  ;;  %v2736_v7 = vadd.f32 %v2735_v19, %v2717_v32  ;;  %3331 = vmatpush.bf16.msra.mxu0 %v7202_v60 }
 0x8cc   :  { %v2778_v52 = vpop.f32.mrf.mxu1 }
 0x8cd   :  { %v2776_v13 = vadd.f32 %v2775_v16, %v2757_v36  ;;  %v9352_v41 = vadd.f32 %v2736_v7, %v2207_v11  ;;  %v8377_v36 = vld [vmem:[#allocation8 + $0x7d4] sm:$0xf0]  ;;  %v7255_v7 = vld [vmem:[#allocation8 + $0x7c8] sm:$0xf0]  ;;  %3292 = vmatpush.bf16.msrb.mxu2 %v7206_v27  ;;  %v7174_v27 = vor.u32 %v8355_v12, %v7173_v42 }
 0x8ce   :  { %v7258_v2 = vor.u32 %v8374_v6, %v7255_v7  ;;  %v7223_v7 = vld [vmem:[#allocation8 + $0x788] sm:$0xf0]  ;;  %v8397_v42 = vld [vmem:[#allocation8 + $0x874] sm:$0xf0] }
 0x8cf   :  { %v9345_v57 = vadd.f32 %v2776_v13, %v2210_v61  ;;  %v2791_v56 = vmax.f32 %v9352_v41, 0.0  ;;  %v7253_v13 = vld [vmem:[#allocation8 + $0x7c0] sm:$0xf] }
 0x8d0   :  { %v2718_v20 = vpop.f32.mrf.mxu2  ;;  %v7254_v43 = vor.u32 %v8375_v21, %v7253_v13  ;;  %v7178_v13 = vor.u32 %v8354_v25, %v7175_v45  ;;  %v7221_v21 = vld [vmem:[#allocation8 + $0x780] sm:$0xf] }
 0x8d1   :  { %v2794_v50 = vmax.f32 %v9345_v57, 0.0  ;;  %v2719_v51 = vadd.f32 %v2718_v20, %v9336_v23  ;;  %v8373_v20 = vld [vmem:[#allocation8 + $0x7b4] sm:$0xf0]  ;;  %v7222_v6 = vor.u32 %v8367_v30, %v7221_v21 }
 0x8d2   :  { %v2759_v54 = vpop.f32.mrf.mxu0  ;;  %v2740_v11 = vpop.f32.mrf.mxu3 }
 0x8d3   :  { %v2833_v61 = vpack.c.bf16 %v2794_v50, %v2792_v26  ;;  %v2738_v55 = vadd.f32 %v2737_v17, %v2719_v51  ;;  %v2760_v14 = vadd.f32 %v2759_v54, %v2544_v1  ;;  %v7197_v17 = vld [vmem:[#allocation8 + $0x750] sm:$0xf]  ;;  %v7246_v51 = vor.u32 %v8373_v20, %v7245_v39  ;;  %v7247_v54 = vld [vmem:[#allocation8 + $0x7b8] sm:$0xf0]  ;;  %v7157_v39 = vld [vmem:[#allocation8 + $0x700] sm:$0xf] }
 0x8d4   :  { %v2780_v18 = vpop.f32.mrf.mxu1  ;;  %v7198_v48 = vor.u32 %v8361_v22, %v7197_v17  ;;  %v8353_v22 = vld [vmem:[#allocation8 + $0x714] sm:$0xf0]  ;;  %v8351_v20 = vld [vmem:[#allocation8 + $0x704] sm:$0xf0] }
 0x8d5   :  { %v9360_v53 = vadd.f32 %v2738_v55, %v2209_v58  ;;  %3030 = vmatmul.bf16.vlgmr.msra.gmra.mxu3 %v2833_v61  ;;  %3068 = vmatmul.bf16.vlgmr.msrb.gmra.mxu1 %v2833_v61  ;;  %v2779_v63 = vadd.f32 %v2778_v52, %v2760_v14  ;;  %v8372_v52 = vld [vmem:[#allocation8 + $0x7b4] sm:$0xf]  ;;  %v7189_v55 = vld [vmem:[#allocation8 + $0x740] sm:$0xf]  ;;  %v8359_v14 = vld [vmem:[#allocation8 + $0x744] sm:$0xf0] }
 0x8d6   :  { %3293 = vmatpush.bf16.msrb.mxu2 %v7198_v48  ;;  %v7250_v61 = vor.u32 %v8372_v52, %v7247_v54  ;;  %v8352_v48 = vld [vmem:[#allocation8 + $0x714] sm:$0xf]  ;;  %v7158_v52 = vor.u32 %v8351_v20, %v7157_v39  ;;  %v7159_v54 = vld [vmem:[#allocation8 + $0x708] sm:$0xf0] }
 0x8d7   :  { %v2793_v10 = vmax.f32 %v9360_v53, 0.0  ;;  %v9371_v9 = vadd.f32 %v2779_v63, %v2212_v35  ;;  %v7170_v60 = vor.u32 %v8352_v48, %v7167_v29 }
 0x8d8   :  { %v2721_v59 = vpop.f32.mrf.mxu2 }
 0x8d9   :  { %v2832_v62 = vpack.c.bf16 %v2793_v10, %v2791_v56  ;;  %v2722_v15 = vadd.f32 %v2721_v59, %v9336_v23  ;;  %v2796_v5 = vmax.f32 %v9371_v9, 0.0  ;;  %v7190_v59 = vor.u32 %v8359_v14, %v7189_v55  ;;  %v2837_v14 = vld [vmem:[#allocation17 + $0x16] ss:$8 sm:$0x3] }
 0x8da   :  { %v2761_v8 = vpop.f32.mrf.mxu0  ;;  %v2742_v32 = vpop.f32.mrf.mxu3 }
 0x8db   :  { %v2762_v58 = vadd.f32 %v2761_v8, %v2544_v1  ;;  %3011 = vmatmul.bf16.vlgmr.msra.gmra.mxu2 %v2832_v62  ;;  %3049 = vmatmul.bf16.vlgmr.msrb.gmra.mxu0 %v2832_v62  ;;  %v2741_v19 = vadd.f32 %v2740_v11, %v2722_v15  ;;  %v8358_v11 = vld [vmem:[#allocation8 + $0x744] sm:$0xf]  ;;  %v7191_v62 = vld [vmem:[#allocation8 + $0x748] sm:$0xf0]  ;;  %v7237_v8 = vld [vmem:[#allocation8 + $0x7a0] sm:$0xf] }
 0x8dc   :  { %v7194_v63 = vor.u32 %v8358_v11, %v7191_v62  ;;  %v8371_v15 = vld [vmem:[#allocation8 + $0x7a4] sm:$0xf0]  ;;  %3294 = vmatpush.bf16.msrb.mxu2 %v7190_v59  ;;  %v2840_v59 = vperm.slane %v2837_v14, 1 }
 0x8dd   :  { %v2781_v4 = vadd.f32 %v2780_v18, %v2762_v58  ;;  %v9382_v3 = vadd.f32 %v2741_v19, %v2211_v37  ;;  %v7261_v37 = vld [vmem:[#allocation8 + $0x7d0] sm:$0xf]  ;;  %v8370_v58 = vld [vmem:[#allocation8 + $0x7a4] sm:$0xf]  ;;  %v7238_v18 = vor.u32 %v8371_v15, %v7237_v8  ;;  %v2839_v15 = vperm.slane %v2837_v14, 0 }
 0x8de   :  { %v7262_v38 = vor.u32 %v8377_v36, %v7261_v37  ;;  %3332 = vmatpush.bf16.msra.mxu0 %v7194_v63  ;;  %v7229_v37 = vld [vmem:[#allocation8 + $0x790] sm:$0xf]  ;;  %v8369_v36 = vld [vmem:[#allocation8 + $0x794] sm:$0xf0] }
 0x8df   :  { %v9375_v28 = vadd.f32 %v2781_v4, %v2214_v31  ;;  %v2795_v31 = vmax.f32 %v9382_v3, 0.0  ;;  %v7239_v4 = vld [vmem:[#allocation8 + $0x7a8] sm:$0xf0] }
 0x8e0   :  { %v2723_v16 = vpop.f32.mrf.mxu2  ;;  %3312 = vmatpush.bf16.msrb.mxu3 %v7262_v38  ;;  %v7242_v19 = vor.u32 %v8370_v58, %v7239_v4  ;;  %v7230_v38 = vor.u32 %v8369_v36, %v7229_v37  ;;  %v8413_v4 = vld [vmem:[#allocation8 + $0x8f4] sm:$0xf0] }
 0x8e1   :  { %v2724_v0 = vadd.f32 %v2723_v16, %v9336_v23  ;;  %v2798_v1 = vmax.f32 %v9375_v28, 0.0  ;;  %v7181_v16 = vld [vmem:[#allocation8 + $0x730] sm:$0xf] }
 0x8e3   :  { %v2743_v24 = vadd.f32 %v2742_v32, %v2724_v0  ;;  %v2835_v33 = vpack.c.bf16 %v2798_v1, %v2796_v5  ;;  %v8357_v0 = vld [vmem:[#allocation8 + $0x734] sm:$0xf0]  ;;  %v8356_v32 = vld [vmem:[#allocation8 + $0x734] sm:$0xf] }
 0x8e4   :  { %3313 = vmatpush.bf16.msrb.mxu3 %v7254_v43  ;;  %v8366_v43 = vld [vmem:[#allocation8 + $0x784] sm:$0xf] }
 0x8e5   :  { %v9390_v35 = vadd.f32 %v2743_v24, %v2213_v34  ;;  %3035 = vmatmul.bf16.gmra.mxu3 %v2835_v33  ;;  %3073 = vmatmul.bf16.gmra.mxu1 %v2835_v33  ;;  %v7266_v34 = vor.u32 %v8376_v40, %v7263_v46  ;;  %v7182_v24 = vor.u32 %v8357_v0, %v7181_v16  ;;  %v7183_v33 = vld [vmem:[#allocation8 + $0x738] sm:$0xf0]  ;;  %v8368_v40 = vld [vmem:[#allocation8 + $0x794] sm:$0xf] }
 0x8e6   :  { %v7231_v46 = vld [vmem:[#allocation8 + $0x798] sm:$0xf0]  ;;  %v7226_v17 = vor.u32 %v8366_v43, %v7223_v7 }
 0x8e7   :  { %v2797_v23 = vmax.f32 %v9390_v35, 0.0  ;;  %3350 = vmatpush.bf16.msra.mxu1 %v7266_v34  ;;  %3295 = vmatpush.bf16.msrb.mxu2 %v7182_v24  ;;  %v7234_v34 = vor.u32 %v8368_v40, %v7231_v46  ;;  %v7397_v24 = vld [vmem:[#allocation8 + $0x8e0] sm:$0xf]  ;;  %v8410_v40 = vld [vmem:[#allocation8 + $0x8e4] sm:$0xf] }
 0x8e8   :  { %3314 = vmatpush.bf16.msrb.mxu3 %v7246_v51  ;;  %v8350_v51 = vld [vmem:[#allocation8 + $0x704] sm:$0xf]  ;;  %v7341_v46 = vld [vmem:[#allocation8 + $0x870] sm:$0xf]  ;;  %v7519_v35 = vld [vmem:[#allocation8 + $0x9d8] sm:$0xf0] }
 0x8e9   :  { %v2834_v44 = vpack.c.bf16 %v2797_v23, %v2795_v31  ;;  %v7342_v45 = vor.u32 %v8397_v42, %v7341_v46  ;;  %v7391_v46 = vld [vmem:[#allocation8 + $0x8d8] sm:$0xf0] }
 0x8eb   :  { %3016 = vmatmul.bf16.gmra.mxu2 %v2834_v44  ;;  %3054 = vmatmul.bf16.gmra.mxu0 %v2834_v44  ;;  %v7186_v44 = vor.u32 %v8356_v32, %v7183_v33  ;;  %v7407_v32 = vld [vmem:[#allocation8 + $0x8f8] sm:$0xf0]  ;;  %v8411_v33 = vld [vmem:[#allocation8 + $0x8e4] sm:$0xf0] }
 0x8ec   :  { %3351 = vmatpush.bf16.msra.mxu1 %v7258_v2  ;;  %3315 = vmatpush.bf16.msrb.mxu3 %v7238_v18  ;;  %v7165_v2 = vld [vmem:[#allocation8 + $0x710] sm:$0xf] }
 0x8ed   :  { %3333 = vmatpush.bf16.msra.mxu0 %v7186_v44  ;;  %3296 = vmatpush.bf16.msrb.mxu2 %v7174_v27  ;;  %v7166_v49 = vor.u32 %v8353_v22, %v7165_v2  ;;  %v7405_v18 = vld [vmem:[#allocation8 + $0x8f0] sm:$0xf] }
 0x8ee   :  { %v7406_v0 = vor.u32 %v8413_v4, %v7405_v18 }
 0x8f0   :  { %3352 = vmatpush.bf16.msra.mxu1 %v7250_v61  ;;  %3316 = vmatpush.bf16.msrb.mxu3 %v7230_v38  ;;  %v7162_v61 = vor.u32 %v8350_v51, %v7159_v54  ;;  %v7399_v38 = vld [vmem:[#allocation8 + $0x8e8] sm:$0xf0] }
 0x8f1   :  { %3334 = vmatpush.bf16.msra.mxu0 %v7178_v13  ;;  %3297 = vmatpush.bf16.msrb.mxu2 %v7166_v49  ;;  %v7402_v27 = vor.u32 %v8410_v40, %v7399_v38  ;;  %v8408_v40 = vld [vmem:[#allocation8 + $0x8d4] sm:$0xf] }
 0x8f2   :  { %v7394_v42 = vor.u32 %v8408_v40, %v7391_v46  ;;  %v8400_v40 = vld [vmem:[#allocation8 + $0x894] sm:$0xf]  ;;  %v7359_v46 = vld [vmem:[#allocation8 + $0x898] sm:$0xf0] }
 0x8f4   :  { %3353 = vmatpush.bf16.msra.mxu1 %v7242_v19  ;;  %3317 = vmatpush.bf16.msrb.mxu3 %v7222_v6  ;;  %v8412_v19 = vld [vmem:[#allocation8 + $0x8f4] sm:$0xf] }
 0x8f5   :  { %3335 = vmatpush.bf16.msra.mxu0 %v7170_v60  ;;  %3298 = vmatpush.bf16.msrb.mxu2 %v7158_v52  ;;  %v7410_v36 = vor.u32 %v8412_v19, %v7407_v32 }
 0x8f8   :  { %3354 = vmatpush.bf16.msra.mxu1 %v7234_v34  ;;  %3606 = vmatpush.bf16.msra.mxu3 %v7406_v0  ;;  %v7398_v34 = vor.u32 %v8411_v33, %v7397_v24  ;;  %v8396_v33 = vld [vmem:[#allocation8 + $0x874] sm:$0xf] }
 0x8f9   :  { %3336 = vmatpush.bf16.msra.mxu0 %v7162_v61  ;;  %3587 = vmatpush.bf16.msra.mxu2 %v7342_v45 }
 0x8fc   :  { %3355 = vmatpush.bf16.msra.mxu1 %v7226_v17  ;;  %3607 = vmatpush.bf16.msra.mxu3 %v7398_v34  ;;  %v8395_v34 = vld [vmem:[#allocation8 + $0x864] sm:$0xf0] }
 0x900   :  { %3644 = vmatpush.bf16.msrb.mxu1 %v7410_v36  ;;  %v8409_v36 = vld [vmem:[#allocation8 + $0x8d4] sm:$0xf0] }
 0x904   :  { %3645 = vmatpush.bf16.msrb.mxu1 %v7402_v27  ;;  %v7335_v27 = vld [vmem:[#allocation8 + $0x868] sm:$0xf0] }
 0x908   :  { %3646 = vmatpush.bf16.msrb.mxu1 %v7394_v42  ;;  %v8387_v42 = vld [vmem:[#allocation8 + $0x824] sm:$0xf0] }
 0x952   :  { %v3069_v55 = vpop.f32.mrf.mxu1 }
 0x958   :  { %v3050_v11 = vpop.f32.mrf.mxu0  ;;  %v3031_v62 = vpop.f32.mrf.mxu3 }
 0x959   :  { %v3051_v63 = vadd.f32 %v3050_v11, %v2840_v59 }
 0x95a   :  { %v3071_v8 = vpop.f32.mrf.mxu1 }
 0x95b   :  { %v3070_v44 = vadd.f32 %v3069_v55, %v3051_v63 }
 0x95d   :  { %v3080_v21 = vmax.f32 %v3070_v44, 0.0 }
 0x95e   :  { %v3012_v58 = vpop.f32.mrf.mxu2 }
 0x95f   :  { %v3013_v12 = vadd.f32 %v3012_v58, %v2839_v15 }
 0x960   :  { %v3052_v16 = vpop.f32.mrf.mxu0  ;;  %v3033_v13 = vpop.f32.mrf.mxu3 }
 0x961   :  { %v3053_v37 = vadd.f32 %v3052_v16, %v2840_v59  ;;  %v3032_v6 = vadd.f32 %v3031_v62, %v3013_v12 }
 0x962   :  { %v3074_v2 = vpop.f32.mrf.mxu1 }
 0x963   :  { %v3072_v25 = vadd.f32 %v3071_v8, %v3053_v37  ;;  %v3079_v49 = vmax.f32 %v3032_v6, 0.0  ;;  %v7389_v37 = vld [vmem:[#allocation8 + $0x8d0] sm:$0xf]  ;;  %v7383_v6 = vld [vmem:[#allocation8 + $0x8c8] sm:$0xf0] }
 0x964   :  { %v7390_v38 = vor.u32 %v8409_v36, %v7389_v37  ;;  %v7357_v37 = vld [vmem:[#allocation8 + $0x890] sm:$0xf]  ;;  %v8401_v36 = vld [vmem:[#allocation8 + $0x894] sm:$0xf0] }
 0x965   :  { %v3082_v30 = vmax.f32 %v3072_v25, 0.0  ;;  %v8394_v25 = vld [vmem:[#allocation8 + $0x864] sm:$0xf] }
 0x966   :  { %v3014_v43 = vpop.f32.mrf.mxu2  ;;  %3608 = vmatpush.bf16.msra.mxu3 %v7390_v38  ;;  %v7338_v45 = vor.u32 %v8394_v25, %v7335_v27  ;;  %v7358_v38 = vor.u32 %v8401_v36, %v7357_v37  ;;  %v7303_v27 = vld [vmem:[#allocation8 + $0x828] sm:$0xf0]  ;;  %v7525_v37 = vld [vmem:[#allocation8 + $0x9e0] sm:$0xf]  ;;  %v8443_v36 = vld [vmem:[#allocation8 + $0x9e4] sm:$0xf0] }
 0x967   :  { %v3121_v7 = vpack.c.bf16 %v3082_v30, %v3080_v21  ;;  %v3015_v17 = vadd.f32 %v3014_v43, %v2839_v15  ;;  %v8407_v21 = vld [vmem:[#allocation8 + $0x8c4] sm:$0xf0]  ;;  %v8406_v30 = vld [vmem:[#allocation8 + $0x8c4] sm:$0xf] }
 0x968   :  { %v3055_v22 = vpop.f32.mrf.mxu0  ;;  %v3036_v20 = vpop.f32.mrf.mxu3 }
 0x969   :  { %v3034_v48 = vadd.f32 %v3033_v13, %v3015_v17  ;;  %3318 = vmatmul.bf16.vlgmr.msrb.gmra.mxu3 %v3121_v7  ;;  %3356 = vmatmul.bf16.vlgmr.msra.gmra.mxu1 %v3121_v7  ;;  %v3056_v39 = vadd.f32 %v3055_v22, %v2840_v59  ;;  %v7381_v13 = vld [vmem:[#allocation8 + $0x8c0] sm:$0xf]  ;;  %v7386_v7 = vor.u32 %v8406_v30, %v7383_v6  ;;  %v7325_v17 = vld [vmem:[#allocation8 + $0x850] sm:$0xf]  ;;  %v8398_v30 = vld [vmem:[#allocation8 + $0x884] sm:$0xf] }
 0x96a   :  { %v3076_v55 = vpop.f32.mrf.mxu1  ;;  %v7382_v43 = vor.u32 %v8407_v21, %v7381_v13  ;;  %v7349_v13 = vld [vmem:[#allocation8 + $0x880] sm:$0xf]  ;;  %v8399_v21 = vld [vmem:[#allocation8 + $0x884] sm:$0xf0]  ;;  %v7351_v6 = vld [vmem:[#allocation8 + $0x888] sm:$0xf0] }
 0x96b   :  { %v3081_v29 = vmax.f32 %v3034_v48, 0.0  ;;  %v3075_v54 = vadd.f32 %v3074_v2, %v3056_v39  ;;  %v8393_v2 = vld [vmem:[#allocation8 + $0x854] sm:$0xf0]  ;;  %v8392_v48 = vld [vmem:[#allocation8 + $0x854] sm:$0xf]  ;;  %3647 = vmatpush.bf16.msrb.mxu1 %v7386_v7  ;;  %v7354_v7 = vor.u32 %v8398_v30, %v7351_v6 }
 0x96c   :  { %3609 = vmatpush.bf16.msra.mxu3 %v7382_v43  ;;  %v7326_v22 = vor.u32 %v8393_v2, %v7325_v17  ;;  %v8405_v39 = vld [vmem:[#allocation8 + $0x8b4] sm:$0xf0]  ;;  %v7350_v43 = vor.u32 %v8399_v21, %v7349_v13  ;;  %v7293_v17 = vld [vmem:[#allocation8 + $0x810] sm:$0xf]  ;;  %v8428_v13 = vld [vmem:[#allocation8 + $0x974] sm:$0xf] }
 0x96d   :  { %v3120_v60 = vpack.c.bf16 %v3081_v29, %v3079_v49  ;;  %v3084_v62 = vmax.f32 %v3075_v54, 0.0  ;;  %v7327_v49 = vld [vmem:[#allocation8 + $0x858] sm:$0xf0]  ;;  %v8385_v2 = vld [vmem:[#allocation8 + $0x814] sm:$0xf0] }
 0x96e   :  { %v3017_v51 = vpop.f32.mrf.mxu2  ;;  %v7330_v29 = vor.u32 %v8392_v48, %v7327_v49  ;;  %v7294_v48 = vor.u32 %v8385_v2, %v7293_v17  ;;  %v7295_v49 = vld [vmem:[#allocation8 + $0x818] sm:$0xf0] }
 0x96f   :  { %3299 = vmatmul.bf16.vlgmr.msrb.gmra.mxu2 %v3120_v60  ;;  %3337 = vmatmul.bf16.vlgmr.msra.gmra.mxu0 %v3120_v60  ;;  %v3018_v14 = vadd.f32 %v3017_v51, %v2839_v15  ;;  %v7373_v60 = vld [vmem:[#allocation8 + $0x8b0] sm:$0xf]  ;;  %v7471_v21 = vld [vmem:[#allocation8 + $0x978] sm:$0xf0] }
 0x970   :  { %v3057_v52 = vpop.f32.mrf.mxu0  ;;  %v3038_v19 = vpop.f32.mrf.mxu3  ;;  %v7374_v51 = vor.u32 %v8405_v39, %v7373_v60  ;;  %v7285_v60 = vld [vmem:[#allocation8 + $0x800] sm:$0xf]  ;;  %v8383_v39 = vld [vmem:[#allocation8 + $0x804] sm:$0xf0] }
 0x971   :  { %v3058_v61 = vadd.f32 %v3057_v52, %v2840_v59  ;;  %v3037_v58 = vadd.f32 %v3036_v20, %v3018_v14  ;;  %v7343_v59 = vld [vmem:[#allocation8 + $0x878] sm:$0xf0]  ;;  %v8404_v20 = vld [vmem:[#allocation8 + $0x8b4] sm:$0xf]  ;;  %v8390_v14 = vld [vmem:[#allocation8 + $0x844] sm:$0xf] }
 0x972   :  { %v7346_v44 = vor.u32 %v8396_v33, %v7343_v59  ;;  %v7375_v52 = vld [vmem:[#allocation8 + $0x8b8] sm:$0xf0]  ;;  %3610 = vmatpush.bf16.msra.mxu3 %v7374_v51  ;;  %v7286_v51 = vor.u32 %v8383_v39, %v7285_v60 }
 0x973   :  { %v3077_v11 = vadd.f32 %v3076_v55, %v3058_v61  ;;  %v3083_v0 = vmax.f32 %v3037_v58, 0.0  ;;  %v7378_v54 = vor.u32 %v8404_v20, %v7375_v52  ;;  %v7317_v61 = vld [vmem:[#allocation8 + $0x840] sm:$0xf]  ;;  %v8391_v55 = vld [vmem:[#allocation8 + $0x844] sm:$0xf0] }
 0x974   :  { %3625 = vmatpush.bf16.msrb.mxu0 %v7346_v44  ;;  %v8403_v58 = vld [vmem:[#allocation8 + $0x8a4] sm:$0xf0]  ;;  %v7311_v59 = vld [vmem:[#allocation8 + $0x838] sm:$0xf0]  ;;  %v8382_v20 = vld [vmem:[#allocation8 + $0x804] sm:$0xf] }
 0x975   :  { %v3086_v63 = vmax.f32 %v3077_v11, 0.0  ;;  %v7318_v11 = vor.u32 %v8391_v55, %v7317_v61  ;;  %3648 = vmatpush.bf16.msrb.mxu1 %v7378_v54  ;;  %v7287_v52 = vld [vmem:[#allocation8 + $0x808] sm:$0xf0]  ;;  %v3125_v55 = vld [vmem:[#allocation17 + $0x17] ss:$8 sm:$0x3] }
 0x976   :  { %v3019_v8 = vpop.f32.mrf.mxu2  ;;  %v7290_v54 = vor.u32 %v8382_v20, %v7287_v52 }
 0x977   :  { %v3020_v18 = vadd.f32 %v3019_v8, %v2839_v15  ;;  %v3123_v4 = vpack.c.bf16 %v3086_v63, %v3084_v62  ;;  %v7333_v15 = vld [vmem:[#allocation8 + $0x860] sm:$0xf]  ;;  %v7319_v62 = vld [vmem:[#allocation8 + $0x848] sm:$0xf0] }
 0x978   :  { %v7334_v12 = vor.u32 %v8395_v34, %v7333_v15  ;;  %3626 = vmatpush.bf16.msrb.mxu0 %v7338_v45  ;;  %v7322_v63 = vor.u32 %v8390_v14, %v7319_v62  ;;  %v7365_v8 = vld [vmem:[#allocation8 + $0x8a0] sm:$0xf]  ;;  %v7362_v15 = vor.u32 %v8400_v40, %v7359_v46  ;;  %v3128_v14 = vperm.slane %v3125_v55, 1 }
 0x979   :  { %v3039_v16 = vadd.f32 %v3038_v19, %v3020_v18  ;;  %3323 = vmatmul.bf16.gmra.mxu3 %v3123_v4  ;;  %3361 = vmatmul.bf16.gmra.mxu1 %v3123_v4  ;;  %v7366_v18 = vor.u32 %v8403_v58, %v7365_v8  ;;  %v8402_v4 = vld [vmem:[#allocation8 + $0x8a4] sm:$0xf]  ;;  %v7367_v19 = vld [vmem:[#allocation8 + $0x8a8] sm:$0xf0]  ;;  %v7301_v34 = vld [vmem:[#allocation8 + $0x820] sm:$0xf] }
 0x97a   :  { %3588 = vmatpush.bf16.msra.mxu2 %v7334_v12  ;;  %v8386_v12 = vld [vmem:[#allocation8 + $0x824] sm:$0xf]  ;;  %v7302_v25 = vor.u32 %v8387_v42, %v7301_v34  ;;  %v9398_v8 = vperm.slane %v3125_v55, 0  ;;  %v7527_v34 = vld [vmem:[#allocation8 + $0x9e8] sm:$0xf0] }
 0x97b   :  { %v3085_v32 = vmax.f32 %v3039_v16, 0.0  ;;  %v7370_v16 = vor.u32 %v8402_v4, %v7367_v19  ;;  %3611 = vmatpush.bf16.msra.mxu3 %v7366_v18  ;;  %v7306_v45 = vor.u32 %v8386_v12, %v7303_v27  ;;  %v7469_v42 = vld [vmem:[#allocation8 + $0x970] sm:$0xf]  ;;  %v7526_v27 = vor.u32 %v8443_v36, %v7525_v37  ;;  %v7463_v36 = vld [vmem:[#allocation8 + $0x968] sm:$0xf0] }
 0x97c   :  { %3627 = vmatpush.bf16.msrb.mxu0 %v7330_v29 }
 0x97d   :  { %v3122_v24 = vpack.c.bf16 %v3085_v32, %v3083_v0  ;;  %v7309_v0 = vld [vmem:[#allocation8 + $0x830] sm:$0xf]  ;;  %v8389_v32 = vld [vmem:[#allocation8 + $0x834] sm:$0xf0]  ;;  %3649 = vmatpush.bf16.msrb.mxu1 %v7370_v16 }
 0x97e   :  { %3589 = vmatpush.bf16.msra.mxu2 %v7326_v22  ;;  %v7310_v33 = vor.u32 %v8389_v32, %v7309_v0  ;;  %v8384_v22 = vld [vmem:[#allocation8 + $0x814] sm:$0xf]  ;;  %v7533_v32 = vld [vmem:[#allocation8 + $0x9f0] sm:$0xf] }
 0x97f   :  { %3304 = vmatmul.bf16.gmra.mxu2 %v3122_v24  ;;  %3342 = vmatmul.bf16.gmra.mxu0 %v3122_v24  ;;  %v8388_v24 = vld [vmem:[#allocation8 + $0x834] sm:$0xf]  ;;  %v7298_v29 = vor.u32 %v8384_v22, %v7295_v49 }
 0x980   :  { %3628 = vmatpush.bf16.msrb.mxu0 %v7322_v63  ;;  %v7314_v44 = vor.u32 %v8388_v24, %v7311_v59  ;;  %3612 = vmatpush.bf16.msra.mxu3 %v7358_v38  ;;  %v8445_v24 = vld [vmem:[#allocation8 + $0x9f4] sm:$0xf0] }
 0x981   :  { %3650 = vmatpush.bf16.msrb.mxu1 %v7362_v15  ;;  %v7534_v59 = vor.u32 %v8445_v24, %v7533_v32  ;;  %v8442_v15 = vld [vmem:[#allocation8 + $0x9e4] sm:$0xf]  ;;  %v8440_v32 = vld [vmem:[#allocation8 + $0x9d4] sm:$0xf] }
 0x982   :  { %3590 = vmatpush.bf16.msra.mxu2 %v7318_v11  ;;  %v7530_v47 = vor.u32 %v8442_v15, %v7527_v34 }
 0x984   :  { %3629 = vmatpush.bf16.msrb.mxu0 %v7314_v44  ;;  %3613 = vmatpush.bf16.msra.mxu3 %v7350_v43  ;;  %v7535_v44 = vld [vmem:[#allocation8 + $0x9f8] sm:$0xf0]  ;;  %v7474_v43 = vor.u32 %v8428_v13, %v7471_v21  ;;  %v8424_v21 = vld [vmem:[#allocation8 + $0x954] sm:$0xf] }
 0x985   :  { %3651 = vmatpush.bf16.msrb.mxu1 %v7354_v7 }
 0x986   :  { %3591 = vmatpush.bf16.msra.mxu2 %v7310_v33  ;;  %v8444_v33 = vld [vmem:[#allocation8 + $0x9f4] sm:$0xf] }
 0x987   :  { %v7538_v46 = vor.u32 %v8444_v33, %v7535_v44  ;;  %v7461_v33 = vld [vmem:[#allocation8 + $0x960] sm:$0xf]  ;;  %v8426_v44 = vld [vmem:[#allocation8 + $0x964] sm:$0xf] }
 0x988   :  { %3630 = vmatpush.bf16.msrb.mxu0 %v7306_v45  ;;  %3894 = vmatpush.bf16.msrb.mxu3 %v7534_v59  ;;  %v8429_v45 = vld [vmem:[#allocation8 + $0x974] sm:$0xf0]  ;;  %v8427_v59 = vld [vmem:[#allocation8 + $0x964] sm:$0xf0]  ;;  %v7466_v15 = vor.u32 %v8426_v44, %v7463_v36  ;;  %v8418_v44 = vld [vmem:[#allocation8 + $0x924] sm:$0xf] }
 0x989   :  { %3932 = vmatpush.bf16.msra.mxu1 %v7538_v46  ;;  %v7462_v37 = vor.u32 %v8427_v59, %v7461_v33  ;;  %v8439_v46 = vld [vmem:[#allocation8 + $0x9c4] sm:$0xf0]  ;;  %v7429_v33 = vld [vmem:[#allocation8 + $0x920] sm:$0xf]  ;;  %v7431_v36 = vld [vmem:[#allocation8 + $0x928] sm:$0xf0] }
 0x98a   :  { %3592 = vmatpush.bf16.msra.mxu2 %v7302_v25  ;;  %v8419_v59 = vld [vmem:[#allocation8 + $0x924] sm:$0xf0] }
 0x98c   :  { %3631 = vmatpush.bf16.msrb.mxu0 %v7298_v29  ;;  %3895 = vmatpush.bf16.msrb.mxu3 %v7526_v27 }
 0x98d   :  { %3933 = vmatpush.bf16.msra.mxu1 %v7530_v47  ;;  %v7455_v47 = vld [vmem:[#allocation8 + $0x958] sm:$0xf0] }
 0x98e   :  { %3593 = vmatpush.bf16.msra.mxu2 %v7294_v48 }
 0x990   :  { %3632 = vmatpush.bf16.msrb.mxu0 %v7290_v54 }
 0x992   :  { %3594 = vmatpush.bf16.msra.mxu2 %v7286_v51 }
 0x994   :  { %3913 = vmatpush.bf16.msra.mxu0 %v7474_v43  ;;  %v7501_v43 = vld [vmem:[#allocation8 + $0x9b0] sm:$0xf] }
 0x998   :  { %3914 = vmatpush.bf16.msra.mxu0 %v7466_v15  ;;  %v8431_v15 = vld [vmem:[#allocation8 + $0x984] sm:$0xf0] }
 0x9e6   :  { %v3357_v61 = vpop.f32.mrf.mxu1 }
 0x9ec   :  { %v3338_v11 = vpop.f32.mrf.mxu0  ;;  %v3319_v62 = vpop.f32.mrf.mxu3 }
 0x9ed   :  { %v3339_v63 = vadd.f32 %v3338_v11, %v3128_v14 }
 0x9ee   :  { %v3359_v58 = vpop.f32.mrf.mxu1 }
 0x9ef   :  { %v3358_v4 = vadd.f32 %v3357_v61, %v3339_v63 }
 0x9f1   :  { %v9403_v40 = vadd.f32 %v3358_v4, %v2792_v26  ;;  %v7470_v26 = vor.u32 %v8429_v45, %v7469_v42  ;;  %v8438_v42 = vld [vmem:[#allocation8 + $0x9c4] sm:$0xf]  ;;  %v8425_v45 = vld [vmem:[#allocation8 + $0x954] sm:$0xf0] }
 0x9f2   :  { %v3300_v18 = vpop.f32.mrf.mxu2 }
 0x9f3   :  { %v3301_v19 = vadd.f32 %v3300_v18, %v9398_v8  ;;  %v3376_v7 = vmax.f32 %v9403_v40, 0.0  ;;  %3875 = vmatpush.bf16.msrb.mxu2 %v7470_v26  ;;  %v7458_v26 = vor.u32 %v8424_v21, %v7455_v47  ;;  %v7423_v47 = vld [vmem:[#allocation8 + $0x918] sm:$0xf0] }
 0x9f4   :  { %v3340_v16 = vpop.f32.mrf.mxu0  ;;  %v3321_v25 = vpop.f32.mrf.mxu3 }
 0x9f5   :  { %v3341_v0 = vadd.f32 %v3340_v16, %v3128_v14  ;;  %v3320_v12 = vadd.f32 %v3319_v62, %v3301_v19  ;;  %3915 = vmatpush.bf16.msra.mxu0 %v7458_v26 }
 0x9f6   :  { %v3362_v22 = vpop.f32.mrf.mxu1 }
 0x9f7   :  { %v3360_v38 = vadd.f32 %v3359_v58, %v3341_v0  ;;  %v9414_v57 = vadd.f32 %v3320_v12, %v2791_v56  ;;  %v8441_v0 = vld [vmem:[#allocation8 + $0x9d4] sm:$0xf0]  ;;  %v7511_v12 = vld [vmem:[#allocation8 + $0x9c8] sm:$0xf0]  ;;  %3876 = vmatpush.bf16.msrb.mxu2 %v7462_v37  ;;  %v7430_v37 = vor.u32 %v8419_v59, %v7429_v33 }
 0x9f8   :  { %v7514_v27 = vor.u32 %v8438_v42, %v7511_v12  ;;  %v7479_v12 = vld [vmem:[#allocation8 + $0x988] sm:$0xf0] }
 0x9f9   :  { %v9407_v30 = vadd.f32 %v3360_v38, %v2794_v50  ;;  %v3375_v39 = vmax.f32 %v9414_v57, 0.0  ;;  %v7509_v38 = vld [vmem:[#allocation8 + $0x9c0] sm:$0xf] }
 0x9fa   :  { %v3302_v6 = vpop.f32.mrf.mxu2  ;;  %v7510_v34 = vor.u32 %v8439_v46, %v7509_v38  ;;  %v7434_v38 = vor.u32 %v8418_v44, %v7431_v36  ;;  %v7477_v46 = vld [vmem:[#allocation8 + $0x980] sm:$0xf] }
 0x9fb   :  { %v3378_v17 = vmax.f32 %v9407_v30, 0.0  ;;  %v3303_v2 = vadd.f32 %v3302_v6, %v9398_v8  ;;  %v8437_v6 = vld [vmem:[#allocation8 + $0x9b4] sm:$0xf0]  ;;  %v7478_v42 = vor.u32 %v8431_v15, %v7477_v46 }
 0x9fc   :  { %v3343_v48 = vpop.f32.mrf.mxu0  ;;  %v3324_v56 = vpop.f32.mrf.mxu3 }
 0x9fd   :  { %v3417_v50 = vpack.c.bf16 %v3378_v17, %v3376_v7  ;;  %v3322_v49 = vadd.f32 %v3321_v25, %v3303_v2  ;;  %v3344_v60 = vadd.f32 %v3343_v48, %v3128_v14  ;;  %v7453_v25 = vld [vmem:[#allocation8 + $0x950] sm:$0xf]  ;;  %v7502_v2 = vor.u32 %v8437_v6, %v7501_v43  ;;  %v7503_v48 = vld [vmem:[#allocation8 + $0x9b8] sm:$0xf0]  ;;  %v7413_v43 = vld [vmem:[#allocation8 + $0x900] sm:$0xf] }
 0x9fe   :  { %v3364_v61 = vpop.f32.mrf.mxu1  ;;  %v7454_v13 = vor.u32 %v8425_v45, %v7453_v25  ;;  %v8417_v45 = vld [vmem:[#allocation8 + $0x914] sm:$0xf0]  ;;  %v8415_v6 = vld [vmem:[#allocation8 + $0x904] sm:$0xf0] }
 0x9ff   :  { %v9422_v29 = vadd.f32 %v3322_v49, %v2793_v10  ;;  %3614 = vmatmul.bf16.vlgmr.msra.gmra.mxu3 %v3417_v50  ;;  %3652 = vmatmul.bf16.vlgmr.msrb.gmra.mxu1 %v3417_v50  ;;  %v3363_v52 = vadd.f32 %v3362_v22, %v3344_v60  ;;  %v8436_v22 = vld [vmem:[#allocation8 + $0x9b4] sm:$0xf]  ;;  %v7445_v49 = vld [vmem:[#allocation8 + $0x940] sm:$0xf]  ;;  %v8423_v60 = vld [vmem:[#allocation8 + $0x944] sm:$0xf0] }
 0xa00   :  { %3877 = vmatpush.bf16.msrb.mxu2 %v7454_v13  ;;  %v7506_v50 = vor.u32 %v8436_v22, %v7503_v48  ;;  %v8416_v13 = vld [vmem:[#allocation8 + $0x914] sm:$0xf]  ;;  %v7414_v22 = vor.u32 %v8415_v6, %v7413_v43  ;;  %v7415_v48 = vld [vmem:[#allocation8 + $0x908] sm:$0xf0] }
 0xa01   :  { %v3377_v41 = vmax.f32 %v9422_v29, 0.0  ;;  %v9433_v55 = vadd.f32 %v3363_v52, %v2796_v5  ;;  %v7426_v26 = vor.u32 %v8416_v13, %v7423_v47 }
 0xa02   :  { %v3305_v20 = vpop.f32.mrf.mxu2 }
 0xa03   :  { %v3416_v51 = vpack.c.bf16 %v3377_v41, %v3375_v39  ;;  %v3306_v53 = vadd.f32 %v3305_v20, %v9398_v8  ;;  %v3380_v18 = vmax.f32 %v9433_v55, 0.0  ;;  %v7446_v20 = vor.u32 %v8423_v60, %v7445_v49  ;;  %v3421_v60 = vld [vmem:[#allocation17 + $0x20] ss:$8 sm:$0x3] }
 0xa04   :  { %v3345_v54 = vpop.f32.mrf.mxu0  ;;  %v3326_v19 = vpop.f32.mrf.mxu3 }
 0xa05   :  { %v3346_v10 = vadd.f32 %v3345_v54, %v3128_v14  ;;  %3595 = vmatmul.bf16.vlgmr.msra.gmra.mxu2 %v3416_v51  ;;  %3633 = vmatmul.bf16.vlgmr.msrb.gmra.mxu0 %v3416_v51  ;;  %v3325_v62 = vadd.f32 %v3324_v56, %v3306_v53  ;;  %v8422_v56 = vld [vmem:[#allocation8 + $0x944] sm:$0xf]  ;;  %v7447_v51 = vld [vmem:[#allocation8 + $0x948] sm:$0xf0]  ;;  %v7493_v54 = vld [vmem:[#allocation8 + $0x9a0] sm:$0xf] }
 0xa06   :  { %v7450_v52 = vor.u32 %v8422_v56, %v7447_v51  ;;  %v8435_v53 = vld [vmem:[#allocation8 + $0x9a4] sm:$0xf0]  ;;  %3878 = vmatpush.bf16.msrb.mxu2 %v7446_v20  ;;  %v3424_v20 = vperm.slane %v3421_v60, 1 }
 0xa07   :  { %v3365_v11 = vadd.f32 %v3364_v61, %v3346_v10  ;;  %v9444_v16 = vadd.f32 %v3325_v62, %v2795_v31  ;;  %v7517_v31 = vld [vmem:[#allocation8 + $0x9d0] sm:$0xf]  ;;  %v8434_v10 = vld [vmem:[#allocation8 + $0x9a4] sm:$0xf]  ;;  %v7494_v61 = vor.u32 %v8435_v53, %v7493_v54 }
 0xa08   :  { %v7518_v24 = vor.u32 %v8441_v0, %v7517_v31  ;;  %3916 = vmatpush.bf16.msra.mxu0 %v7450_v52  ;;  %v7485_v31 = vld [vmem:[#allocation8 + $0x990] sm:$0xf]  ;;  %v8433_v0 = vld [vmem:[#allocation8 + $0x994] sm:$0xf0] }
 0xa09   :  { %v9437_v63 = vadd.f32 %v3365_v11, %v2798_v1  ;;  %v3379_v1 = vmax.f32 %v9444_v16, 0.0  ;;  %v7495_v11 = vld [vmem:[#allocation8 + $0x9a8] sm:$0xf0]  ;;  %v8462_v16 = vld [vmem:[#allocation11] sm:$0xff] }
 0xa0a   :  { %v3307_v58 = vpop.f32.mrf.mxu2  ;;  %3896 = vmatpush.bf16.msrb.mxu3 %v7518_v24  ;;  %v7498_v62 = vor.u32 %v8434_v10, %v7495_v11  ;;  %v7486_v24 = vor.u32 %v8433_v0, %v7485_v31  ;;  %v3423_v10 = vperm.slane %v3421_v60, 0  ;;  %v8453_v11 = vld [vmem:[#allocation10 + $0x38] sm:$0xff] }
 0xa0b   :  { %v3308_v4 = vadd.f32 %v3307_v58, %v9398_v8  ;;  %v3382_v14 = vmax.f32 %v9437_v63, 0.0  ;;  %v7437_v58 = vld [vmem:[#allocation8 + $0x930] sm:$0xf]  ;;  %v8466_v63 = vld [vmem:[#allocation11 + $0x20] sm:$0xff] }
 0xa0d   :  { %v3327_v9 = vadd.f32 %v3326_v19, %v3308_v4  ;;  %v3419_v28 = vpack.c.bf16 %v3382_v14, %v3380_v18  ;;  %v8421_v4 = vld [vmem:[#allocation8 + $0x934] sm:$0xf0]  ;;  %v8420_v19 = vld [vmem:[#allocation8 + $0x934] sm:$0xf] }
 0xa0e   :  { %3897 = vmatpush.bf16.msrb.mxu3 %v7510_v34  ;;  %v8430_v34 = vld [vmem:[#allocation8 + $0x984] sm:$0xf] }
 0xa0f   :  { %v9452_v5 = vadd.f32 %v3327_v9, %v2797_v23  ;;  %3619 = vmatmul.bf16.gmra.mxu3 %v3419_v28  ;;  %3657 = vmatmul.bf16.gmra.mxu1 %v3419_v28  ;;  %v7522_v23 = vor.u32 %v8440_v32, %v7519_v35  ;;  %v7438_v9 = vor.u32 %v8421_v4, %v7437_v58  ;;  %v7439_v28 = vld [vmem:[#allocation8 + $0x938] sm:$0xf0]  ;;  %v8432_v32 = vld [vmem:[#allocation8 + $0x994] sm:$0xf] }
 0xa10   :  { %v7487_v35 = vld [vmem:[#allocation8 + $0x998] sm:$0xf0]  ;;  %v7482_v25 = vor.u32 %v8430_v34, %v7479_v12 }
 0xa11   :  { %v3381_v8 = vmax.f32 %v9452_v5, 0.0  ;;  %3934 = vmatpush.bf16.msra.mxu1 %v7522_v23  ;;  %3879 = vmatpush.bf16.msrb.mxu2 %v7438_v9  ;;  %v7490_v23 = vor.u32 %v8432_v32, %v7487_v35  ;;  %v4003_v5 = vld [vmem:[#allocation17 + $0x22] ss:$0 sm:$0xff] }
 0xa12   :  { %3898 = vmatpush.bf16.msrb.mxu3 %v7502_v2  ;;  %v8414_v2 = vld [vmem:[#allocation8 + $0x904] sm:$0xf] }
 0xa13   :  { %v3418_v3 = vpack.c.bf16 %v3381_v8, %v3379_v1 }
 0xa15   :  { %3600 = vmatmul.bf16.gmra.mxu2 %v3418_v3  ;;  %3638 = vmatmul.bf16.gmra.mxu0 %v3418_v3  ;;  %v7442_v3 = vor.u32 %v8420_v19, %v7439_v28  ;;  %v8460_v19 = vld [vmem:[#allocation10 + $0x70] sm:$0xff] }
 0xa16   :  { %3935 = vmatpush.bf16.msra.mxu1 %v7514_v27  ;;  %3899 = vmatpush.bf16.msrb.mxu3 %v7494_v61  ;;  %v7421_v27 = vld [vmem:[#allocation8 + $0x910] sm:$0xf]  ;;  %v8461_v61 = vld [vmem:[#allocation10 + $0x78] sm:$0xff] }
 0xa17   :  { %3917 = vmatpush.bf16.msra.mxu0 %v7442_v3  ;;  %3880 = vmatpush.bf16.msrb.mxu2 %v7430_v37  ;;  %v7422_v21 = vor.u32 %v8417_v45, %v7421_v27 }
 0xa1a   :  { %3936 = vmatpush.bf16.msra.mxu1 %v7506_v50  ;;  %3900 = vmatpush.bf16.msrb.mxu3 %v7486_v24  ;;  %v7418_v50 = vor.u32 %v8414_v2, %v7415_v48 }
 0xa1b   :  { %3918 = vmatpush.bf16.msra.mxu0 %v7434_v38  ;;  %3881 = vmatpush.bf16.msrb.mxu2 %v7422_v21 }
 0xa1e   :  { %3937 = vmatpush.bf16.msra.mxu1 %v7498_v62  ;;  %3901 = vmatpush.bf16.msrb.mxu3 %v7478_v42 }
 0xa1f   :  { %3919 = vmatpush.bf16.msra.mxu0 %v7426_v26  ;;  %3882 = vmatpush.bf16.msrb.mxu2 %v7414_v22 }
 0xa22   :  { %3938 = vmatpush.bf16.msra.mxu1 %v7490_v23  ;;  %4119 = vmatpush.bf16.msra.mxu3 %v8461_v61  ;;  %v8449_v61 = vld [vmem:[#allocation10 + $0x18] sm:$0xff] }
 0xa23   :  { %3920 = vmatpush.bf16.msra.mxu0 %v7418_v50  ;;  %4100 = vmatpush.bf16.msra.mxu2 %v8453_v11  ;;  %v8455_v11 = vld [vmem:[#allocation10 + $0x48] sm:$0xff] }
 0xa26   :  { %3939 = vmatpush.bf16.msra.mxu1 %v7482_v25  ;;  %4120 = vmatpush.bf16.msra.mxu3 %v8460_v19  ;;  %v8446_v19 = vld [vmem:[#allocation10] sm:$0xff] }
 0xa7c   :  { %v3653_v49 = vpop.f32.mrf.mxu1 }
 0xa82   :  { %v3634_v56 = vpop.f32.mrf.mxu0  ;;  %v3615_v51 = vpop.f32.mrf.mxu3 }
 0xa83   :  { %v3635_v52 = vadd.f32 %v3634_v56, %v3424_v20  ;;  %v8459_v56 = vld [vmem:[#allocation10 + $0x68] sm:$0xff] }
 0xa84   :  { %v3655_v54 = vpop.f32.mrf.mxu1  ;;  %4121 = vmatpush.bf16.msra.mxu3 %v8459_v56 }
 0xa85   :  { %v3654_v58 = vadd.f32 %v3653_v49, %v3635_v52  ;;  %v8451_v52 = vld [vmem:[#allocation10 + $0x28] sm:$0xff] }
 0xa87   :  { %v3664_v31 = vmax.f32 %v3654_v58, 0.0  ;;  %v8454_v58 = vld [vmem:[#allocation10 + $0x40] sm:$0xff] }
 0xa88   :  { %v3596_v53 = vpop.f32.mrf.mxu2 }
 0xa89   :  { %v3597_v9 = vadd.f32 %v3596_v53, %v3423_v10  ;;  %v8450_v53 = vld [vmem:[#allocation10 + $0x20] sm:$0xff] }
 0xa8a   :  { %v3636_v62 = vpop.f32.mrf.mxu0  ;;  %v3617_v3 = vpop.f32.mrf.mxu3 }
 0xa8b   :  { %v3637_v4 = vadd.f32 %v3636_v62, %v3424_v20  ;;  %v3616_v24 = vadd.f32 %v3615_v51, %v3597_v9  ;;  %v8458_v51 = vld [vmem:[#allocation10 + $0x60] sm:$0xff]  ;;  %v8448_v62 = vld [vmem:[#allocation10 + $0x10] sm:$0xff] }
 0xa8c   :  { %v3658_v33 = vpop.f32.mrf.mxu1  ;;  %4122 = vmatpush.bf16.msra.mxu3 %v8458_v51 }
 0xa8d   :  { %v3656_v28 = vadd.f32 %v3655_v54, %v3637_v4  ;;  %v3663_v37 = vmax.f32 %v3616_v24, 0.0  ;;  %v8457_v54 = vld [vmem:[#allocation10 + $0x58] sm:$0xff]  ;;  %v8447_v4 = vld [vmem:[#allocation10 + $0x8] sm:$0xff] }
 0xa8f   :  { %v3666_v0 = vmax.f32 %v3656_v28, 0.0  ;;  %v3709_v28 = vld [vmem:[#allocation17 + $0x21] ss:$8 sm:$0x3] }
 0xa90   :  { %v3598_v32 = vpop.f32.mrf.mxu2  ;;  %4123 = vmatpush.bf16.msra.mxu3 %v8457_v54  ;;  %v3711_v24 = vperm.slane %v3709_v28, 0 }
 0xa91   :  { %v3705_v35 = vpack.c.bf16 %v3666_v0, %v3664_v31  ;;  %v3599_v23 = vadd.f32 %v3598_v32, %v3423_v10 }
 0xa92   :  { %v3639_v59 = vpop.f32.mrf.mxu0  ;;  %v3620_v15 = vpop.f32.mrf.mxu3 }
 0xa93   :  { %v3618_v44 = vadd.f32 %v3617_v3, %v3599_v23  ;;  %3902 = vmatmul.bf16.vlgmr.msrb.gmra.mxu3 %v3705_v35  ;;  %3940 = vmatmul.bf16.vlgmr.msra.gmra.mxu1 %v3705_v35  ;;  %v3640_v46 = vadd.f32 %v3639_v59, %v3424_v20  ;;  %v3712_v3 = vperm.slane %v3709_v28, 1  ;;  %v8463_v28 = vld [vmem:[#allocation11 + $0x8] sm:$0xff] }
 0xa94   :  { %v3660_v27 = vpop.f32.mrf.mxu1 }
 0xa95   :  { %v3665_v36 = vmax.f32 %v3618_v44, 0.0  ;;  %v3659_v12 = vadd.f32 %v3658_v33, %v3640_v46 }
 0xa97   :  { %v3704_v38 = vpack.c.bf16 %v3665_v36, %v3663_v37  ;;  %v3668_v21 = vmax.f32 %v3659_v12, 0.0  ;;  %v8469_v36 = vld [vmem:[#allocation11 + $0x38] sm:$0xff] }
 0xa98   :  { %v3601_v34 = vpop.f32.mrf.mxu2  ;;  %4209 = vmatpush.bf16.msrb.mxu0 %v8469_v36 }
 0xa99   :  { %3883 = vmatmul.bf16.vlgmr.msrb.gmra.mxu2 %v3704_v38  ;;  %3921 = vmatmul.bf16.vlgmr.msra.gmra.mxu0 %v3704_v38  ;;  %v3602_v45 = vadd.f32 %v3601_v34, %v3423_v10 }
 0xa9a   :  { %v3641_v42 = vpop.f32.mrf.mxu0  ;;  %v3622_v22 = vpop.f32.mrf.mxu3 }
 0xa9b   :  { %v3642_v25 = vadd.f32 %v3641_v42, %v3424_v20  ;;  %v3621_v43 = vadd.f32 %v3620_v15, %v3602_v45  ;;  %v8452_v20 = vld [vmem:[#allocation10 + $0x30] sm:$0xff] }
 0xa9c   :  { %4101 = vmatpush.bf16.msra.mxu2 %v8452_v20  ;;  %v8468_v15 = vld [vmem:[#allocation11 + $0x30] sm:$0xff] }
 0xa9d   :  { %v3661_v13 = vadd.f32 %v3660_v27, %v3642_v25  ;;  %v3667_v50 = vmax.f32 %v3621_v43, 0.0  ;;  %4210 = vmatpush.bf16.msrb.mxu0 %v8468_v15 }
 0xa9f   :  { %v3670_v47 = vmax.f32 %v3661_v13, 0.0 }
 0xaa0   :  { %v3603_v26 = vpop.f32.mrf.mxu2  ;;  %4102 = vmatpush.bf16.msra.mxu2 %v8451_v52 }
 0xaa1   :  { %v3604_v6 = vadd.f32 %v3603_v26, %v3423_v10  ;;  %v3707_v2 = vpack.c.bf16 %v3670_v47, %v3668_v21  ;;  %v8456_v10 = vld [vmem:[#allocation10 + $0x50] sm:$0xff]  ;;  %v8467_v21 = vld [vmem:[#allocation11 + $0x28] sm:$0xff] }
 0xaa2   :  { %4124 = vmatpush.bf16.msra.mxu3 %v8456_v10  ;;  %4211 = vmatpush.bf16.msrb.mxu0 %v8467_v21 }
 0xaa3   :  { %v3623_v48 = vadd.f32 %v3622_v22, %v3604_v6  ;;  %3907 = vmatmul.bf16.gmra.mxu3 %v3707_v2  ;;  %3945 = vmatmul.bf16.gmra.mxu1 %v3707_v2 }
 0xaa4   :  { %4103 = vmatpush.bf16.msra.mxu2 %v8450_v53 }
 0xaa5   :  { %v3669_v49 = vmax.f32 %v3623_v48, 0.0 }
 0xaa6   :  { %4125 = vmatpush.bf16.msra.mxu3 %v8455_v11  ;;  %4212 = vmatpush.bf16.msrb.mxu0 %v8466_v63  ;;  %v8491_v63 = vld [vmem:[#allocation11 + $0xe8] sm:$0xff] }
 0xaa7   :  { %v3706_v60 = vpack.c.bf16 %v3669_v49, %v3667_v50 }
 0xaa8   :  { %4104 = vmatpush.bf16.msra.mxu2 %v8449_v61 }
 0xaa9   :  { %3888 = vmatmul.bf16.gmra.mxu2 %v3706_v60  ;;  %3926 = vmatmul.bf16.gmra.mxu0 %v3706_v60 }
 0xaaa   :  { %4126 = vmatpush.bf16.msra.mxu3 %v8454_v58 }
 0xaac   :  { %4105 = vmatpush.bf16.msra.mxu2 %v8448_v62 }
 0xab0   :  { %4106 = vmatpush.bf16.msra.mxu2 %v8447_v4 }
 0xab4   :  { %4107 = vmatpush.bf16.msra.mxu2 %v8446_v19 }
 0xb10   :  { %v3941_v9 = vpop.f32.mrf.mxu1 }
 0xb16   :  { %v3922_v31 = vpop.f32.mrf.mxu0  ;;  %v3903_v0 = vpop.f32.mrf.mxu3 }
 0xb17   :  { %v3923_v32 = vadd.f32 %v3922_v31, %v3712_v3  ;;  %v8477_v31 = vld [vmem:[#allocation11 + $0x78] sm:$0xff] }
 0xb18   :  { %v3943_v35 = vpop.f32.mrf.mxu1  ;;  %4300 = vmatpush.bf16.msrb.mxu1 %v8477_v31 }
 0xb19   :  { %v3942_v33 = vadd.f32 %v3941_v9, %v3923_v32  ;;  %v8464_v9 = vld [vmem:[#allocation11 + $0x10] sm:$0xff] }
 0xb1b   :  { %v3952_v38 = vadd.f32 %v3942_v33, %v3376_v7 }
 0xb1c   :  { %v3884_v23 = vpop.f32.mrf.mxu2 }
 0xb1d   :  { %v3885_v44 = vadd.f32 %v3884_v23, %v3711_v24  ;;  %v3960_v27 = vmax.f32 %v3952_v38, 0.0 }
 0xb1e   :  { %v3924_v59 = vpop.f32.mrf.mxu0  ;;  %v3905_v34 = vpop.f32.mrf.mxu3 }
 0xb1f   :  { %v3925_v37 = vadd.f32 %v3924_v59, %v3712_v3  ;;  %v3904_v42 = vadd.f32 %v3903_v0, %v3885_v44  ;;  %v8474_v44 = vld [vmem:[#allocation11 + $0x60] sm:$0xff] }
 0xb20   :  { %v3946_v47 = vpop.f32.mrf.mxu1 }
 0xb21   :  { %v3944_v46 = vadd.f32 %v3943_v35, %v3925_v37  ;;  %v3951_v40 = vadd.f32 %v3904_v42, %v3375_v39 }
 0xb23   :  { %v3954_v12 = vadd.f32 %v3944_v46, %v3378_v17  ;;  %v3959_v30 = vmax.f32 %v3951_v40, 0.0  ;;  %v8473_v46 = vld [vmem:[#allocation11 + $0x58] sm:$0xff]  ;;  %v8472_v40 = vld [vmem:[#allocation11 + $0x50] sm:$0xff] }
 0xb24   :  { %v3886_v25 = vpop.f32.mrf.mxu2 }
 0xb25   :  { %v3962_v45 = vmax.f32 %v3954_v12, 0.0  ;;  %v3887_v13 = vadd.f32 %v3886_v25, %v3711_v24 }
 0xb26   :  { %v3927_v26 = vpop.f32.mrf.mxu0  ;;  %v3908_v22 = vpop.f32.mrf.mxu3 }
 0xb27   :  { %v4000_v7 = vpack.c.bf16 %v3962_v45, %v3960_v27  ;;  %v3906_v43 = vadd.f32 %v3905_v34, %v3887_v13  ;;  %v3928_v2 = vadd.f32 %v3927_v26, %v3712_v3 }
 0xb28   :  { %v3948_v57 = vpop.f32.mrf.mxu1 }
 0xb29   :  { %v3953_v6 = vadd.f32 %v3906_v43, %v3377_v41  ;;  %4127 = vmatmul.bf16.vlgmr.msra.gmra.mxu3 %v4000_v7  ;;  %v3947_v49 = vadd.f32 %v3946_v47, %v3928_v2  ;;  %v8471_v7 = vld [vmem:[#allocation11 + $0x48] sm:$0xff]  ;;  %v8470_v43 = vld [vmem:[#allocation11 + $0x40] sm:$0xff] }
 0xb2b   :  { %v3961_v17 = vmax.f32 %v3953_v6, 0.0  ;;  %v3956_v39 = vadd.f32 %v3947_v49, %v3380_v18  ;;  %v8485_v6 = vld [vmem:[#allocation11 + $0xb8] sm:$0xff] }
 0xb2c   :  { %v3889_v48 = vpop.f32.mrf.mxu2  ;;  %4395 = vmatpush.bf16.msrb.mxu2 %v8485_v6 }
 0xb2d   :  { %v3999_v50 = vpack.c.bf16 %v3961_v17, %v3959_v30  ;;  %v3890_v56 = vadd.f32 %v3889_v48, %v3711_v24  ;;  %v3964_v54 = vmax.f32 %v3956_v39, 0.0  ;;  %v8484_v30 = vld [vmem:[#allocation11 + $0xb0] sm:$0xff]  ;;  %v4160_v17 = vld [vmem:[#allocation17 + $0x23] ss:$0 sm:$0xff] }
 0xb2e   :  { %v3929_v60 = vpop.f32.mrf.mxu0  ;;  %v3910_v61 = vpop.f32.mrf.mxu3 }
 0xb2f   :  { %v3930_v20 = vadd.f32 %v3929_v60, %v3712_v3  ;;  %4108 = vmatmul.bf16.vlgmr.msra.gmra.mxu2 %v3999_v50  ;;  %v3909_v29 = vadd.f32 %v3908_v22, %v3890_v56  ;;  %v8483_v22 = vld [vmem:[#allocation11 + $0xa8] sm:$0xff]  ;;  %v8482_v60 = vld [vmem:[#allocation11 + $0xa0] sm:$0xff] }
 0xb30   :  { %4396 = vmatpush.bf16.msrb.mxu2 %v8484_v30 }
 0xb31   :  { %v3949_v51 = vadd.f32 %v3948_v57, %v3930_v20  ;;  %v3955_v11 = vadd.f32 %v3909_v29, %v3379_v1 }
 0xb33   :  { %v3958_v41 = vadd.f32 %v3949_v51, %v3382_v14  ;;  %v3963_v55 = vmax.f32 %v3955_v11, 0.0  ;;  %v8465_v14 = vld [vmem:[#allocation11 + $0x18] sm:$0xff]  ;;  %v8479_v11 = vld [vmem:[#allocation11 + $0x88] sm:$0xff] }
 0xb34   :  { %v3891_v52 = vpop.f32.mrf.mxu2  ;;  %4213 = vmatpush.bf16.msrb.mxu0 %v8465_v14  ;;  %4397 = vmatpush.bf16.msrb.mxu2 %v8483_v22 }
 0xb35   :  { %v3892_v53 = vadd.f32 %v3891_v52, %v3711_v24  ;;  %v3966_v10 = vmax.f32 %v3958_v41, 0.0  ;;  %v8475_v24 = vld [vmem:[#allocation11 + $0x68] sm:$0xff] }
 0xb37   :  { %v3911_v62 = vadd.f32 %v3910_v61, %v3892_v53  ;;  %v4002_v58 = vpack.c.bf16 %v3966_v10, %v3964_v54  ;;  %v8481_v10 = vld [vmem:[#allocation11 + $0x98] sm:$0xff]  ;;  %v8480_v61 = vld [vmem:[#allocation11 + $0x90] sm:$0xff] }
 0xb38   :  { %4214 = vmatpush.bf16.msrb.mxu0 %v8464_v9  ;;  %4398 = vmatpush.bf16.msrb.mxu2 %v8482_v60  ;;  %v8494_v60 = vld [vmem:[#allocation11 + $0x100] sm:$0xff] }
 0xb39   :  { %v3957_v4 = vadd.f32 %v3911_v62, %v3381_v8  ;;  %4132 = vmatmul.bf16.gmra.mxu3 %v4002_v58  ;;  %v8476_v8 = vld [vmem:[#allocation11 + $0x70] sm:$0xff]  ;;  %v8478_v62 = vld [vmem:[#allocation11 + $0x80] sm:$0xff] }
 0xb3a   :  { %4301 = vmatpush.bf16.msrb.mxu1 %v8476_v8  ;;  %v8489_v8 = vld [vmem:[#allocation11 + $0xd8] sm:$0xff] }
 0xb3b   :  { %v3965_v18 = vmax.f32 %v3957_v4, 0.0  ;;  %v8493_v4 = vld [vmem:[#allocation11 + $0xf8] sm:$0xff] }
 0xb3c   :  { %4215 = vmatpush.bf16.msrb.mxu0 %v8463_v28  ;;  %4399 = vmatpush.bf16.msrb.mxu2 %v8481_v10  ;;  %v8506_v10 = vld [vmem:[#allocation11 + $0x160] sm:$0xff] }
 0xb3d   :  { %v4001_v19 = vpack.c.bf16 %v3965_v18, %v3963_v55  ;;  %v4251_v55 = vld [vmem:[#allocation17 + $0x24] ss:$0 sm:$0xff]  ;;  %4486 = vmatpush.bf16.msrb.mxu3 %v8493_v4  ;;  %v8492_v18 = vld [vmem:[#allocation11 + $0xf0] sm:$0xff] }
 0xb3e   :  { %4302 = vmatpush.bf16.msrb.mxu1 %v8475_v24 }
 0xb3f   :  { %4113 = vmatmul.bf16.gmra.mxu2 %v4001_v19 }
 0xb40   :  { %4216 = vmatpush.bf16.msrb.mxu0 %v8462_v16  ;;  %4400 = vmatpush.bf16.msrb.mxu2 %v8480_v61 }
 0xb41   :  { %4487 = vmatpush.bf16.msrb.mxu3 %v8492_v18 }
 0xb42   :  { %4303 = vmatpush.bf16.msrb.mxu1 %v8474_v44 }
 0xb44   :  { %4401 = vmatpush.bf16.msrb.mxu2 %v8479_v11 }
 0xb45   :  { %4488 = vmatpush.bf16.msrb.mxu3 %v8491_v63 }
 0xb46   :  { %4304 = vmatpush.bf16.msrb.mxu1 %v8473_v46  ;;  %v8486_v46 = vld [vmem:[#allocation11 + $0xc0] sm:$0xff] }
 0xb48   :  { %4402 = vmatpush.bf16.msrb.mxu2 %v8478_v62 }
 0xb4a   :  { %4305 = vmatpush.bf16.msrb.mxu1 %v8472_v40 }
 0xb4e   :  { %4306 = vmatpush.bf16.msrb.mxu1 %v8471_v7 }
 0xb52   :  { %4307 = vmatpush.bf16.msrb.mxu1 %v8470_v43 }
 0xbac   :  { %v4128_v1 = vpop.f32.mrf.mxu3 }
 0xbb2   :  { %v4109_v3 = vpop.f32.mrf.mxu2 }
 0xbb3   :  { %v4110_v0 = vadd.f32 %v4109_v3, %v4003_v5 }
 0xbb4   :  { %v4130_v32 = vpop.f32.mrf.mxu3 }
 0xbb5   :  { %v9476_v23 = vadd.f32 %v4128_v1, %v4110_v0  ;;  %v8490_v1 = vld [vmem:[#allocation11 + $0xe0] sm:$0xff] }
 0xbb6   :  { %4489 = vmatpush.bf16.msrb.mxu3 %v8490_v1  ;;  %v8504_v1 = vld [vmem:[#allocation11 + $0x150] sm:$0xff] }
 0xbb7   :  { %v4138_v37 = vmax.f32 %v9476_v23, 0.0 }
 0xbba   :  { %v4111_v35 = vpop.f32.mrf.mxu2  ;;  %4490 = vmatpush.bf16.msrb.mxu3 %v8489_v8  ;;  %v8525_v8 = vld [vmem:[#allocation13 + $0x74] sm:$0xf0] }
 0xbbb   :  { %v4112_v33 = vadd.f32 %v4111_v35, %v4003_v5 }
 0xbbc   :  { %v4133_v15 = vpop.f32.mrf.mxu3 }
 0xbbd   :  { %v9478_v59 = vadd.f32 %v4130_v32, %v4112_v33 }
 0xbbf   :  { %v4139_v36 = vmax.f32 %v9478_v59, 0.0 }
 0xbc1   :  { %v4158_v38 = vpack.c.bf16 %v4139_v36, %v4138_v37 }
 0xbc2   :  { %v4114_v34 = vpop.f32.mrf.mxu2 }
 0xbc3   :  { %4217 = vmatmul.bf16.vlgmr.msrb.gmra.mxu0 %v4158_v38  ;;  %v4115_v42 = vadd.f32 %v4114_v34, %v4003_v5  ;;  %v8487_v38 = vld [vmem:[#allocation11 + $0xc8] sm:$0xff] }
 0xbc4   :  { %v4135_v45 = vpop.f32.mrf.mxu3 }
 0xbc5   :  { %v9486_v25 = vadd.f32 %v4133_v15, %v4115_v42  ;;  %v8501_v15 = vld [vmem:[#allocation11 + $0x138] sm:$0xff]  ;;  %v8500_v42 = vld [vmem:[#allocation11 + $0x130] sm:$0xff] }
 0xbc6   :  { %4581 = vmatpush.bf16.msra.mxu0 %v8501_v15  ;;  %v8521_v15 = vld [vmem:[#allocation13 + $0x54] sm:$0xf0] }
 0xbc7   :  { %v4140_v21 = vmax.f32 %v9486_v25, 0.0  ;;  %v8499_v25 = vld [vmem:[#allocation11 + $0x128] sm:$0xff] }
 0xbca   :  { %v4116_v12 = vpop.f32.mrf.mxu2  ;;  %4582 = vmatpush.bf16.msra.mxu0 %v8500_v42  ;;  %v8520_v42 = vld [vmem:[#allocation13 + $0x54] sm:$0xf] }
 0xbcb   :  { %v4117_v27 = vadd.f32 %v4116_v12, %v4003_v5  ;;  %v4346_v12 = vld [vmem:[#allocation17 + $0x25] ss:$0 sm:$0xff] }
 0xbcd   :  { %v9488_v13 = vadd.f32 %v4135_v45, %v4117_v27 }
 0xbce   :  { %4583 = vmatpush.bf16.msra.mxu0 %v8499_v25 }
 0xbcf   :  { %v4141_v47 = vmax.f32 %v9488_v13, 0.0 }
 0xbd1   :  { %v4159_v26 = vpack.c.bf16 %v4141_v47, %v4140_v21 }
 0xbd3   :  { %4222 = vmatmul.bf16.gmra.mxu0 %v4159_v26 }
 0xc40   :  { %v4218_v2 = vpop.f32.mrf.mxu0 }
 0xc41   :  { %v4219_v48 = vadd.f32 %v4218_v2, %v4160_v17 }
 0xc43   :  { %v4228_v56 = vmax.f32 %v4219_v48, 0.0  ;;  %v8497_v48 = vld [vmem:[#allocation11 + $0x118] sm:$0xff] }
 0xc48   :  { %v4220_v50 = vpop.f32.mrf.mxu0 }
 0xc49   :  { %v4221_v49 = vadd.f32 %v4220_v50, %v4160_v17  ;;  %v8496_v50 = vld [vmem:[#allocation11 + $0x110] sm:$0xff] }
 0xc4b   :  { %v4229_v20 = vmax.f32 %v4221_v49, 0.0  ;;  %v8495_v49 = vld [vmem:[#allocation11 + $0x108] sm:$0xff] }
 0xc4d   :  { %v4249_v57 = vpack.c.bf16 %v4229_v20, %v4228_v56  ;;  %v8509_v20 = vld [vmem:[#allocation11 + $0x178] sm:$0xff] }
 0xc4e   :  { %4672 = vmatpush.bf16.msra.mxu1 %v8509_v20 }
 0xc4f   :  { %4308 = vmatmul.bf16.vlgmr.msrb.gmra.mxu1 %v4249_v57  ;;  %v4437_v57 = vld [vmem:[#allocation17 + $0x26] ss:$0 sm:$0xff] }
 0xc50   :  { %v4223_v39 = vpop.f32.mrf.mxu0 }
 0xc51   :  { %v4224_v51 = vadd.f32 %v4223_v39, %v4160_v17  ;;  %v8508_v39 = vld [vmem:[#allocation11 + $0x170] sm:$0xff] }
 0xc52   :  { %4673 = vmatpush.bf16.msra.mxu1 %v8508_v39  ;;  %v8517_v39 = vld [vmem:[#allocation13 + $0x34] sm:$0xf0] }
 0xc53   :  { %v4230_v52 = vmax.f32 %v4224_v51, 0.0 }
 0xc58   :  { %v4225_v29 = vpop.f32.mrf.mxu0 }
 0xc59   :  { %v4226_v41 = vadd.f32 %v4225_v29, %v4160_v17  ;;  %v8507_v29 = vld [vmem:[#allocation11 + $0x168] sm:$0xff] }
 0xc5a   :  { %4674 = vmatpush.bf16.msra.mxu1 %v8507_v29 }
 0xc5b   :  { %v4231_v54 = vmax.f32 %v4226_v41, 0.0 }
 0xc5d   :  { %v4250_v53 = vpack.c.bf16 %v4231_v54, %v4230_v52 }
 0xc5e   :  { %4675 = vmatpush.bf16.msra.mxu1 %v8506_v10  ;;  %v7813_v10 = vld [vmem:[#allocation13 + $0x20] sm:$0xf] }
 0xc5f   :  { %4313 = vmatmul.bf16.gmra.mxu1 %v4250_v53 }
 0xccc   :  { %v4309_v58 = vpop.f32.mrf.mxu1 }
 0xccd   :  { %v4310_v19 = vadd.f32 %v4309_v58, %v4251_v55  ;;  %v8505_v58 = vld [vmem:[#allocation11 + $0x158] sm:$0xff] }
 0xcce   :  { %4676 = vmatpush.bf16.msra.mxu1 %v8505_v58  ;;  %v8514_v58 = vld [vmem:[#allocation13 + $0x24] sm:$0xf] }
 0xccf   :  { %v9498_v9 = vadd.f32 %v4310_v19, %v4138_v37 }
 0xcd1   :  { %v4323_v3 = vmax.f32 %v9498_v9, 0.0 }
 0xcd2   :  { %4677 = vmatpush.bf16.msra.mxu1 %v8504_v1  ;;  %v8512_v1 = vld [vmem:[#allocation13 + $0x14] sm:$0xf] }
 0xcd4   :  { %v4311_v14 = vpop.f32.mrf.mxu1 }
 0xcd5   :  { %v4312_v28 = vadd.f32 %v4311_v14, %v4251_v55 }
 0xcd7   :  { %v9502_v16 = vadd.f32 %v4312_v28, %v4139_v36  ;;  %v8488_v36 = vld [vmem:[#allocation11 + $0xd0] sm:$0xff] }
 0xcd8   :  { %4491 = vmatpush.bf16.msrb.mxu3 %v8488_v36 }
 0xcd9   :  { %v4324_v31 = vmax.f32 %v9502_v16, 0.0 }
 0xcdb   :  { %v4344_v5 = vpack.c.bf16 %v4324_v31, %v4323_v3 }
 0xcdc   :  { %v4314_v0 = vpop.f32.mrf.mxu1  ;;  %4492 = vmatpush.bf16.msrb.mxu3 %v8487_v38 }
 0xcdd   :  { %4403 = vmatmul.bf16.vlgmr.msrb.gmra.mxu2 %v4344_v5  ;;  %v4315_v32 = vadd.f32 %v4314_v0, %v4251_v55  ;;  %v7853_v5 = vld [vmem:[#allocation13 + $0x70] sm:$0xf]  ;;  %v8524_v0 = vld [vmem:[#allocation13 + $0x74] sm:$0xf] }
 0xcdf   :  { %v9512_v35 = vadd.f32 %v4315_v32, %v4140_v21  ;;  %v8498_v21 = vld [vmem:[#allocation11 + $0x120] sm:$0xff] }
 0xce0   :  { %4493 = vmatpush.bf16.msrb.mxu3 %v8486_v46  ;;  %4584 = vmatpush.bf16.msra.mxu0 %v8498_v21  ;;  %v7837_v46 = vld [vmem:[#allocation13 + $0x50] sm:$0xf]  ;;  %v8519_v21 = vld [vmem:[#allocation13 + $0x44] sm:$0xf0] }
 0xce1   :  { %v4325_v59 = vmax.f32 %v9512_v35, 0.0  ;;  %v7855_v35 = vld [vmem:[#allocation13 + $0x78] sm:$0xf0]  ;;  %v7838_v25 = vor.u32 %v8521_v15, %v7837_v46 }
 0xce4   :  { %v4316_v24 = vpop.f32.mrf.mxu1  ;;  %4585 = vmatpush.bf16.msra.mxu0 %v8497_v48 }
 0xce5   :  { %v4317_v23 = vadd.f32 %v4316_v24, %v4251_v55  ;;  %v7854_v24 = vor.u32 %v8525_v8, %v7853_v5  ;;  %v7797_v8 = vld [vmem:[#allocation13] sm:$0xf] }
 0xce7   :  { %v9516_v33 = vadd.f32 %v4317_v23, %v4141_v47  ;;  %v7845_v23 = vld [vmem:[#allocation13 + $0x60] sm:$0xf]  ;;  %4804 = vmatpush.bf16.msra.mxu2 %v7854_v24 }
 0xce8   :  { %4586 = vmatpush.bf16.msra.mxu0 %v8496_v50 }
 0xce9   :  { %v4326_v44 = vmax.f32 %v9516_v33, 0.0  ;;  %v8523_v33 = vld [vmem:[#allocation13 + $0x64] sm:$0xf0] }
 0xcea   :  { %v7846_v36 = vor.u32 %v8523_v33, %v7845_v23 }
 0xceb   :  { %v4345_v37 = vpack.c.bf16 %v4326_v44, %v4325_v59 }
 0xcec   :  { %4587 = vmatpush.bf16.msra.mxu0 %v8495_v49  ;;  %4805 = vmatpush.bf16.msra.mxu2 %v7846_v36 }
 0xced   :  { %4408 = vmatmul.bf16.gmra.mxu2 %v4345_v37  ;;  %v7847_v37 = vld [vmem:[#allocation13 + $0x68] sm:$0xf0] }
 0xcf0   :  { %4588 = vmatpush.bf16.msra.mxu0 %v8494_v60  ;;  %4806 = vmatpush.bf16.msra.mxu2 %v7838_v25 }
 0xd60   :  { %v4404_v34 = vpop.f32.mrf.mxu2 }
 0xd61   :  { %v4405_v27 = vadd.f32 %v4404_v34, %v4346_v12  ;;  %v4532_v34 = vld [vmem:[#allocation17 + $0x27] ss:$0 sm:$0xff] }
 0xd63   :  { %v4414_v47 = vmax.f32 %v4405_v27, 0.0 }
 0xd68   :  { %v4406_v45 = vpop.f32.mrf.mxu2 }
 0xd69   :  { %v4407_v13 = vadd.f32 %v4406_v45, %v4346_v12 }
 0xd6b   :  { %v4415_v26 = vmax.f32 %v4407_v13, 0.0  ;;  %v7829_v13 = vld [vmem:[#allocation13 + $0x40] sm:$0xf] }
 0xd6d   :  { %v4435_v40 = vpack.c.bf16 %v4415_v26, %v4414_v47  ;;  %v8518_v26 = vld [vmem:[#allocation13 + $0x44] sm:$0xf] }
 0xd6f   :  { %4494 = vmatmul.bf16.vlgmr.msrb.gmra.mxu3 %v4435_v40  ;;  %v7831_v40 = vld [vmem:[#allocation13 + $0x48] sm:$0xf0] }
 0xd70   :  { %v4409_v7 = vpop.f32.mrf.mxu2 }
 0xd71   :  { %v4410_v43 = vadd.f32 %v4409_v7, %v4346_v12 }
 0xd73   :  { %v4416_v30 = vmax.f32 %v4410_v43, 0.0  ;;  %v7830_v43 = vor.u32 %v8519_v21, %v7829_v13 }
 0xd75   :  { %4807 = vmatpush.bf16.msra.mxu2 %v7830_v43  ;;  %v8531_v43 = vld [vmem:[#allocation16 + $0x18] sm:$0xff] }
 0xd78   :  { %v4411_v6 = vpop.f32.mrf.mxu2 }
 0xd79   :  { %v4412_v2 = vadd.f32 %v4411_v6, %v4346_v12  ;;  %v7839_v12 = vld [vmem:[#allocation13 + $0x58] sm:$0xf0] }
 0xd7a   :  { %v7842_v45 = vor.u32 %v8520_v42, %v7839_v12 }
 0xd7b   :  { %v4417_v17 = vmax.f32 %v4412_v2, 0.0 }
 0xd7d   :  { %v4436_v22 = vpack.c.bf16 %v4417_v17, %v4416_v30  ;;  %v7834_v30 = vor.u32 %v8518_v26, %v7831_v40  ;;  %v8526_v40 = vld [vmem:[#allocation14] sm:$0xff] }
 0xd7f   :  { %4499 = vmatmul.bf16.gmra.mxu3 %v4436_v22 }
 0xdf2   :  { %v4495_v56 = vpop.f32.mrf.mxu3 }
 0xdf3   :  { %v4496_v51 = vadd.f32 %v4495_v56, %v4437_v57 }
 0xdf5   :  { %v9526_v52 = vadd.f32 %v4496_v51, %v4323_v3  ;;  %v8503_v3 = vld [vmem:[#allocation11 + $0x148] sm:$0xff]  ;;  %v8516_v51 = vld [vmem:[#allocation13 + $0x34] sm:$0xf] }
 0xdf6   :  { %4678 = vmatpush.bf16.msra.mxu1 %v8503_v3 }
 0xdf7   :  { %v4509_v61 = vmax.f32 %v9526_v52, 0.0 }
 0xdfa   :  { %v4497_v41 = vpop.f32.mrf.mxu3 }
 0xdfb   :  { %v4498_v54 = vadd.f32 %v4497_v41, %v4437_v57  ;;  %v7823_v41 = vld [vmem:[#allocation13 + $0x38] sm:$0xf0] }
 0xdfd   :  { %v9530_v53 = vadd.f32 %v4498_v54, %v4324_v31  ;;  %v8502_v31 = vld [vmem:[#allocation11 + $0x140] sm:$0xff]  ;;  %v7826_v54 = vor.u32 %v8516_v51, %v7823_v41 }
 0xdfe   :  { %4679 = vmatpush.bf16.msra.mxu1 %v8502_v31  ;;  %v7807_v31 = vld [vmem:[#allocation13 + $0x18] sm:$0xf0] }
 0xdff   :  { %v4510_v11 = vmax.f32 %v9530_v53, 0.0  ;;  %v7810_v5 = vor.u32 %v8512_v1, %v7807_v31  ;;  %v8534_v53 = vld [vmem:[#allocation16 + $0x28] sm:$0xff] }
 0xe01   :  { %v4530_v62 = vpack.c.bf16 %v4510_v11, %v4509_v61 }
 0xe02   :  { %v4500_v4 = vpop.f32.mrf.mxu3  ;;  %4912 = vmatpush.bf16.xpose.msrb.mxu1 %v8526_v40 }
 0xe03   :  { %4589 = vmatmul.bf16.vlgmr.msra.gmra.mxu0 %v4530_v62  ;;  %v4501_v55 = vadd.f32 %v4500_v4, %v4437_v57  ;;  %v8515_v62 = vld [vmem:[#allocation13 + $0x24] sm:$0xf0] }
 0xe04   :  { %v7814_v4 = vor.u32 %v8515_v62, %v7813_v10 }
 0xe05   :  { %v9540_v19 = vadd.f32 %v4501_v55, %v4325_v59  ;;  %v7858_v59 = vor.u32 %v8524_v0, %v7855_v35  ;;  %v7815_v55 = vld [vmem:[#allocation13 + $0x28] sm:$0xf0]  ;;  %v8511_v0 = vld [vmem:[#allocation13 + $0x4] sm:$0xf0] }
 0xe06   :  { %v7798_v24 = vor.u32 %v8511_v0, %v7797_v8  ;;  %v7799_v35 = vld [vmem:[#allocation13 + $0x8] sm:$0xf0] }
 0xe07   :  { %v4511_v9 = vmax.f32 %v9540_v19, 0.0  ;;  %4823 = vmatpush.bf16.msra.mxu3 %v7858_v59  ;;  %v8529_v59 = vld [vmem:[#allocation14 + $0x8] sm:$0xff] }
 0xe08   :  { %4893 = vmatpush.bf16.xpose.msrb.mxu0 %v8529_v59  ;;  %v8528_v19 = vld [vmem:[#allocation16 + $0x8] sm:$0xff]  ;;  %v8544_v59 = vld [vmem:[#allocation14 + $0x30] sm:$0xff] }
 0xe0a   :  { %v4502_v18 = vpop.f32.mrf.mxu3 }
 0xe0b   :  { %v4503_v63 = vadd.f32 %v4502_v18, %v4437_v57  ;;  %v7821_v57 = vld [vmem:[#allocation13 + $0x30] sm:$0xf]  ;;  %v7818_v18 = vor.u32 %v8514_v58, %v7815_v55 }
 0xe0c   :  { %v7822_v29 = vor.u32 %v8517_v39, %v7821_v57 }
 0xe0d   :  { %v9544_v14 = vadd.f32 %v4503_v63, %v4326_v44  ;;  %v8522_v44 = vld [vmem:[#allocation13 + $0x64] sm:$0xf]  ;;  %v7805_v63 = vld [vmem:[#allocation13 + $0x10] sm:$0xf] }
 0xe0e   :  { %v7850_v38 = vor.u32 %v8522_v44, %v7847_v37  ;;  %4808 = vmatpush.bf16.msra.mxu2 %v7822_v29  ;;  %v4623_v44 = vld [vmem:[#allocation17 + $0x30] ss:$0 sm:$0xff] }
 0xe0f   :  { %v4512_v28 = vmax.f32 %v9544_v14, 0.0  ;;  %v8530_v14 = vld [vmem:[#allocation16 + $0x10] sm:$0xff] }
 0xe10   :  { %4824 = vmatpush.bf16.msra.mxu3 %v7850_v38  ;;  %4941 = vmatpush.bf16.xpose.msra.mxu0 %v8531_v43 }
 0xe11   :  { %v4531_v16 = vpack.c.bf16 %v4512_v28, %v4511_v9 }
 0xe12   :  { %4809 = vmatpush.bf16.msra.mxu2 %v7814_v4 }
 0xe13   :  { %4594 = vmatmul.bf16.gmra.mxu0 %v4531_v16  ;;  %v8513_v16 = vld [vmem:[#allocation13 + $0x14] sm:$0xf0] }
 0xe14   :  { %4825 = vmatpush.bf16.msra.mxu3 %v7842_v45  ;;  %v7806_v3 = vor.u32 %v8513_v16, %v7805_v63 }
 0xe16   :  { %4810 = vmatpush.bf16.msra.mxu2 %v7806_v3  ;;  %v8535_v3 = vld [vmem:[#allocation14 + $0x18] sm:$0xff] }
 0xe18   :  { %4826 = vmatpush.bf16.msra.mxu3 %v7834_v30  ;;  %v8527_v30 = vld [vmem:[#allocation16] sm:$0xff]  ;;  %4942 = vmatpush.bf16.xpose.msra.mxu0 %v8530_v14 }
 0xe1a   :  { %4811 = vmatpush.bf16.msra.mxu2 %v7798_v24 }
 0xe1c   :  { %4827 = vmatpush.bf16.msra.mxu3 %v7826_v54 }
 0xe20   :  { %4828 = vmatpush.bf16.msra.mxu3 %v7818_v18 }
 0xe24   :  { %4829 = vmatpush.bf16.msra.mxu3 %v7810_v5 }
 0xe80   :  { %v4590_v32 = vpop.f32.mrf.mxu0 }
 0xe81   :  { %v4591_v27 = vadd.f32 %v4590_v32, %v4532_v34  ;;  %v8510_v32 = vld [vmem:[#allocation13 + $0x4] sm:$0xf] }
 0xe82   :  { %v7802_v23 = vor.u32 %v8510_v32, %v7799_v35  ;;  %v8537_v32 = vld [vmem:[#allocation16 + $0x38] sm:$0xff] }
 0xe83   :  { %v4600_v6 = vmax.f32 %v4591_v27, 0.0 }
 0xe84   :  { %4830 = vmatpush.bf16.msra.mxu3 %v7802_v23 }
 0xe88   :  { %v4592_v47 = vpop.f32.mrf.mxu0  ;;  %5031 = vmatpush.bf16.xpose.msrb.mxu3 %v8534_v53 }
 0xe89   :  { %v4593_v7 = vadd.f32 %v4592_v47, %v4532_v34 }
 0xe8b   :  { %v4601_v2 = vmax.f32 %v4593_v7, 0.0  ;;  %v8533_v7 = vld [vmem:[#allocation16 + $0x20] sm:$0xff] }
 0xe8d   :  { %v4621_v17 = vpack.c.bf16 %v4601_v2, %v4600_v6  ;;  %v8538_v6 = vld [vmem:[#allocation14 + $0x20] sm:$0xff] }
 0xe8f   :  { %4680 = vmatmul.bf16.vlgmr.msra.gmra.mxu1 %v4621_v17  ;;  %v8539_v17 = vld [vmem:[#allocation16 + $0x40] sm:$0xff] }
 0xe90   :  { %v4595_v22 = vpop.f32.mrf.mxu0  ;;  %5032 = vmatpush.bf16.xpose.msrb.mxu3 %v8533_v7  ;;  %4966 = vmatpush.bf16.xpose.msra.mxu1 %v8528_v19 }
 0xe91   :  { %v4596_v48 = vadd.f32 %v4595_v22, %v4532_v34  ;;  %v4718_v22 = vld [vmem:[#allocation17 + $0x31] ss:$8 sm:$0x3] }
 0xe93   :  { %v4602_v60 = vmax.f32 %v4596_v48, 0.0  ;;  %v4720_v48 = vperm.slane %v4718_v22, 0 }
 0xe98   :  { %v4597_v50 = vpop.f32.mrf.mxu0  ;;  %4967 = vmatpush.bf16.xpose.msra.mxu1 %v8527_v30 }
 0xe99   :  { %v4598_v49 = vadd.f32 %v4597_v50, %v4532_v34  ;;  %v4721_v50 = vperm.slane %v4718_v22, 1 }
 0xe9b   :  { %v4603_v56 = vmax.f32 %v4598_v49, 0.0 }
 0xe9d   :  { %v4622_v20 = vpack.c.bf16 %v4603_v56, %v4602_v60 }
 0xe9f   :  { %4685 = vmatmul.bf16.gmra.mxu1 %v4622_v20 }
 0xf0c   :  { %v4681_v33 = vpop.f32.mrf.mxu1 }
 0xf0d   :  { %v4682_v37 = vadd.f32 %v4681_v33, %v4623_v44  ;;  %v8546_v33 = vld [vmem:[#allocation16 + $0x68] sm:$0xff] }
 0xf0f   :  { %v4691_v38 = vadd.f32 %v4682_v37, %v4509_v61 }
 0xf11   :  { %v4695_v34 = vmax.f32 %v4691_v38, 0.0 }
 0xf14   :  { %v4683_v36 = vpop.f32.mrf.mxu1 }
 0xf15   :  { %v4684_v46 = vadd.f32 %v4683_v36, %v4623_v44 }
 0xf17   :  { %v4692_v15 = vadd.f32 %v4684_v46, %v4510_v11  ;;  %v8532_v11 = vld [vmem:[#allocation14 + $0x10] sm:$0xff] }
 0xf18   :  { %5001 = vmatpush.bf16.xpose.msrb.mxu2 %v8532_v11  ;;  %v8536_v46 = vld [vmem:[#allocation16 + $0x30] sm:$0xff] }
 0xf19   :  { %v4696_v42 = vmax.f32 %v4692_v15, 0.0  ;;  %v8545_v15 = vld [vmem:[#allocation16 + $0x60] sm:$0xff] }
 0xf1b   :  { %v4715_v12 = vpack.c.bf16 %v4696_v42, %v4695_v34 }
 0xf1c   :  { %v4686_v25 = vpop.f32.mrf.mxu1 }
 0xf1d   :  { %4812 = vmatmul.bf16.vlgmr.msra.gmra.mxu2 %v4715_v12  ;;  %4831 = vmatmul.bf16.vlgmr.msra.gmra.mxu3 %v4715_v12  ;;  %v4687_v27 = vadd.f32 %v4686_v25, %v4623_v44 }
 0xf1f   :  { %v4693_v13 = vadd.f32 %v4687_v27, %v4511_v9  ;;  %v8540_v9 = vld [vmem:[#allocation16 + $0x48] sm:$0xff] }
 0xf20   :  { %5163 = vmatpush.bf16.xpose.msra.mxu3 %v8540_v9  ;;  %5133 = vmatpush.bf16.xpose.msra.mxu2 %v8538_v6  ;;  %v8541_v6 = vld [vmem:[#allocation14 + $0x28] sm:$0xff] }
 0xf21   :  { %v4697_v61 = vmax.f32 %v4693_v13, 0.0 }
 0xf24   :  { %v4688_v45 = vpop.f32.mrf.mxu1 }
 0xf25   :  { %v4689_v21 = vadd.f32 %v4688_v45, %v4623_v44 }
 0xf27   :  { %v4694_v52 = vadd.f32 %v4689_v21, %v4512_v28 }
 0xf28   :  { %5164 = vmatpush.bf16.xpose.msra.mxu3 %v8539_v17  ;;  %v8543_v17 = vld [vmem:[#allocation16 + $0x58] sm:$0xff] }
 0xf29   :  { %v4698_v47 = vmax.f32 %v4694_v52, 0.0 }
 0xf2b   :  { %v4716_v26 = vpack.c.bf16 %v4698_v47, %v4697_v61 }
 0xf2d   :  { %4817 = vmatmul.bf16.gmra.mxu2 %v4716_v26  ;;  %4836 = vmatmul.bf16.gmra.mxu3 %v4716_v26 }
 0xfa0   :  { %v4813_v28 = vpop.f32.mrf.mxu2  ;;  %v4832_v2 = vpop.f32.mrf.mxu3 }
 0xfa1   :  { %v4814_v56 = vadd.f32 %v4813_v28, %v4720_v48  ;;  %v4833_v20 = vadd.f32 %v4832_v2, %v4721_v50 }
 0xfa3   :  { %v9560_v57 = vmax.f32 %v4814_v56, 0.0  ;;  %v9562_v39 = vmax.f32 %v4833_v20, 0.0 }
 0xfa5   :  { %v4869_v58 = vrot.slane %v9560_v57, 1  ;;  %v4973_v4 = vrot.slane %v9560_v57, 2  ;;  %v4974_v55 = vrot.slane %v9562_v39, 2  ;;  %v4870_v38 = vrot.slane %v9562_v39, 1 }
 0xfa6   :  { %v5303_v34 = vrot.slane %v9560_v57, 7  ;;  %v5304_v12 = vrot.slane %v9562_v39, 7  ;;  %v5105_v40 = vrot.slane %v9560_v57, 4  ;;  %v5106_v7 = vrot.slane %v9562_v39, 4 }
 0xfa8   :  { %v4815_v49 = vpop.f32.mrf.mxu2  ;;  %v4834_v60 = vpop.f32.mrf.mxu3 }
 0xfa9   :  { %v4816_v27 = vadd.f32 %v4815_v49, %v4720_v48  ;;  %v4835_v45 = vadd.f32 %v4834_v60, %v4721_v50  ;;  %v8552_v49 = vld [vmem:[#allocation16 + $0x88] sm:$0xff]  ;;  %v8550_v60 = vld [vmem:[#allocation14 + $0x40] sm:$0xff] }
 0xfab   :  { %v9600_v43 = vmax.f32 %v4835_v45, 0.0  ;;  %v9605_v14 = vmax.f32 %v4816_v27, 0.0  ;;  %v5171_v27 = vrot.slane %v9560_v57, 5 }
 0xfad   :  { %v5696_v20 = vrot.slane %v9600_v43, 5 }
 0xfb0   :  { %v4818_v51 = vpop.f32.mrf.mxu2  ;;  %v4837_v29 = vpop.f32.mrf.mxu3 }
 0xfb1   :  { %v4819_v41 = vadd.f32 %v4818_v51, %v4720_v48  ;;  %v4838_v54 = vadd.f32 %v4837_v29, %v4721_v50  ;;  %v5827_v51 = vrot.slane %v9605_v14, 7 }
 0xfb3   :  { %v9564_v10 = vmax.f32 %v4819_v41, 0.0  ;;  %v9566_v62 = vmax.f32 %v4838_v54, 0.0  ;;  %v5828_v54 = vrot.slane %v9600_v43, 7 }
 0xfb5   :  { %v4873_v18 = vsel %vm4856_vm2, %v4869_v58, %v9564_v10  ;;  %v4852_v63 = vrot.slane %v9564_v10, 7  ;;  %v4977_v16 = vrot.slane %v9564_v10, 1  ;;  %v4978_v1 = vrot.slane %v9566_v62, 1 }
 0xfb6   :  { %v4875_v31 = vpack.c.bf16 %v4873_v18, %v4873_v18  ;;  %v5307_v42 = vrot.slane %v9564_v10, 6  ;;  %v5308_v25 = vrot.slane %v9566_v62, 6  ;;  %v4853_v13 = vrot.slane %v9566_v62, 7 }
 0xfb7   :  { %v4857_v5 = vsel %vm4856_vm2, %v9560_v57, %v4852_v63  ;;  %v4981_v8 = vsel %vm4856_vm2, %v4973_v4, %v4977_v16  ;;  %v4982_v0 = vsel %vm4856_vm2, %v4974_v55, %v4978_v1  ;;  %v5109_v21 = vrot.slane %v9564_v10, 3  ;;  %v8542_v63 = vld [vmem:[#allocation16 + $0x50] sm:$0xff]  ;;  %v8551_v16 = vld [vmem:[#allocation16 + $0x80] sm:$0xff] }
 0xfb8   :  { %4894 = vmatmul.bf16.vlgmr.msrb.gmra.mxu0 %v4875_v31  ;;  %v4859_v24 = vpack.c.bf16 %v4857_v5, %v4857_v5  ;;  %v4983_v35 = vpack.c.bf16 %v4981_v8, %v4981_v8  ;;  %v4984_v23 = vpack.c.bf16 %v4982_v0, %v4982_v0  ;;  %v4839_v44 = vpop.f32.mrf.mxu3  ;;  %v4820_v37 = vpop.f32.mrf.mxu2  ;;  %v5110_v61 = vrot.slane %v9566_v62, 3 }
 0xfb9   :  { %5067 = vmatpush.bf16.xpose.msrb.mxu0 %v8535_v3  ;;  %v4840_v36 = vadd.f32 %v4839_v44, %v4721_v50  ;;  %v4821_v52 = vadd.f32 %v4820_v37, %v4720_v48  ;;  %v9589_v47 = vsel %vm4856_vm2, %v5303_v34, %v5307_v42  ;;  %v9592_v26 = vsel %vm4856_vm2, %v5304_v12, %v5308_v25  ;;  %v8549_v37 = vld [vmem:[#allocation16 + $0x78] sm:$0xff]  ;;  %v8548_v12 = vld [vmem:[#allocation16 + $0x70] sm:$0xff]  ;;  %v8557_v25 = vld [vmem:[#allocation16 + $0xa0] sm:$0xff] }
 0xfba   :  { %4913 = vmatmul.bf16.vlgmr.msrb.gmra.mxu1 %v4859_v24  ;;  %5002 = vmatmul.bf16.vlgmr.msrb.gmra.mxu2 %v4983_v35  ;;  %v4874_v11 = vsel %vm4856_vm2, %v4870_v38, %v9566_v62  ;;  %v4858_v19 = vsel %vm4856_vm2, %v9562_v39, %v4853_v13  ;;  %v5113_v9 = vsel %vm4856_vm2, %v5105_v40, %v5109_v21  ;;  %v5043_v18 = vrot.slane %v9564_v10, 2  ;;  %v8553_v40 = vld [vmem:[#allocation14 + $0x48] sm:$0xff] }
 0xfbb   :  { %5033 = vmatmul.bf16.vlgmr.msrb.gmra.mxu3 %v4984_v23  ;;  %5097 = vmatpush.bf16.xpose.msrb.mxu1 %v8537_v32  ;;  %v9594_v53 = vmax.f32 %v4840_v36, 0.0  ;;  %v9607_v28 = vmax.f32 %v4821_v52, 0.0  ;;  %v4876_v2 = vpack.c.bf16 %v4874_v11, %v4874_v11  ;;  %v5114_v30 = vsel %vm4856_vm2, %v5106_v7, %v5110_v61 }
 0xfbc   :  { %5295 = vmatpush.bf16.xpose.msrb.mxu3 %v8546_v33  ;;  %5265 = vmatpush.bf16.xpose.msrb.mxu2 %v8544_v59  ;;  %v4860_v48 = vpack.c.bf16 %v4858_v19, %v4858_v19  ;;  %v5115_v50 = vpack.c.bf16 %v5113_v9, %v5113_v9  ;;  %v5116_v56 = vpack.c.bf16 %v5114_v30, %v5114_v30  ;;  %v5039_v1 = vrot.slane %v9560_v57, 3  ;;  %v8547_v33 = vld [vmem:[#allocation14 + $0x38] sm:$0xff] }
 0xfbd   :  { %v5700_v22 = vrot.slane %v9594_v53, 4  ;;  %v5831_v29 = vrot.slane %v9607_v28, 6  ;;  %v5832_v58 = vrot.slane %v9594_v53, 6  ;;  %v5044_v3 = vrot.slane %v9566_v62, 2 }
 0xfbe   :  { %v5241_v31 = vrot.slane %v9564_v10, 5  ;;  %v5242_v5 = vrot.slane %v9566_v62, 5  ;;  %v5047_v8 = vsel %vm4856_vm2, %v5039_v1, %v5043_v18  ;;  %v5040_v0 = vrot.slane %v9562_v39, 3  ;;  %v8570_v18 = vld [vmem:[#allocation16 + $0xe8] sm:$0xff]  ;;  %v8560_v1 = vld [vmem:[#allocation16 + $0xb0] sm:$0xff] }
 0xfbf   :  { %v9615_v41 = vsel %vm4856_vm2, %v5696_v20, %v5700_v22  ;;  %v9620_v4 = vsel %vm4856_vm2, %v5827_v51, %v5831_v29  ;;  %v9623_v55 = vsel %vm4856_vm2, %v5828_v54, %v5832_v58  ;;  %v5237_v32 = vrot.slane %v9560_v57, 6  ;;  %v8561_v29 = vld [vmem:[#allocation16 + $0xb8] sm:$0xff] }
 0xfc0   :  { %v5238_v24 = vrot.slane %v9562_v39, 6  ;;  %v5048_v35 = vsel %vm4856_vm2, %v5040_v0, %v5044_v3  ;;  %v5049_v59 = vpack.c.bf16 %v5047_v8, %v5047_v8  ;;  %v5175_v42 = vrot.slane %v9564_v10, 4 }
 0xfc1   :  { %v5245_v23 = vsel %vm4856_vm2, %v5237_v32, %v5241_v31  ;;  %v5050_v36 = vpack.c.bf16 %v5048_v35, %v5048_v35  ;;  %v5176_v45 = vrot.slane %v9566_v62, 4  ;;  %v5371_v13 = vrot.slane %v9607_v28, 7  ;;  %v8555_v62 = vld [vmem:[#allocation16 + $0x98] sm:$0xff] }
 0xfc2   :  { %v5246_v44 = vsel %vm4856_vm2, %v5238_v24, %v5242_v5  ;;  %v5247_v38 = vpack.c.bf16 %v5245_v23, %v5245_v23  ;;  %v5372_v21 = vrot.slane %v9594_v53, 7  ;;  %v5179_v52 = vsel %vm4856_vm2, %v5171_v27, %v5175_v42  ;;  %v8565_v23 = vld [vmem:[#allocation14 + $0x68] sm:$0xff] }
 0xfc3   :  { %5098 = vmatpush.bf16.xpose.msrb.mxu1 %v8536_v46  ;;  %v8558_v46 = vld [vmem:[#allocation16 + $0xa8] sm:$0xff]  ;;  %v5248_v34 = vpack.c.bf16 %v5246_v44, %v5246_v44  ;;  %v5172_v61 = vrot.slane %v9562_v39, 5  ;;  %v5375_v10 = vsel %vm4856_vm2, %v9605_v14, %v5371_v13  ;;  %v5181_v7 = vpack.c.bf16 %v5179_v52, %v5179_v52  ;;  %v8554_v39 = vld [vmem:[#allocation16 + $0x90] sm:$0xff]  ;;  %v8567_v44 = vld [vmem:[#allocation16 + $0xd8] sm:$0xff] }
 0xfc4   :  { %5296 = vmatpush.bf16.xpose.msrb.mxu3 %v8545_v15  ;;  %v8556_v15 = vld [vmem:[#allocation14 + $0x50] sm:$0xff]  ;;  %v5376_v57 = vsel %vm4856_vm2, %v9600_v43, %v5372_v21  ;;  %v5377_v9 = vpack.c.bf16 %v5375_v10, %v5375_v10  ;;  %v5501_v22 = vrot.slane %v9607_v28, 1  ;;  %v5313_v20 = vpack.c.bf16 %v9589_v47, %v9589_v47  ;;  %v8569_v47 = vld [vmem:[#allocation16 + $0xe0] sm:$0xff] }
 0xfc5   :  { %v5180_v11 = vsel %vm4856_vm2, %v5172_v61, %v5176_v45  ;;  %v5378_v30 = vpack.c.bf16 %v5376_v57, %v5376_v57  ;;  %v5314_v54 = vpack.c.bf16 %v9592_v26, %v9592_v26  ;;  %v5435_v3 = vrot.slane %v9605_v14, 1 }
 0xfc6   :  { %v5182_v19 = vpack.c.bf16 %v5180_v11, %v5180_v11  ;;  %v5633_v31 = vrot.slane %v9607_v28, 3  ;;  %v5634_v5 = vrot.slane %v9594_v53, 3  ;;  %v5436_v8 = vrot.slane %v9600_v43, 1  ;;  %v8571_v11 = vld [vmem:[#allocation14 + $0x78] sm:$0xff] }
 0xfc7   :  { %v5439_v26 = vsel %vm4856_vm2, %v5435_v3, %v9607_v28  ;;  %v5629_v0 = vrot.slane %v9605_v14, 4  ;;  %v5630_v32 = vrot.slane %v9600_v43, 4  ;;  %v5568_v42 = vrot.slane %v9594_v53, 2 }
 0xfc8   :  { %4943 = vmatmul.bf16.vlgmr.msra.gmra.mxu0 %v4876_v2  ;;  %v8562_v2 = vld [vmem:[#allocation14 + $0x60] sm:$0xff]  ;;  %v5440_v24 = vsel %vm4856_vm2, %v5436_v8, %v9594_v53  ;;  %v5564_v45 = vrot.slane %v9600_v43, 3  ;;  %v5761_v13 = vrot.slane %v9605_v14, 6  ;;  %v5762_v21 = vrot.slane %v9600_v43, 6 }
 0xfc9   :  { %5199 = vmatpush.bf16.xpose.msra.mxu0 %v8541_v6  ;;  %v8564_v6 = vld [vmem:[#allocation16 + $0xc8] sm:$0xff]  ;;  %v5637_v35 = vsel %vm4856_vm2, %v5629_v0, %v5633_v31 }
 0xfca   :  { %4968 = vmatmul.bf16.vlgmr.msra.gmra.mxu1 %v4860_v48  ;;  %5134 = vmatmul.bf16.vlgmr.msra.gmra.mxu2 %v5115_v50  ;;  %v5502_v48 = vrot.slane %v9594_v53, 1  ;;  %v5497_v50 = vrot.slane %v9605_v14, 2  ;;  %v5572_v52 = vsel %vm4856_vm2, %v5564_v45, %v5568_v42 }
 0xfcb   :  { %5165 = vmatmul.bf16.vlgmr.msra.gmra.mxu3 %v5116_v56  ;;  %5229 = vmatpush.bf16.xpose.msra.mxu1 %v8543_v17  ;;  %v8563_v17 = vld [vmem:[#allocation16 + $0xc0] sm:$0xff]  ;;  %v8559_v56 = vld [vmem:[#allocation14 + $0x58] sm:$0xff] }
 0xfcc   :  { %5425 = vmatpush.bf16.xpose.msra.mxu3 %v8552_v49  ;;  %5395 = vmatpush.bf16.xpose.msra.mxu2 %v8550_v60  ;;  %v5498_v49 = vrot.slane %v9600_v43, 2  ;;  %v5505_v60 = vsel %vm4856_vm2, %v5497_v50, %v5501_v22  ;;  %v5699_v43 = vrot.slane %v9607_v28, 4 }
 0xfcd   :  { %v5507_v58 = vpack.c.bf16 %v5505_v60, %v5505_v60 }
 0xfce   :  { %v5506_v51 = vsel %vm4856_vm2, %v5498_v49, %v5502_v48 }
 0xfd3   :  { %5230 = vmatpush.bf16.xpose.msra.mxu1 %v8542_v63  ;;  %v8568_v63 = vld [vmem:[#allocation14 + $0x70] sm:$0xff] }
 0xfd4   :  { %5426 = vmatpush.bf16.xpose.msra.mxu3 %v8551_v16  ;;  %v5508_v16 = vpack.c.bf16 %v5506_v51, %v5506_v51 }
 0xfd8   :  { %5068 = vmatmul.bf16.vlgmr.msrb.gmra.mxu0 %v5049_v59  ;;  %v5638_v59 = vsel %vm4856_vm2, %v5630_v32, %v5634_v5 }
 0xfd9   :  { %5331 = vmatpush.bf16.xpose.msrb.mxu0 %v8547_v33  ;;  %v5441_v33 = vpack.c.bf16 %v5439_v26, %v5439_v26 }
 0xfda   :  { %5099 = vmatmul.bf16.vlgmr.msrb.gmra.mxu1 %v5050_v36  ;;  %5266 = vmatmul.bf16.vlgmr.msrb.gmra.mxu2 %v5247_v38  ;;  %v5639_v36 = vpack.c.bf16 %v5637_v35, %v5637_v35  ;;  %v5640_v38 = vpack.c.bf16 %v5638_v59, %v5638_v59 }
 0xfdb   :  { %5297 = vmatmul.bf16.vlgmr.msrb.gmra.mxu3 %v5248_v34  ;;  %5361 = vmatpush.bf16.xpose.msrb.mxu1 %v8549_v37  ;;  %v5442_v37 = vpack.c.bf16 %v5440_v24, %v5440_v24  ;;  %v5563_v34 = vrot.slane %v9605_v14, 3 }
 0xfdc   :  { %5555 = vmatpush.bf16.xpose.msrb.mxu3 %v8558_v46  ;;  %5525 = vmatpush.bf16.xpose.msrb.mxu2 %v8556_v15  ;;  %v5567_v46 = vrot.slane %v9607_v28, 2  ;;  %v8566_v15 = vld [vmem:[#allocation16 + $0xd0] sm:$0xff] }
 0xfde   :  { %v5571_v27 = vsel %vm4856_vm2, %v5563_v34, %v5567_v46 }
 0xfdf   :  { %v5573_v10 = vpack.c.bf16 %v5571_v27, %v5571_v27 }
 0xfe3   :  { %5362 = vmatpush.bf16.xpose.msrb.mxu1 %v8548_v12  ;;  %v5765_v12 = vrot.slane %v9607_v28, 5  ;;  %v5838_v28 = vpack.c.bf16 %v9623_v55, %v9623_v55 }
 0xfe4   :  { %5556 = vmatpush.bf16.xpose.msrb.mxu3 %v8557_v25  ;;  %v5766_v25 = vrot.slane %v9594_v53, 5  ;;  %v5574_v53 = vpack.c.bf16 %v5572_v52, %v5572_v52 }
 0xfe5   :  { %v5769_v61 = vsel %vm4856_vm2, %v5761_v13, %v5765_v12 }
 0xfe6   :  { %v5771_v57 = vpack.c.bf16 %v5769_v61, %v5769_v61 }
 0xfe8   :  { %5200 = vmatmul.bf16.vlgmr.msra.gmra.mxu0 %v5181_v7  ;;  %v8573_v7 = vld [vmem:[#allocation16 + $0xf8] sm:$0xff] }
 0xfe9   :  { %5459 = vmatpush.bf16.xpose.msra.mxu0 %v8553_v40  ;;  %v5770_v40 = vsel %vm4856_vm2, %v5762_v21, %v5766_v25 }
 0xfea   :  { %5231 = vmatmul.bf16.vlgmr.msra.gmra.mxu1 %v5182_v19  ;;  %5396 = vmatmul.bf16.vlgmr.msra.gmra.mxu2 %v5377_v9  ;;  %v8572_v19 = vld [vmem:[#allocation16 + $0xf0] sm:$0xff]  ;;  %v5695_v9 = vrot.slane %v9605_v14, 5 }
 0xfeb   :  { %5427 = vmatmul.bf16.vlgmr.msra.gmra.mxu3 %v5378_v30  ;;  %5489 = vmatpush.bf16.xpose.msra.mxu1 %v8555_v62  ;;  %v5772_v62 = vpack.c.bf16 %v5770_v40, %v5770_v40  ;;  %v5706_v30 = vpack.c.bf16 %v9615_v41, %v9615_v41 }
 0xfec   :  { %5687 = vmatpush.bf16.xpose.msra.mxu3 %v8564_v6  ;;  %5657 = vmatpush.bf16.xpose.msra.mxu2 %v8562_v2  ;;  %v5703_v6 = vsel %vm4856_vm2, %v5695_v9, %v5699_v43 }
 0xfed   :  { %v5705_v2 = vpack.c.bf16 %v5703_v6, %v5703_v6 }
 0xff3   :  { %5490 = vmatpush.bf16.xpose.msra.mxu1 %v8554_v39 }
 0xff4   :  { %5688 = vmatpush.bf16.xpose.msra.mxu3 %v8563_v17  ;;  %v5837_v17 = vpack.c.bf16 %v9620_v4, %v9620_v4 }
 0xff8   :  { %5332 = vmatmul.bf16.vlgmr.msrb.gmra.mxu0 %v5313_v20 }
 0xff9   :  { %5591 = vmatpush.bf16.xpose.msrb.mxu0 %v8559_v56 }
 0xffa   :  { %5363 = vmatmul.bf16.vlgmr.msrb.gmra.mxu1 %v5314_v54  ;;  %5526 = vmatmul.bf16.vlgmr.msrb.gmra.mxu2 %v5507_v58 }
 0xffb   :  { %5557 = vmatmul.bf16.vlgmr.msrb.gmra.mxu3 %v5508_v16  ;;  %5621 = vmatpush.bf16.xpose.msrb.mxu1 %v8561_v29 }
 0xffc   :  { %5819 = vmatpush.bf16.xpose.msrb.mxu3 %v8570_v18  ;;  %5789 = vmatpush.bf16.xpose.msrb.mxu2 %v8568_v63 }
0x1003   :  { %5622 = vmatpush.bf16.xpose.msrb.mxu1 %v8560_v1 }
0x1004   :  { %5820 = vmatpush.bf16.xpose.msrb.mxu3 %v8569_v47 }
0x1008   :  { %5460 = vmatmul.bf16.vlgmr.msra.gmra.mxu0 %v5441_v33 }
0x1009   :  { %5723 = vmatpush.bf16.xpose.msra.mxu0 %v8565_v23 }
0x100a   :  { %5491 = vmatmul.bf16.vlgmr.msra.gmra.mxu1 %v5442_v37  ;;  %5658 = vmatmul.bf16.vlgmr.msra.gmra.mxu2 %v5639_v36 }
0x100b   :  { %5689 = vmatmul.bf16.vlgmr.msra.gmra.mxu3 %v5640_v38  ;;  %5753 = vmatpush.bf16.xpose.msra.mxu1 %v8567_v44 }
0x1013   :  { %5754 = vmatpush.bf16.xpose.msra.mxu1 %v8566_v15 }
0x1018   :  { %5592 = vmatmul.bf16.vlgmr.msrb.gmra.mxu0 %v5573_v10 }
0x1019   :  { %5855 = vmatpush.bf16.xpose.msrb.mxu0 %v8571_v11 }
0x101a   :  { %5623 = vmatmul.bf16.vlgmr.msrb.gmra.mxu1 %v5574_v53  ;;  %5790 = vmatmul.bf16.vlgmr.msrb.gmra.mxu2 %v5771_v57 }
0x101b   :  { %5821 = vmatmul.bf16.vlgmr.msrb.gmra.mxu3 %v5772_v62  ;;  %5885 = vmatpush.bf16.xpose.msrb.mxu1 %v8573_v7 }
0x1023   :  { %5886 = vmatpush.bf16.xpose.msrb.mxu1 %v8572_v19 }
0x1028   :  { %5724 = vmatmul.bf16.vlgmr.msra.gmra.mxu0 %v5705_v2 }
0x102a   :  { %5755 = vmatmul.bf16.vlgmr.msra.gmra.mxu1 %v5706_v30 }
0x1035   :  { %v4895_v39 = vpop.f32.mrf.mxu0 }
0x1037   :  { %v4914_v22 = vpop.f32.mrf.mxu1 }
0x1038   :  { %v4915_v48 = vadd.f32 %v4914_v22, %v4895_v39  ;;  %5856 = vmatmul.bf16.vlgmr.msrb.gmra.mxu0 %v5837_v17 }
0x103a   :  { %5887 = vmatmul.bf16.vlgmr.msrb.gmra.mxu1 %v5838_v28  ;;  %v8575_v28 = vld [vmem:[%s9717_s10 + $0x8] sm:$0xff] }
0x103b   :  { %5941 = vmatpush.bf16.msra.mxu2 %v8575_v28 }
0x103d   :  { %v4897_v14 = vpop.f32.mrf.mxu0  ;;  %v5003_v50 = vpop.f32.mrf.mxu2 }
0x103e   :  { %v5007_v49 = vadd.f32 %v5003_v50, %v4915_v48  ;;  %v5034_v60 = vpop.f32.mrf.mxu3 }
0x103f   :  { %v4916_v56 = vpop.f32.mrf.mxu1 }
0x1045   :  { %v4944_v20 = vpop.f32.mrf.mxu0  ;;  %v5005_v51 = vpop.f32.mrf.mxu2 }
0x1046   :  { %v5036_v41 = vpop.f32.mrf.mxu3 }
0x1047   :  { %v4969_v29 = vpop.f32.mrf.mxu1 }
0x1048   :  { %v4970_v54 = vadd.f32 %v4969_v29, %v4944_v20 }
0x104a   :  { %v5038_v58 = vadd.f32 %v5034_v60, %v4970_v54 }
0x104d   :  { %v4946_v18 = vpop.f32.mrf.mxu0  ;;  %v5135_v4 = vpop.f32.mrf.mxu2 }
0x104e   :  { %v5166_v63 = vpop.f32.mrf.mxu3 }
0x104f   :  { %v4971_v16 = vpop.f32.mrf.mxu1 }
0x1055   :  { %v5069_v1 = vpop.f32.mrf.mxu0  ;;  %v5137_v47 = vpop.f32.mrf.mxu2 }
0x1056   :  { %v5073_v3 = vadd.f32 %v5069_v1, %v5007_v49  ;;  %v5168_v55 = vpop.f32.mrf.mxu3  ;;  %v8574_v49 = vld [vmem:[%s9717_s10] sm:$0xff]  ;;  %s8921_s10 = smov [#allocation20]  }
0x1057   :  { %v5100_v31 = vpop.f32.mrf.mxu1  ;;  %5942 = vmatpush.bf16.msra.mxu2 %v8574_v49  ;;  %s5967_s8 = sshll.u32 %s8921_s10, 4  ;;  %s5968_s8 = int_to_ptr.vmem [resolvable:$true] %s5967_s8 }
0x1058   :  { %v5104_v5 = vadd.f32 %v5100_v31, %v5038_v58  ;;  %v5139_v26 = vadd.f32 %v5135_v4, %v5073_v3 }
0x105a   :  { %v5170_v8 = vadd.f32 %v5166_v63, %v5104_v5 }
0x105d   :  { %v5071_v0 = vpop.f32.mrf.mxu0  ;;  %v5267_v32 = vpop.f32.mrf.mxu2 }
0x105e   :  { %v5298_v24 = vpop.f32.mrf.mxu3  ;;  %v5893_v0 = vld [vmem:[#allocation17 + $0x32] ss:$0 sm:$0xff] }
0x105f   :  { %v5102_v35 = vpop.f32.mrf.mxu1 }
0x1065   :  { %v5201_v23 = vpop.f32.mrf.mxu0  ;;  %v5269_v33 = vpop.f32.mrf.mxu2 }
0x1066   :  { %v5205_v59 = vadd.f32 %v5201_v23, %v5139_v26  ;;  %v5300_v44 = vpop.f32.mrf.mxu3  ;;  %v5910_v23 = vld [vmem:[#allocation17 + $0x33] ss:$0 sm:$0xff] }
0x1067   :  { %v5232_v37 = vpop.f32.mrf.mxu1 }
0x1068   :  { %v5236_v36 = vadd.f32 %v5232_v37, %v5170_v8  ;;  %v5271_v38 = vadd.f32 %v5267_v32, %v5205_v59 }
0x106a   :  { %v5302_v46 = vadd.f32 %v5298_v24, %v5236_v36 }
0x106d   :  { %v5203_v15 = vpop.f32.mrf.mxu0  ;;  %v5397_v34 = vpop.f32.mrf.mxu2 }
0x106e   :  { %v5428_v42 = vpop.f32.mrf.mxu3 }
0x106f   :  { %v5234_v12 = vpop.f32.mrf.mxu1 }
0x1075   :  { %v5333_v25 = vpop.f32.mrf.mxu0  ;;  %v5399_v27 = vpop.f32.mrf.mxu2 }
0x1076   :  { %v5430_v45 = vpop.f32.mrf.mxu3  ;;  %v5337_v22 = vadd.f32 %v5333_v25, %v5271_v38 }
0x1077   :  { %v5364_v13 = vpop.f32.mrf.mxu1  ;;  %v5918_v45 = vld [vmem:[#allocation17 + $0x34] ss:$0 sm:$0xff] }
0x1078   :  { %v5368_v50 = vadd.f32 %v5364_v13, %v5302_v46  ;;  %v5401_v60 = vadd.f32 %v5397_v34, %v5337_v22 }
0x107a   :  { %v5432_v20 = vadd.f32 %v5428_v42, %v5368_v50 }
0x107d   :  { %v5335_v21 = vpop.f32.mrf.mxu0  ;;  %v5527_v52 = vpop.f32.mrf.mxu2 }
0x107e   :  { %v5558_v61 = vpop.f32.mrf.mxu3 }
0x107f   :  { %v5366_v11 = vpop.f32.mrf.mxu1 }
0x1085   :  { %v5461_v10 = vpop.f32.mrf.mxu0  ;;  %v5529_v40 = vpop.f32.mrf.mxu2 }
0x1086   :  { %v5560_v7 = vpop.f32.mrf.mxu3  ;;  %v5465_v56 = vadd.f32 %v5461_v10, %v5401_v60 }
0x1087   :  { %v5492_v53 = vpop.f32.mrf.mxu1 }
0x1088   :  { %v5496_v29 = vadd.f32 %v5492_v53, %v5432_v20  ;;  %v5531_v18 = vadd.f32 %v5527_v52, %v5465_v56 }
0x108a   :  { %v5562_v63 = vadd.f32 %v5558_v61, %v5496_v29 }
0x108d   :  { %v5463_v57 = vpop.f32.mrf.mxu0  ;;  %v5659_v62 = vpop.f32.mrf.mxu2 }
0x108e   :  { %v5690_v43 = vpop.f32.mrf.mxu3 }
0x108f   :  { %v5494_v19 = vpop.f32.mrf.mxu1 }
0x1095   :  { %v5593_v9 = vpop.f32.mrf.mxu0  ;;  %v5661_v6 = vpop.f32.mrf.mxu2 }
0x1096   :  { %v5692_v2 = vpop.f32.mrf.mxu3  ;;  %v5597_v4 = vadd.f32 %v5593_v9, %v5531_v18 }
0x1097   :  { %v5624_v30 = vpop.f32.mrf.mxu1 }
0x1098   :  { %v5628_v16 = vadd.f32 %v5624_v30, %v5562_v63  ;;  %v5663_v47 = vadd.f32 %v5659_v62, %v5597_v4 }
0x109a   :  { %v5694_v31 = vadd.f32 %v5690_v43, %v5628_v16 }
0x109d   :  { %v5595_v39 = vpop.f32.mrf.mxu0  ;;  %v5791_v17 = vpop.f32.mrf.mxu2 }
0x109e   :  { %v5822_v48 = vpop.f32.mrf.mxu3 }
0x109f   :  { %v5626_v14 = vpop.f32.mrf.mxu1 }
0x10a5   :  { %v5725_v51 = vpop.f32.mrf.mxu0  ;;  %v5793_v41 = vpop.f32.mrf.mxu2 }
0x10a6   :  { %v5824_v54 = vpop.f32.mrf.mxu3  ;;  %v5729_v55 = vadd.f32 %v5725_v51, %v5663_v47 }
0x10a7   :  { %v5756_v58 = vpop.f32.mrf.mxu1 }
0x10a8   :  { %v5760_v5 = vadd.f32 %v5756_v58, %v5694_v31  ;;  %v5795_v26 = vadd.f32 %v5791_v17, %v5729_v55 }
0x10aa   :  { %v5826_v24 = vadd.f32 %v5822_v48, %v5760_v5 }
0x10ad   :  { %v5727_v1 = vpop.f32.mrf.mxu0 }
0x10af   :  { %v5758_v3 = vpop.f32.mrf.mxu1 }
0x10b5   :  { %v5857_v8 = vpop.f32.mrf.mxu0 }
0x10b6   :  { %v5861_v32 = vadd.f32 %v5857_v8, %v5795_v26 }
0x10b7   :  { %v5888_v35 = vpop.f32.mrf.mxu1 }
0x10b8   :  { %v5894_v33 = vadd.f32 %v5893_v0, %v5861_v32  ;;  %v5892_v59 = vadd.f32 %v5888_v35, %v5826_v24 }
0x10ba   :  { %v5911_v44 = vadd.f32 %v5910_v23, %v5892_v59  ;;  %v5896_v37 = vsel %vm5895_vm3, %v5894_v33, -inf }
0x10bb   :  { %5897 = vmax.xlane.f32.xlu2 %v5896_v37 }
0x10bc   :  { %v5912_v36 = vmax.f32 %v5911_v44, 0.0 }
0x10bd   :  { %v5859_v38 = vpop.f32.mrf.mxu0 }
0x10be   :  { %v5917_v46 = vpack.c.bf16 %v5912_v36, %v5912_v36 }
0x10bf   :  { %v5890_v15 = vpop.f32.mrf.mxu1 }
0x10c0   :  { %8059 = vmatmul.msk.bf16.vlgmr.msra.gmra.mxu2 %vm5931_vm4, %v5917_v46 }
0x112e   :  { %v5898_v34 = vpop.xlane.xlu2 %5897 }
0x112f   :  { %v5899_v42 = vsub.f32 %v5894_v33, %v5898_v34 }
0x1131   :  { %v5900_v12 = vmul.f32 1.442695, %v5899_v42 }
0x1133   :  { %8595 = vpow2.f32 %v5900_v12 }
0x1139   :  { %v8596_v25 = vpop.eup %8595 }
0x113a   :  { %v5902_v27 = vsel %vm5895_vm3, %v8596_v25, 0.0 }
0x113b   :  { %5903 = vadd.xlane.f32.xlu2 %v5902_v27 }
0x1143   :  { %v5944_v13 = vpop.f32.mrf.mxu2 }
0x1144   :  { %v5945_v21 = vadd.f32 %v5944_v13, %v5918_v45 }
0x1146   :  { %8597 = vtanh.f32 %v5945_v21 }
0x114b   :  { %v5946_v52 = vpop.f32.mrf.mxu2 }
0x114c   :  { %v8598_v61 = vpop.eup %8597 }
0x114d   :  { %5950 = vst.msk [vmem:[#allocation20] sm:$0x3] %vm5949_vm5, %v8598_v61 }
0x114e   :  { %5972 = dma.vmem_to_hbm [thread:$0]  %s5968_s8, 32, %s5970_s19, [#allocation21]  }
0x11ae   :  { %v5904_v11 = vpop.xlane.xlu2 %5903 }
0x11af   :  { %8599 = vlog2.f32 %v5904_v11 }
0x11b5   :  { %v8600_v10 = vpop.eup %8599 }
0x11b6   :  { %v5906_v40 = vmul.f32 0.6931472, %v8600_v10 }
0x11b8   :  { %v5907_v7 = vadd.f32 %v5906_v40, %v5898_v34 }
0x11ba   :  { %v5908_v53 = vsub.f32 %v5894_v33, %v5907_v7 }
0x11bc   :  { %5909 = vst.msk [vmem:[#allocation19] sm:$0x3] %vm5895_vm3, %v5908_v53 }
0x11bd   :  { %5961 = dma.vmem_to_hbm [thread:$0]  %s5957_s9, 32, %s5959_s11, [#allocation4]  }
0x11be   :  { %8901 = dma.done.wait [#allocation4], 32  }
0x11bf   :  { %8902 = vsyncadd [#allocation4], 4294967264 }
0x11c0   :  { %8903 = dma.done.wait [#allocation21], 32  }
0x11c1   :  { %8904 = vsyncadd [#allocation21], 4294967264 }
0x11c2   :  { %5981 = vsyncpa [#allocation3], 1 }
0x11c3   :  { %5982 = vsyncpa [#allocation6], 1 }
0x11c4   :  { %5983 = vsyncpa [#allocation9], 1 }
0x11c5   :  { %5984 = vsyncpa [#allocation12], 1 }
0x11c6   :  { %5985 = vsyncpa [#allocation15], 1 }
0x11c7   :  { %5986 = vsyncpa [#allocation18], 1 }
0x11c8   :  { %5987 = vsyncpa [#allocation4], 1 }
0x11c9   :  { %5988 = vsyncpa [#allocation21], 1 }

</bundles_post_ra>
